<compile_context>
chip_gen: v5e
topology: v5e:2x2
jax: 0.10.0
libtpu: 0.0.40
codegen_flags: <defaults>
</compile_context>

<pallas_src>
import jax
import jax.numpy as jnp
from jax.experimental import pallas as pl
from jax.experimental.pallas import tpu as pltpu

LANE = 128


def _ru(x, m):
    return ((x + m - 1) // m) * m


# ---------------------------------------------------------------------------
# Parameter packing (BN fold, channel padding, bf16 weights) — trace time
# ---------------------------------------------------------------------------
def _fold_bn(w, b, gamma, beta, mean, var, eps=1e-5):
    """Fold inference-mode BN into conv weight/bias. w: (cout, cin, kh, kw)."""
    scale = gamma / jnp.sqrt(var + eps)
    return w * scale[:, None, None, None], scale * (b - mean) + beta


def _pack3x3_taps(w, bias, cin_p, cout_p):
    """(cout,cin,3,3) -> (9, cin_p, cout_p) bf16 tap matrices + (1,cout_p) f32."""
    cout, cin = w.shape[0], w.shape[1]
    wt = jnp.transpose(w, (2, 3, 1, 0))                       # (3,3,cin,cout)
    wt = jnp.pad(wt, ((0, 0), (0, 0), (0, cin_p - cin), (0, cout_p - cout)))
    wt = wt.reshape(9, cin_p, cout_p).astype(jnp.bfloat16)
    b = jnp.pad(bias, (0, cout_p - cout)).reshape(1, cout_p).astype(jnp.float32)
    return wt, b


def _pack3x3_im2col(w, bias, k_p, cout_p):
    """(cout,cin,3,3) -> (k_p, cout_p) bf16 im2col weight (K = 9*cin packed)."""
    cout, cin = w.shape[0], w.shape[1]
    wt = jnp.transpose(w, (2, 3, 1, 0)).reshape(9 * cin, cout)
    wt = jnp.pad(wt, ((0, k_p - 9 * cin), (0, cout_p - cout))).astype(jnp.bfloat16)
    b = jnp.pad(bias, (0, cout_p - cout)).reshape(1, cout_p).astype(jnp.float32)
    return wt, b


def _pack1x1(w, bias, cin_p, cout_p):
    cout, cin = w.shape[0], w.shape[1]
    wt = jnp.transpose(w[:, :, 0, 0])                         # (cin, cout)
    wt = jnp.pad(wt, ((0, cin_p - cin), (0, cout_p - cout))).astype(jnp.bfloat16)
    b = jnp.pad(bias, (0, cout_p - cout)).reshape(1, cout_p).astype(jnp.float32)
    return wt, b


# ---------------------------------------------------------------------------
# Fused forward (single pallas_call)
# ---------------------------------------------------------------------------
def yolo_custom_forward(x_nchw, params):
    B, cin, H, W = x_nchw.shape
    assert H % 8 == 0 and W % 8 == 0, "spatial dims must survive 3 stride-2 pools"
    assert 9 * cin <= LANE, "stage-1 im2col packing assumes 9*Cin <= 128"

    # ---- static geometry ----------------------------------------------------
    H1, W1 = H, W                         # stage-1 conv spatial (compact rows)
    H2, W2 = H // 2, W // 2               # stage-2 conv spatial
    H3, W3 = H // 4, W // 4               # stage-3 conv spatial
    H4, W4 = H // 8, W // 8               # neck / head spatial
    WP2, WP3, WP4 = _ru(W2 + 2, 8), _ru(W3 + 2, 8), _ru(W4 + 2, 8)  # pitches
    M1 = H1 * W1                          # conv-output rows per stage
    M2, M3, M4 = H2 * WP2, H3 * WP3, H4 * WP4
    R2 = _ru((H2 + 2) * WP2 + 2, 8)       # pitched-padded input scratch rows
    R3 = _ru((H3 + 2) * WP3 + 2, 8)
    R4 = _ru((H4 + 2) * WP4 + 2, 8)
    R_ACC = _ru(max(M1, M2, M3), 8)       # f32 conv-output scratch rows
    R_OUT = _ru(H4 * W4, 8)

    # ---- channels / paddings ------------------------------------------------
    (w1q, b1q, g1, be1, m1, v1), (w2q, b2q, g2, be2, m2, v2), \
        (w3q, b3q, g3, be3, m3, v3) = params["backbone"]
    w4q, b4q, g4, be4, m4, v4 = params["neck"]
    whq, bhq = params["head"]
    C1, C2, C3, C4, CH = (w1q.shape[0], w2q.shape[0], w3q.shape[0],
                          w4q.shape[0], whq.shape[0])
    C1P, C2P, C3P, C4P, CHP = (_ru(C1, LANE), _ru(C2, LANE), _ru(C3, LANE),
                               _ru(C4, LANE), _ru(CH, LANE))
    assert C1P == C2P == C3P            # shared acc / scratch lane width (128)
    KP = LANE                           # stage-1 im2col K (9*cin -> 128)

    # ---- fold BN + pack weights (bf16 MXU operands, f32 biases) -------------
    w1f, b1f = _fold_bn(w1q, b1q, g1, be1, m1, v1)
    w2f, b2f = _fold_bn(w2q, b2q, g2, be2, m2, v2)
    w3f, b3f = _fold_bn(w3q, b3q, g3, be3, m3, v3)
    w4f, b4f = _fold_bn(w4q, b4q, g4, be4, m4, v4)
    w1, b1 = _pack3x3_im2col(w1f, b1f, KP, C1P)
    w2, b2 = _pack3x3_taps(w2f, b2f, C1P, C2P)
    w3, b3 = _pack3x3_taps(w3f, b3f, C2P, C3P)
    w4, b4 = _pack3x3_taps(w4f, b4f, C3P, C4P)
    wh, bh = _pack1x1(whq, bhq, C4P, CHP)

    # ---- stage-1 im2col in the wrapper (K = 9*cin, tiny) --------------------
    x = jnp.transpose(x_nchw, (0, 2, 3, 1)).astype(jnp.float32)        # NHWC
    xp = jnp.pad(x, ((0, 0), (1, 1), (1, 1), (0, 0)))
    taps = [xp[:, ky:ky + H, kx:kx + W, :] for ky in range(3) for kx in range(3)]
    xim = jnp.concatenate(taps, axis=-1)                               # (B,H,W,9*cin)
    xim = jnp.pad(xim, ((0, 0), (0, 0), (0, 0), (0, KP - 9 * cin)))
    x1 = xim.reshape(B, M1, KP).astype(jnp.bfloat16)

    # ---- the fused kernel ----------------------------------------------------
    def kernel(x1_ref, w1_ref, b1_ref, w2_ref, b2_ref, w3_ref, b3_ref,
               w4_ref, b4_ref, wh_ref, bh_ref, o_ref,
               acc_ref, a2_ref, a3_ref, a4_ref):
        f32 = jnp.float32

        # Padding of the pitched inter-stage buffers must be exact zeros.
        a2_ref[...] = jnp.zeros_like(a2_ref)
        a3_ref[...] = jnp.zeros_like(a3_ref)
        a4_ref[...] = jnp.zeros_like(a4_ref)

        def conv3x3(a_ref, w_ref, b_ref, m, pitch):
            # 9 constant-row-offset taps, value-accumulated; bias+ReLU fused.
            y = jnp.dot(a_ref[pl.ds(0, m), :], w_ref[0],
                        preferred_element_type=f32)
            for t in range(1, 9):
                ky, kx = divmod(t, 3)
                y = y + jnp.dot(a_ref[pl.ds(ky * pitch + kx, m), :], w_ref[t],
                                preferred_element_type=f32)
            return jnp.maximum(y + b_ref[...], 0.0)

        def pool_repack(h_out, w_out, src_pitch, dst_ref, dst_pitch):
            # 2x2 max pool of acc_ref (pitched conv output) + scatter into the
            # next stage's pitched-padded bf16 layout: strided reads, no MXU.
            for i2 in range(h_out):
                base = 2 * i2 * src_pitch
                t00 = acc_ref[pl.ds(base, w_out, stride=2), :]
                t01 = acc_ref[pl.ds(base + 1, w_out, stride=2), :]
                t10 = acc_ref[pl.ds(base + src_pitch, w_out, stride=2), :]
                t11 = acc_ref[pl.ds(base + src_pitch + 1, w_out, stride=2), :]
                pooled = jnp.maximum(jnp.maximum(t00, t01),
                                     jnp.maximum(t10, t11))
                dst_ref[pl.ds((i2 + 1) * dst_pitch + 1, w_out), :] = (
                    pooled.astype(dst_ref.dtype))

        # stage 1: Conv3x3(cin->32)+BN+ReLU as ONE im2col dot, then pool.
        y1 = jnp.dot(x1_ref[...], w1_ref[...], preferred_element_type=f32)
        acc_ref[pl.ds(0, M1), :] = jnp.maximum(y1 + b1_ref[...], 0.0)
        pool_repack(H2, W2, W1, a2_ref, WP2)          # stage-1 rows are compact

        # stage 2: Conv3x3(32->64)+BN+ReLU, then pool.
        acc_ref[pl.ds(0, M2), :] = conv3x3(a2_ref, w2_ref, b2_ref, M2, WP2)
        pool_repack(H3, W3, WP2, a3_ref, WP3)

        # stage 3: Conv3x3(64->128)+BN+ReLU, then pool.
        acc_ref[pl.ds(0, M3), :] = conv3x3(a3_ref, w3_ref, b3_ref, M3, WP3)
        pool_repack(H4, W4, WP3, a4_ref, WP4)

        # neck Conv3x3(128->256)+BN+ReLU fused with the 1x1 head conv.
        y4 = conv3x3(a4_ref, w4_ref, b4_ref, M4, WP4)              # (M4, 256)
        head = jnp.dot(y4.astype(jnp.bfloat16), wh_ref[...],
                       preferred_element_type=f32) + bh_ref[...]

        # Compact the valid pitched rows into H4*W4 contiguous output rows.
        o_ref[...] = jnp.zeros_like(o_ref)
        for i in range(H4):
            o_ref[pl.ds(i * W4, W4), :] = head[i * WP4:i * WP4 + W4, :]

    flops_per_b = 2 * (M1 * KP * C1P + 9 * M2 * C1P * C2P + 9 * M3 * C2P * C3P
                       + 9 * M4 * C3P * C4P + M4 * C4P * CHP)
    bytes_acc = int(x1.size * 2
                    + (w1.size + w2.size + w3.size + w4.size + wh.size) * 2
                    + (b1.size + b2.size + b3.size + b4.size + bh.size) * 4
                    + B * R_OUT * CHP * 4)

    out = pl.pallas_call(
        kernel,
        out_shape=jax.ShapeDtypeStruct((B, R_OUT, CHP), jnp.float32),
        grid=(B,),
        in_specs=[
            pl.BlockSpec((None, M1, KP), lambda b: (b, 0, 0)),     # im2col input
            pl.BlockSpec((KP, C1P), lambda b: (0, 0)),             # stage-1 weight
            pl.BlockSpec((1, C1P), lambda b: (0, 0)),
            pl.BlockSpec((9, C1P, C2P), lambda b: (0, 0, 0)),      # stage-2 taps
            pl.BlockSpec((1, C2P), lambda b: (0, 0)),
            pl.BlockSpec((9, C2P, C3P), lambda b: (0, 0, 0)),      # stage-3 taps
            pl.BlockSpec((1, C3P), lambda b: (0, 0)),
            pl.BlockSpec((9, C3P, C4P), lambda b: (0, 0, 0)),      # neck taps
            pl.BlockSpec((1, C4P), lambda b: (0, 0)),
            pl.BlockSpec((C4P, CHP), lambda b: (0, 0)),            # 1x1 head
            pl.BlockSpec((1, CHP), lambda b: (0, 0)),
        ],
        out_specs=pl.BlockSpec((None, R_OUT, CHP), lambda b: (b, 0, 0)),
        scratch_shapes=[
            pltpu.VMEM((R_ACC, C1P), jnp.float32),   # conv-output scratch
            pltpu.VMEM((R2, C1P), jnp.bfloat16),     # stage-2 pitched input
            pltpu.VMEM((R3, C2P), jnp.bfloat16),     # stage-3 pitched input
            pltpu.VMEM((R4, C3P), jnp.bfloat16),     # neck pitched input
        ],
        compiler_params=pltpu.CompilerParams(
            dimension_semantics=("parallel",)),
        cost_estimate=pl.CostEstimate(flops=B * flops_per_b, transcendentals=0,
                                      bytes_accessed=bytes_acc),
    )(x1, w1, b1, w2, b2, w3, b3, w4, b4, wh, bh)

    out = out[:, :H4 * W4, :CH].reshape(B, H4, W4, CH)
    return jnp.transpose(out, (0, 3, 1, 2))           # NHWC -> NCHW


# ---------------------------------------------------------------------------
# Pure-JAX reference (inference-mode BN), for correctness checking
# ---------------------------------------------------------------------------
def _ref_forward(x_nchw, params, eps=1e-5):
    dn = ("NHWC", "HWIO", "NHWC")
    x = jnp.transpose(x_nchw, (0, 2, 3, 1)).astype(jnp.float32)

    def conv(x, w, b):
        wt = jnp.transpose(w, (2, 3, 1, 0))
        return jax.lax.conv_general_dilated(
            x, wt, (1, 1), "SAME", dimension_numbers=dn) + b

    def bn(x, g, bt, m, v):
        return (x - m) / jnp.sqrt(v + eps) * g + bt

    for (w, b, g, bt, m, v) in params["backbone"]:
        x = jnp.maximum(bn(conv(x, w, b), g, bt, m, v), 0.0)
        x = jax.lax.reduce_window(x, -jnp.inf, jax.lax.max,
                                  (1, 2, 2, 1), (1, 2, 2, 1), "VALID")
    w, b, g, bt, m, v = params["neck"]
    x = jnp.maximum(bn(conv(x, w, b), g, bt, m, v), 0.0)
    hw, hb = params["head"]
    x = conv(x, hw, hb)
    return jnp.transpose(x, (0, 3, 1, 2))


# ---------------------------------------------------------------------------
# Deterministic synthetic parameters (not a checkpoint)
# ---------------------------------------------------------------------------
def init_params(key, num_classes=58, input_channels=3):
    def conv_init(k, cout, cin, ksz):
        kw, kb = jax.random.split(k)
        fan_in = cin * ksz * ksz
        w = jax.random.normal(kw, (cout, cin, ksz, ksz), jnp.float32) / jnp.sqrt(fan_in)
        b = 0.01 * jax.random.normal(kb, (cout,), jnp.float32)
        return w, b

    def bn_init(k, c):
        k1, k2, k3, k4 = jax.random.split(k, 4)
        gamma = 1.0 + 0.1 * jax.random.normal(k1, (c,), jnp.float32)
        beta = 0.1 * jax.random.normal(k2, (c,), jnp.float32)
        mean = 0.1 * jax.random.normal(k3, (c,), jnp.float32)
        var = 0.5 + jax.random.uniform(k4, (c,), jnp.float32)
        return gamma, beta, mean, var

    keys = jax.random.split(key, 10)
    chans = [(input_channels, 32), (32, 64), (64, 128)]
    backbone = []
    for i, (ci, co) in enumerate(chans):
        w, b = conv_init(keys[2 * i], co, ci, 3)
        backbone.append((w, b) + bn_init(keys[2 * i + 1], co))
    nw, nb = conv_init(keys[6], 256, 128, 3)
    neck = (nw, nb) + bn_init(keys[7], 256)
    head_c = (num_classes + 5) * 3
    hw, hb = conv_init(keys[8], head_c, 256, 1)
    return {"backbone": backbone, "neck": neck, "head": (hw, hb)}


if __name__ == "__main__":
    key = jax.random.PRNGKey(0)
    k_param, k_x = jax.random.split(key)

    num_classes = 58
    params = init_params(k_param, num_classes=num_classes, input_channels=3)

    # small input consistent with the module: batch=2, 3 channels, 16x16
    x = jax.random.normal(k_x, (2, 3, 16, 16), jnp.float32)

    fwd = jax.jit(lambda inp: yolo_custom_forward(inp, params))
    out = fwd(x)
    jax.block_until_ready(out)

    expected_shape = (2, (num_classes + 5) * 3, 2, 2)  # (2, 189, 2, 2)
    assert out.shape == expected_shape, (out.shape, expected_shape)
    assert bool(jnp.all(jnp.isfinite(out)))

    # sanity vs a pure-JAX f32 reference (bf16 MXU operands -> loose tolerance)
    ref = jax.jit(lambda inp: _ref_forward(inp, params))(x)
    rel_err = float(jnp.max(jnp.abs(out - ref)) / (jnp.max(jnp.abs(ref)) + 1e-6))
    assert rel_err < 0.1, f"relative error too large: {rel_err}"

    print("KERNEL_OK")
</pallas_src>

<mosaic_0001>
module attributes {stable_mosaic.version = 11 : i64} {
  func.func @kernel(%arg0: i32, %arg1: memref<1x256x128xbf16, #tpu.memory_space<vmem>>, %arg2: memref<128x128xbf16, #tpu.memory_space<vmem>>, %arg3: memref<1x128xf32, #tpu.memory_space<vmem>>, %arg4: memref<9x128x128xbf16, #tpu.memory_space<vmem>>, %arg5: memref<1x128xf32, #tpu.memory_space<vmem>>, %arg6: memref<9x128x128xbf16, #tpu.memory_space<vmem>>, %arg7: memref<1x128xf32, #tpu.memory_space<vmem>>, %arg8: memref<9x128x256xbf16, #tpu.memory_space<vmem>>, %arg9: memref<1x256xf32, #tpu.memory_space<vmem>>, %arg10: memref<256x256xbf16, #tpu.memory_space<vmem>>, %arg11: memref<1x256xf32, #tpu.memory_space<vmem>>, %arg12: memref<1x8x256xf32, #tpu.memory_space<vmem>>, %arg13: memref<256x128xf32, #tpu.memory_space<vmem>>, %arg14: memref<168x128xbf16, #tpu.memory_space<vmem>>, %arg15: memref<56x128xbf16, #tpu.memory_space<vmem>>, %arg16: memref<40x128xbf16, #tpu.memory_space<vmem>>) attributes {dimension_semantics = [#tpu.dimension_semantics<parallel>], iteration_bounds = array<i64: 2>, scalar_prefetch = 0 : i64, scratch_operands = 4 : i64, tpu.core_type = #tpu.core_type<tc>, window_params = [{transform_indices = @transform_0, window_bounds = array<i64: 1, 256, 128>}, {pipeline_mode = #tpu.pipeline_mode<synchronous>, transform_indices = @transform_1, window_bounds = array<i64: 128, 128>}, {pipeline_mode = #tpu.pipeline_mode<synchronous>, transform_indices = @transform_2, window_bounds = array<i64: 1, 128>}, {pipeline_mode = #tpu.pipeline_mode<synchronous>, transform_indices = @transform_3, window_bounds = array<i64: 9, 128, 128>}, {pipeline_mode = #tpu.pipeline_mode<synchronous>, transform_indices = @transform_4, window_bounds = array<i64: 1, 128>}, {pipeline_mode = #tpu.pipeline_mode<synchronous>, transform_indices = @transform_5, window_bounds = array<i64: 9, 128, 128>}, {pipeline_mode = #tpu.pipeline_mode<synchronous>, transform_indices = @transform_6, window_bounds = array<i64: 1, 128>}, {pipeline_mode = #tpu.pipeline_mode<synchronous>, transform_indices = @transform_7, window_bounds = array<i64: 9, 128, 256>}, {pipeline_mode = #tpu.pipeline_mode<synchronous>, transform_indices = @transform_8, window_bounds = array<i64: 1, 256>}, {pipeline_mode = #tpu.pipeline_mode<synchronous>, transform_indices = @transform_9, window_bounds = array<i64: 256, 256>}, {pipeline_mode = #tpu.pipeline_mode<synchronous>, transform_indices = @transform_10, window_bounds = array<i64: 1, 256>}, {transform_indices = @transform_11, window_bounds = array<i64: 1, 8, 256>}]} {
    %cst = arith.constant 0.000000e+00 : bf16
    %0 = vector.broadcast %cst : bf16 to vector<168x128xbf16>
    %c0 = arith.constant 0 : index
    %c0_0 = arith.constant 0 : index
    %1 = vector.load %arg14[%c0, %c0_0] : memref<168x128xbf16, #tpu.memory_space<vmem>>, vector<168x128xbf16>
    tpu.vector_store %arg14[%c0, %c0_0], %0 {strides = array<i32>} : memref<168x128xbf16, #tpu.memory_space<vmem>>, vector<168x128xbf16>,
    %cst_1 = arith.constant 0.000000e+00 : bf16
    %2 = vector.broadcast %cst_1 : bf16 to vector<56x128xbf16>
    %c0_2 = arith.constant 0 : index
    %c0_3 = arith.constant 0 : index
    %3 = vector.load %arg15[%c0_2, %c0_3] : memref<56x128xbf16, #tpu.memory_space<vmem>>, vector<56x128xbf16>
    tpu.vector_store %arg15[%c0_2, %c0_3], %2 {strides = array<i32>} : memref<56x128xbf16, #tpu.memory_space<vmem>>, vector<56x128xbf16>,
    %cst_4 = arith.constant 0.000000e+00 : bf16
    %4 = vector.broadcast %cst_4 : bf16 to vector<40x128xbf16>
    %c0_5 = arith.constant 0 : index
    %c0_6 = arith.constant 0 : index
    %5 = vector.load %arg16[%c0_5, %c0_6] : memref<40x128xbf16, #tpu.memory_space<vmem>>, vector<40x128xbf16>
    tpu.vector_store %arg16[%c0_5, %c0_6], %4 {strides = array<i32>} : memref<40x128xbf16, #tpu.memory_space<vmem>>, vector<40x128xbf16>,
    %c0_7 = arith.constant 0 : index
    %c0_8 = arith.constant 0 : index
    %c0_9 = arith.constant 0 : index
    %6 = vector.load %arg1[%c0_7, %c0_8, %c0_9] : memref<1x256x128xbf16, #tpu.memory_space<vmem>>, vector<1x256x128xbf16>
    %7 = vector.shape_cast %6 : vector<1x256x128xbf16> to vector<256x128xbf16>
    %c0_10 = arith.constant 0 : index
    %c0_11 = arith.constant 0 : index
    %8 = vector.load %arg2[%c0_10, %c0_11] : memref<128x128xbf16, #tpu.memory_space<vmem>>, vector<128x128xbf16>
    %cst_12 = arith.constant dense<0.000000e+00> : vector<256x128xf32>
    %9 = tpu.matmul %7, %8, %cst_12 {dimension_numbers = #tpu.dot_dimension_numbers<[1], [0], [0], [1], [0, 0, 1, 1], [], []>} : vector<256x128xbf16>, vector<128x128xbf16>, vector<256x128xf32> -> vector<256x128xf32>
    %c0_13 = arith.constant 0 : index
    %c0_14 = arith.constant 0 : index
    %10 = vector.load %arg3[%c0_13, %c0_14] : memref<1x128xf32, #tpu.memory_space<vmem>>, vector<1x128xf32>
    %11 = vector.broadcast %10 : vector<1x128xf32> to vector<256x128xf32>
    %12 = arith.addf %9, %11 : vector<256x128xf32>
    %cst_15 = arith.constant 0.000000e+00 : f32
    %13 = vector.broadcast %cst_15 : f32 to vector<256x128xf32>
    %14 = arith.maximumf %12, %13 : vector<256x128xf32>
    %c0_16 = arith.constant 0 : index
    %c0_17 = arith.constant 0 : index
    %15 = vector.load %arg13[%c0_16, %c0_17] : memref<256x128xf32, #tpu.memory_space<vmem>>, vector<256x128xf32>
    tpu.vector_store %arg13[%c0_16, %c0_17], %14 {strides = array<i32>} : memref<256x128xf32, #tpu.memory_space<vmem>>, vector<256x128xf32>,
    %c0_18 = arith.constant 0 : index
    %c0_19 = arith.constant 0 : index
    %16 = tpu.strided_load %arg13[%c0_18, %c0_19] {strides = array<i32: 2, 1>} : memref<256x128xf32, #tpu.memory_space<vmem>>, vector<8x128xf32>
    %c1 = arith.constant 1 : index
    %c0_20 = arith.constant 0 : index
    %17 = tpu.strided_load %arg13[%c1, %c0_20] {strides = array<i32: 2, 1>} : memref<256x128xf32, #tpu.memory_space<vmem>>, vector<8x128xf32>
    %c16 = arith.constant 16 : index
    %c0_21 = arith.constant 0 : index
    %18 = tpu.strided_load %arg13[%c16, %c0_21] {strides = array<i32: 2, 1>} : memref<256x128xf32, #tpu.memory_space<vmem>>, vector<8x128xf32>
    %c17 = arith.constant 17 : index
    %c0_22 = arith.constant 0 : index
    %19 = tpu.strided_load %arg13[%c17, %c0_22] {strides = array<i32: 2, 1>} : memref<256x128xf32, #tpu.memory_space<vmem>>, vector<8x128xf32>
    %20 = arith.maximumf %16, %17 : vector<8x128xf32>
    %21 = arith.maximumf %18, %19 : vector<8x128xf32>
    %22 = arith.maximumf %20, %21 : vector<8x128xf32>
    %23 = arith.truncf %22 : vector<8x128xf32> to vector<8x128xbf16>
    %c17_23 = arith.constant 17 : index
    %c0_24 = arith.constant 0 : index
    %24 = vector.load %arg14[%c17_23, %c0_24] : memref<168x128xbf16, #tpu.memory_space<vmem>>, vector<8x128xbf16>
    tpu.vector_store %arg14[%c17_23, %c0_24], %23 {strides = array<i32>} : memref<168x128xbf16, #tpu.memory_space<vmem>>, vector<8x128xbf16>,
    %c32 = arith.constant 32 : index
    %c0_25 = arith.constant 0 : index
    %25 = tpu.strided_load %arg13[%c32, %c0_25] {strides = array<i32: 2, 1>} : memref<256x128xf32, #tpu.memory_space<vmem>>, vector<8x128xf32>
    %c33 = arith.constant 33 : index
    %c0_26 = arith.constant 0 : index
    %26 = tpu.strided_load %arg13[%c33, %c0_26] {strides = array<i32: 2, 1>} : memref<256x128xf32, #tpu.memory_space<vmem>>, vector<8x128xf32>
    %c48 = arith.constant 48 : index
    %c0_27 = arith.constant 0 : index
    %27 = tpu.strided_load %arg13[%c48, %c0_27] {strides = array<i32: 2, 1>} : memref<256x128xf32, #tpu.memory_space<vmem>>, vector<8x128xf32>
    %c49 = arith.constant 49 : index
    %c0_28 = arith.constant 0 : index
    %28 = tpu.strided_load %arg13[%c49, %c0_28] {strides = array<i32: 2, 1>} : memref<256x128xf32, #tpu.memory_space<vmem>>, vector<8x128xf32>
    %29 = arith.maximumf %25, %26 : vector<8x128xf32>
    %30 = arith.maximumf %27, %28 : vector<8x128xf32>
    %31 = arith.maximumf %29, %30 : vector<8x128xf32>
    %32 = arith.truncf %31 : vector<8x128xf32> to vector<8x128xbf16>
    %c33_29 = arith.constant 33 : index
    %c0_30 = arith.constant 0 : index
    %33 = vector.load %arg14[%c33_29, %c0_30] : memref<168x128xbf16, #tpu.memory_space<vmem>>, vector<8x128xbf16>
    tpu.vector_store %arg14[%c33_29, %c0_30], %32 {strides = array<i32>} : memref<168x128xbf16, #tpu.memory_space<vmem>>, vector<8x128xbf16>,
    %c64 = arith.constant 64 : index
    %c0_31 = arith.constant 0 : index
    %34 = tpu.strided_load %arg13[%c64, %c0_31] {strides = array<i32: 2, 1>} : memref<256x128xf32, #tpu.memory_space<vmem>>, vector<8x128xf32>
    %c65 = arith.constant 65 : index
    %c0_32 = arith.constant 0 : index
    %35 = tpu.strided_load %arg13[%c65, %c0_32] {strides = array<i32: 2, 1>} : memref<256x128xf32, #tpu.memory_space<vmem>>, vector<8x128xf32>
    %c80 = arith.constant 80 : index
    %c0_33 = arith.constant 0 : index
    %36 = tpu.strided_load %arg13[%c80, %c0_33] {strides = array<i32: 2, 1>} : memref<256x128xf32, #tpu.memory_space<vmem>>, vector<8x128xf32>
    %c81 = arith.constant 81 : index
    %c0_34 = arith.constant 0 : index
    %37 = tpu.strided_load %arg13[%c81, %c0_34] {strides = array<i32: 2, 1>} : memref<256x128xf32, #tpu.memory_space<vmem>>, vector<8x128xf32>
    %38 = arith.maximumf %34, %35 : vector<8x128xf32>
    %39 = arith.maximumf %36, %37 : vector<8x128xf32>
    %40 = arith.maximumf %38, %39 : vector<8x128xf32>
    %41 = arith.truncf %40 : vector<8x128xf32> to vector<8x128xbf16>
    %c49_35 = arith.constant 49 : index
    %c0_36 = arith.constant 0 : index
    %42 = vector.load %arg14[%c49_35, %c0_36] : memref<168x128xbf16, #tpu.memory_space<vmem>>, vector<8x128xbf16>
    tpu.vector_store %arg14[%c49_35, %c0_36], %41 {strides = array<i32>} : memref<168x128xbf16, #tpu.memory_space<vmem>>, vector<8x128xbf16>,
    %c96 = arith.constant 96 : index
    %c0_37 = arith.constant 0 : index
    %43 = tpu.strided_load %arg13[%c96, %c0_37] {strides = array<i32: 2, 1>} : memref<256x128xf32, #tpu.memory_space<vmem>>, vector<8x128xf32>
    %c97 = arith.constant 97 : index
    %c0_38 = arith.constant 0 : index
    %44 = tpu.strided_load %arg13[%c97, %c0_38] {strides = array<i32: 2, 1>} : memref<256x128xf32, #tpu.memory_space<vmem>>, vector<8x128xf32>
    %c112 = arith.constant 112 : index
    %c0_39 = arith.constant 0 : index
    %45 = tpu.strided_load %arg13[%c112, %c0_39] {strides = array<i32: 2, 1>} : memref<256x128xf32, #tpu.memory_space<vmem>>, vector<8x128xf32>
    %c113 = arith.constant 113 : index
    %c0_40 = arith.constant 0 : index
    %46 = tpu.strided_load %arg13[%c113, %c0_40] {strides = array<i32: 2, 1>} : memref<256x128xf32, #tpu.memory_space<vmem>>, vector<8x128xf32>
    %47 = arith.maximumf %43, %44 : vector<8x128xf32>
    %48 = arith.maximumf %45, %46 : vector<8x128xf32>
    %49 = arith.maximumf %47, %48 : vector<8x128xf32>
    %50 = arith.truncf %49 : vector<8x128xf32> to vector<8x128xbf16>
    %c65_41 = arith.constant 65 : index
    %c0_42 = arith.constant 0 : index
    %51 = vector.load %arg14[%c65_41, %c0_42] : memref<168x128xbf16, #tpu.memory_space<vmem>>, vector<8x128xbf16>
    tpu.vector_store %arg14[%c65_41, %c0_42], %50 {strides = array<i32>} : memref<168x128xbf16, #tpu.memory_space<vmem>>, vector<8x128xbf16>,
    %c128 = arith.constant 128 : index
    %c0_43 = arith.constant 0 : index
    %52 = tpu.strided_load %arg13[%c128, %c0_43] {strides = array<i32: 2, 1>} : memref<256x128xf32, #tpu.memory_space<vmem>>, vector<8x128xf32>
    %c129 = arith.constant 129 : index
    %c0_44 = arith.constant 0 : index
    %53 = tpu.strided_load %arg13[%c129, %c0_44] {strides = array<i32: 2, 1>} : memref<256x128xf32, #tpu.memory_space<vmem>>, vector<8x128xf32>
    %c144 = arith.constant 144 : index
    %c0_45 = arith.constant 0 : index
    %54 = tpu.strided_load %arg13[%c144, %c0_45] {strides = array<i32: 2, 1>} : memref<256x128xf32, #tpu.memory_space<vmem>>, vector<8x128xf32>
    %c145 = arith.constant 145 : index
    %c0_46 = arith.constant 0 : index
    %55 = tpu.strided_load %arg13[%c145, %c0_46] {strides = array<i32: 2, 1>} : memref<256x128xf32, #tpu.memory_space<vmem>>, vector<8x128xf32>
    %56 = arith.maximumf %52, %53 : vector<8x128xf32>
    %57 = arith.maximumf %54, %55 : vector<8x128xf32>
    %58 = arith.maximumf %56, %57 : vector<8x128xf32>
    %59 = arith.truncf %58 : vector<8x128xf32> to vector<8x128xbf16>
    %c81_47 = arith.constant 81 : index
    %c0_48 = arith.constant 0 : index
    %60 = vector.load %arg14[%c81_47, %c0_48] : memref<168x128xbf16, #tpu.memory_space<vmem>>, vector<8x128xbf16>
    tpu.vector_store %arg14[%c81_47, %c0_48], %59 {strides = array<i32>} : memref<168x128xbf16, #tpu.memory_space<vmem>>, vector<8x128xbf16>,
    %c160 = arith.constant 160 : index
    %c0_49 = arith.constant 0 : index
    %61 = tpu.strided_load %arg13[%c160, %c0_49] {strides = array<i32: 2, 1>} : memref<256x128xf32, #tpu.memory_space<vmem>>, vector<8x128xf32>
    %c161 = arith.constant 161 : index
    %c0_50 = arith.constant 0 : index
    %62 = tpu.strided_load %arg13[%c161, %c0_50] {strides = array<i32: 2, 1>} : memref<256x128xf32, #tpu.memory_space<vmem>>, vector<8x128xf32>
    %c176 = arith.constant 176 : index
    %c0_51 = arith.constant 0 : index
    %63 = tpu.strided_load %arg13[%c176, %c0_51] {strides = array<i32: 2, 1>} : memref<256x128xf32, #tpu.memory_space<vmem>>, vector<8x128xf32>
    %c177 = arith.constant 177 : index
    %c0_52 = arith.constant 0 : index
    %64 = tpu.strided_load %arg13[%c177, %c0_52] {strides = array<i32: 2, 1>} : memref<256x128xf32, #tpu.memory_space<vmem>>, vector<8x128xf32>
    %65 = arith.maximumf %61, %62 : vector<8x128xf32>
    %66 = arith.maximumf %63, %64 : vector<8x128xf32>
    %67 = arith.maximumf %65, %66 : vector<8x128xf32>
    %68 = arith.truncf %67 : vector<8x128xf32> to vector<8x128xbf16>
    %c97_53 = arith.constant 97 : index
    %c0_54 = arith.constant 0 : index
    %69 = vector.load %arg14[%c97_53, %c0_54] : memref<168x128xbf16, #tpu.memory_space<vmem>>, vector<8x128xbf16>
    tpu.vector_store %arg14[%c97_53, %c0_54], %68 {strides = array<i32>} : memref<168x128xbf16, #tpu.memory_space<vmem>>, vector<8x128xbf16>,
    %c192 = arith.constant 192 : index
    %c0_55 = arith.constant 0 : index
    %70 = tpu.strided_load %arg13[%c192, %c0_55] {strides = array<i32: 2, 1>} : memref<256x128xf32, #tpu.memory_space<vmem>>, vector<8x128xf32>
    %c193 = arith.constant 193 : index
    %c0_56 = arith.constant 0 : index
    %71 = tpu.strided_load %arg13[%c193, %c0_56] {strides = array<i32: 2, 1>} : memref<256x128xf32, #tpu.memory_space<vmem>>, vector<8x128xf32>
    %c208 = arith.constant 208 : index
    %c0_57 = arith.constant 0 : index
    %72 = tpu.strided_load %arg13[%c208, %c0_57] {strides = array<i32: 2, 1>} : memref<256x128xf32, #tpu.memory_space<vmem>>, vector<8x128xf32>
    %c209 = arith.constant 209 : index
    %c0_58 = arith.constant 0 : index
    %73 = tpu.strided_load %arg13[%c209, %c0_58] {strides = array<i32: 2, 1>} : memref<256x128xf32, #tpu.memory_space<vmem>>, vector<8x128xf32>
    %74 = arith.maximumf %70, %71 : vector<8x128xf32>
    %75 = arith.maximumf %72, %73 : vector<8x128xf32>
    %76 = arith.maximumf %74, %75 : vector<8x128xf32>
    %77 = arith.truncf %76 : vector<8x128xf32> to vector<8x128xbf16>
    %c113_59 = arith.constant 113 : index
    %c0_60 = arith.constant 0 : index
    %78 = vector.load %arg14[%c113_59, %c0_60] : memref<168x128xbf16, #tpu.memory_space<vmem>>, vector<8x128xbf16>
    tpu.vector_store %arg14[%c113_59, %c0_60], %77 {strides = array<i32>} : memref<168x128xbf16, #tpu.memory_space<vmem>>, vector<8x128xbf16>,
    %c224 = arith.constant 224 : index
    %c0_61 = arith.constant 0 : index
    %79 = tpu.strided_load %arg13[%c224, %c0_61] {strides = array<i32: 2, 1>} : memref<256x128xf32, #tpu.memory_space<vmem>>, vector<8x128xf32>
    %c225 = arith.constant 225 : index
    %c0_62 = arith.constant 0 : index
    %80 = tpu.strided_load %arg13[%c225, %c0_62] {strides = array<i32: 2, 1>} : memref<256x128xf32, #tpu.memory_space<vmem>>, vector<8x128xf32>
    %c240 = arith.constant 240 : index
    %c0_63 = arith.constant 0 : index
    %81 = tpu.strided_load %arg13[%c240, %c0_63] {strides = array<i32: 2, 1>} : memref<256x128xf32, #tpu.memory_space<vmem>>, vector<8x128xf32>
    %c241 = arith.constant 241 : index
    %c0_64 = arith.constant 0 : index
    %82 = tpu.strided_load %arg13[%c241, %c0_64] {strides = array<i32: 2, 1>} : memref<256x128xf32, #tpu.memory_space<vmem>>, vector<8x128xf32>
    %83 = arith.maximumf %79, %80 : vector<8x128xf32>
    %84 = arith.maximumf %81, %82 : vector<8x128xf32>
    %85 = arith.maximumf %83, %84 : vector<8x128xf32>
    %86 = arith.truncf %85 : vector<8x128xf32> to vector<8x128xbf16>
    %c129_65 = arith.constant 129 : index
    %c0_66 = arith.constant 0 : index
    %87 = vector.load %arg14[%c129_65, %c0_66] : memref<168x128xbf16, #tpu.memory_space<vmem>>, vector<8x128xbf16>
    tpu.vector_store %arg14[%c129_65, %c0_66], %86 {strides = array<i32>} : memref<168x128xbf16, #tpu.memory_space<vmem>>, vector<8x128xbf16>,
    %c0_67 = arith.constant 0 : index
    %c0_68 = arith.constant 0 : index
    %88 = vector.load %arg14[%c0_67, %c0_68] : memref<168x128xbf16, #tpu.memory_space<vmem>>, vector<128x128xbf16>
    %c0_69 = arith.constant 0 : index
    %c0_70 = arith.constant 0 : index
    %c0_71 = arith.constant 0 : index
    %89 = vector.load %arg4[%c0_69, %c0_70, %c0_71] : memref<9x128x128xbf16, #tpu.memory_space<vmem>>, vector<1x128x128xbf16>
    %90 = vector.shape_cast %89 : vector<1x128x128xbf16> to vector<128x128xbf16>
    %cst_72 = arith.constant dense<0.000000e+00> : vector<128x128xf32>
    %91 = tpu.matmul %88, %90, %cst_72 {dimension_numbers = #tpu.dot_dimension_numbers<[1], [0], [0], [1], [0, 0, 1, 1], [], []>} : vector<128x128xbf16>, vector<128x128xbf16>, vector<128x128xf32> -> vector<128x128xf32>
    %c1_73 = arith.constant 1 : index
    %c0_74 = arith.constant 0 : index
    %92 = vector.load %arg14[%c1_73, %c0_74] : memref<168x128xbf16, #tpu.memory_space<vmem>>, vector<128x128xbf16>
    %c1_75 = arith.constant 1 : index
    %c0_76 = arith.constant 0 : index
    %c0_77 = arith.constant 0 : index
    %93 = vector.load %arg4[%c1_75, %c0_76, %c0_77] : memref<9x128x128xbf16, #tpu.memory_space<vmem>>, vector<1x128x128xbf16>
    %94 = vector.shape_cast %93 : vector<1x128x128xbf16> to vector<128x128xbf16>
    %cst_78 = arith.constant dense<0.000000e+00> : vector<128x128xf32>
    %95 = tpu.matmul %92, %94, %cst_78 {dimension_numbers = #tpu.dot_dimension_numbers<[1], [0], [0], [1], [0, 0, 1, 1], [], []>} : vector<128x128xbf16>, vector<128x128xbf16>, vector<128x128xf32> -> vector<128x128xf32>
    %96 = arith.addf %91, %95 : vector<128x128xf32>
    %c2 = arith.constant 2 : index
    %c0_79 = arith.constant 0 : index
    %97 = vector.load %arg14[%c2, %c0_79] : memref<168x128xbf16, #tpu.memory_space<vmem>>, vector<128x128xbf16>
    %c2_80 = arith.constant 2 : index
    %c0_81 = arith.constant 0 : index
    %c0_82 = arith.constant 0 : index
    %98 = vector.load %arg4[%c2_80, %c0_81, %c0_82] : memref<9x128x128xbf16, #tpu.memory_space<vmem>>, vector<1x128x128xbf16>
    %99 = vector.shape_cast %98 : vector<1x128x128xbf16> to vector<128x128xbf16>
    %cst_83 = arith.constant dense<0.000000e+00> : vector<128x128xf32>
    %100 = tpu.matmul %97, %99, %cst_83 {dimension_numbers = #tpu.dot_dimension_numbers<[1], [0], [0], [1], [0, 0, 1, 1], [], []>} : vector<128x128xbf16>, vector<128x128xbf16>, vector<128x128xf32> -> vector<128x128xf32>
    %101 = arith.addf %96, %100 : vector<128x128xf32>
    %c16_84 = arith.constant 16 : index
    %c0_85 = arith.constant 0 : index
    %102 = vector.load %arg14[%c16_84, %c0_85] : memref<168x128xbf16, #tpu.memory_space<vmem>>, vector<128x128xbf16>
    %c3 = arith.constant 3 : index
    %c0_86 = arith.constant 0 : index
    %c0_87 = arith.constant 0 : index
    %103 = vector.load %arg4[%c3, %c0_86, %c0_87] : memref<9x128x128xbf16, #tpu.memory_space<vmem>>, vector<1x128x128xbf16>
    %104 = vector.shape_cast %103 : vector<1x128x128xbf16> to vector<128x128xbf16>
    %cst_88 = arith.constant dense<0.000000e+00> : vector<128x128xf32>
    %105 = tpu.matmul %102, %104, %cst_88 {dimension_numbers = #tpu.dot_dimension_numbers<[1], [0], [0], [1], [0, 0, 1, 1], [], []>} : vector<128x128xbf16>, vector<128x128xbf16>, vector<128x128xf32> -> vector<128x128xf32>
    %106 = arith.addf %101, %105 : vector<128x128xf32>
    %c17_89 = arith.constant 17 : index
    %c0_90 = arith.constant 0 : index
    %107 = vector.load %arg14[%c17_89, %c0_90] : memref<168x128xbf16, #tpu.memory_space<vmem>>, vector<128x128xbf16>
    %c4 = arith.constant 4 : index
    %c0_91 = arith.constant 0 : index
    %c0_92 = arith.constant 0 : index
    %108 = vector.load %arg4[%c4, %c0_91, %c0_92] : memref<9x128x128xbf16, #tpu.memory_space<vmem>>, vector<1x128x128xbf16>
    %109 = vector.shape_cast %108 : vector<1x128x128xbf16> to vector<128x128xbf16>
    %cst_93 = arith.constant dense<0.000000e+00> : vector<128x128xf32>
    %110 = tpu.matmul %107, %109, %cst_93 {dimension_numbers = #tpu.dot_dimension_numbers<[1], [0], [0], [1], [0, 0, 1, 1], [], []>} : vector<128x128xbf16>, vector<128x128xbf16>, vector<128x128xf32> -> vector<128x128xf32>
    %111 = arith.addf %106, %110 : vector<128x128xf32>
    %c18 = arith.constant 18 : index
    %c0_94 = arith.constant 0 : index
    %112 = vector.load %arg14[%c18, %c0_94] : memref<168x128xbf16, #tpu.memory_space<vmem>>, vector<128x128xbf16>
    %c5 = arith.constant 5 : index
    %c0_95 = arith.constant 0 : index
    %c0_96 = arith.constant 0 : index
    %113 = vector.load %arg4[%c5, %c0_95, %c0_96] : memref<9x128x128xbf16, #tpu.memory_space<vmem>>, vector<1x128x128xbf16>
    %114 = vector.shape_cast %113 : vector<1x128x128xbf16> to vector<128x128xbf16>
    %cst_97 = arith.constant dense<0.000000e+00> : vector<128x128xf32>
    %115 = tpu.matmul %112, %114, %cst_97 {dimension_numbers = #tpu.dot_dimension_numbers<[1], [0], [0], [1], [0, 0, 1, 1], [], []>} : vector<128x128xbf16>, vector<128x128xbf16>, vector<128x128xf32> -> vector<128x128xf32>
    %116 = arith.addf %111, %115 : vector<128x128xf32>
    %c32_98 = arith.constant 32 : index
    %c0_99 = arith.constant 0 : index
    %117 = vector.load %arg14[%c32_98, %c0_99] : memref<168x128xbf16, #tpu.memory_space<vmem>>, vector<128x128xbf16>
    %c6 = arith.constant 6 : index
    %c0_100 = arith.constant 0 : index
    %c0_101 = arith.constant 0 : index
    %118 = vector.load %arg4[%c6, %c0_100, %c0_101] : memref<9x128x128xbf16, #tpu.memory_space<vmem>>, vector<1x128x128xbf16>
    %119 = vector.shape_cast %118 : vector<1x128x128xbf16> to vector<128x128xbf16>
    %cst_102 = arith.constant dense<0.000000e+00> : vector<128x128xf32>
    %120 = tpu.matmul %117, %119, %cst_102 {dimension_numbers = #tpu.dot_dimension_numbers<[1], [0], [0], [1], [0, 0, 1, 1], [], []>} : vector<128x128xbf16>, vector<128x128xbf16>, vector<128x128xf32> -> vector<128x128xf32>
    %121 = arith.addf %116, %120 : vector<128x128xf32>
    %c33_103 = arith.constant 33 : index
    %c0_104 = arith.constant 0 : index
    %122 = vector.load %arg14[%c33_103, %c0_104] : memref<168x128xbf16, #tpu.memory_space<vmem>>, vector<128x128xbf16>
    %c7 = arith.constant 7 : index
    %c0_105 = arith.constant 0 : index
    %c0_106 = arith.constant 0 : index
    %123 = vector.load %arg4[%c7, %c0_105, %c0_106] : memref<9x128x128xbf16, #tpu.memory_space<vmem>>, vector<1x128x128xbf16>
    %124 = vector.shape_cast %123 : vector<1x128x128xbf16> to vector<128x128xbf16>
    %cst_107 = arith.constant dense<0.000000e+00> : vector<128x128xf32>
    %125 = tpu.matmul %122, %124, %cst_107 {dimension_numbers = #tpu.dot_dimension_numbers<[1], [0], [0], [1], [0, 0, 1, 1], [], []>} : vector<128x128xbf16>, vector<128x128xbf16>, vector<128x128xf32> -> vector<128x128xf32>
    %126 = arith.addf %121, %125 : vector<128x128xf32>
    %c34 = arith.constant 34 : index
    %c0_108 = arith.constant 0 : index
    %127 = vector.load %arg14[%c34, %c0_108] : memref<168x128xbf16, #tpu.memory_space<vmem>>, vector<128x128xbf16>
    %c8 = arith.constant 8 : index
    %c0_109 = arith.constant 0 : index
    %c0_110 = arith.constant 0 : index
    %128 = vector.load %arg4[%c8, %c0_109, %c0_110] : memref<9x128x128xbf16, #tpu.memory_space<vmem>>, vector<1x128x128xbf16>
    %129 = vector.shape_cast %128 : vector<1x128x128xbf16> to vector<128x128xbf16>
    %cst_111 = arith.constant dense<0.000000e+00> : vector<128x128xf32>
    %130 = tpu.matmul %127, %129, %cst_111 {dimension_numbers = #tpu.dot_dimension_numbers<[1], [0], [0], [1], [0, 0, 1, 1], [], []>} : vector<128x128xbf16>, vector<128x128xbf16>, vector<128x128xf32> -> vector<128x128xf32>
    %131 = arith.addf %126, %130 : vector<128x128xf32>
    %c0_112 = arith.constant 0 : index
    %c0_113 = arith.constant 0 : index
    %132 = vector.load %arg5[%c0_112, %c0_113] : memref<1x128xf32, #tpu.memory_space<vmem>>, vector<1x128xf32>
    %133 = vector.broadcast %132 : vector<1x128xf32> to vector<128x128xf32>
    %134 = arith.addf %131, %133 : vector<128x128xf32>
    %cst_114 = arith.constant 0.000000e+00 : f32
    %135 = vector.broadcast %cst_114 : f32 to vector<128x128xf32>
    %136 = arith.maximumf %134, %135 : vector<128x128xf32>
    %c0_115 = arith.constant 0 : index
    %c0_116 = arith.constant 0 : index
    %137 = vector.load %arg13[%c0_115, %c0_116] : memref<256x128xf32, #tpu.memory_space<vmem>>, vector<128x128xf32>
    tpu.vector_store %arg13[%c0_115, %c0_116], %136 {strides = array<i32>} : memref<256x128xf32, #tpu.memory_space<vmem>>, vector<128x128xf32>,
    %c0_117 = arith.constant 0 : index
    %c0_118 = arith.constant 0 : index
    %138 = tpu.strided_load %arg13[%c0_117, %c0_118] {strides = array<i32: 2, 1>} : memref<256x128xf32, #tpu.memory_space<vmem>>, vector<4x128xf32>
    %c1_119 = arith.constant 1 : index
    %c0_120 = arith.constant 0 : index
    %139 = tpu.strided_load %arg13[%c1_119, %c0_120] {strides = array<i32: 2, 1>} : memref<256x128xf32, #tpu.memory_space<vmem>>, vector<4x128xf32>
    %c16_121 = arith.constant 16 : index
    %c0_122 = arith.constant 0 : index
    %140 = tpu.strided_load %arg13[%c16_121, %c0_122] {strides = array<i32: 2, 1>} : memref<256x128xf32, #tpu.memory_space<vmem>>, vector<4x128xf32>
    %c17_123 = arith.constant 17 : index
    %c0_124 = arith.constant 0 : index
    %141 = tpu.strided_load %arg13[%c17_123, %c0_124] {strides = array<i32: 2, 1>} : memref<256x128xf32, #tpu.memory_space<vmem>>, vector<4x128xf32>
    %142 = arith.maximumf %138, %139 : vector<4x128xf32>
    %143 = arith.maximumf %140, %141 : vector<4x128xf32>
    %144 = arith.maximumf %142, %143 : vector<4x128xf32>
    %145 = arith.truncf %144 : vector<4x128xf32> to vector<4x128xbf16>
    %c9 = arith.constant 9 : index
    %c0_125 = arith.constant 0 : index
    %146 = vector.load %arg15[%c9, %c0_125] : memref<56x128xbf16, #tpu.memory_space<vmem>>, vector<4x128xbf16>
    tpu.vector_store %arg15[%c9, %c0_125], %145 {strides = array<i32>} : memref<56x128xbf16, #tpu.memory_space<vmem>>, vector<4x128xbf16>,
    %c32_126 = arith.constant 32 : index
    %c0_127 = arith.constant 0 : index
    %147 = tpu.strided_load %arg13[%c32_126, %c0_127] {strides = array<i32: 2, 1>} : memref<256x128xf32, #tpu.memory_space<vmem>>, vector<4x128xf32>
    %c33_128 = arith.constant 33 : index
    %c0_129 = arith.constant 0 : index
    %148 = tpu.strided_load %arg13[%c33_128, %c0_129] {strides = array<i32: 2, 1>} : memref<256x128xf32, #tpu.memory_space<vmem>>, vector<4x128xf32>
    %c48_130 = arith.constant 48 : index
    %c0_131 = arith.constant 0 : index
    %149 = tpu.strided_load %arg13[%c48_130, %c0_131] {strides = array<i32: 2, 1>} : memref<256x128xf32, #tpu.memory_space<vmem>>, vector<4x128xf32>
    %c49_132 = arith.constant 49 : index
    %c0_133 = arith.constant 0 : index
    %150 = tpu.strided_load %arg13[%c49_132, %c0_133] {strides = array<i32: 2, 1>} : memref<256x128xf32, #tpu.memory_space<vmem>>, vector<4x128xf32>
    %151 = arith.maximumf %147, %148 : vector<4x128xf32>
    %152 = arith.maximumf %149, %150 : vector<4x128xf32>
    %153 = arith.maximumf %151, %152 : vector<4x128xf32>
    %154 = arith.truncf %153 : vector<4x128xf32> to vector<4x128xbf16>
    %c17_134 = arith.constant 17 : index
    %c0_135 = arith.constant 0 : index
    %155 = vector.load %arg15[%c17_134, %c0_135] : memref<56x128xbf16, #tpu.memory_space<vmem>>, vector<4x128xbf16>
    tpu.vector_store %arg15[%c17_134, %c0_135], %154 {strides = array<i32>} : memref<56x128xbf16, #tpu.memory_space<vmem>>, vector<4x128xbf16>,
    %c64_136 = arith.constant 64 : index
    %c0_137 = arith.constant 0 : index
    %156 = tpu.strided_load %arg13[%c64_136, %c0_137] {strides = array<i32: 2, 1>} : memref<256x128xf32, #tpu.memory_space<vmem>>, vector<4x128xf32>
    %c65_138 = arith.constant 65 : index
    %c0_139 = arith.constant 0 : index
    %157 = tpu.strided_load %arg13[%c65_138, %c0_139] {strides = array<i32: 2, 1>} : memref<256x128xf32, #tpu.memory_space<vmem>>, vector<4x128xf32>
    %c80_140 = arith.constant 80 : index
    %c0_141 = arith.constant 0 : index
    %158 = tpu.strided_load %arg13[%c80_140, %c0_141] {strides = array<i32: 2, 1>} : memref<256x128xf32, #tpu.memory_space<vmem>>, vector<4x128xf32>
    %c81_142 = arith.constant 81 : index
    %c0_143 = arith.constant 0 : index
    %159 = tpu.strided_load %arg13[%c81_142, %c0_143] {strides = array<i32: 2, 1>} : memref<256x128xf32, #tpu.memory_space<vmem>>, vector<4x128xf32>
    %160 = arith.maximumf %156, %157 : vector<4x128xf32>
    %161 = arith.maximumf %158, %159 : vector<4x128xf32>
    %162 = arith.maximumf %160, %161 : vector<4x128xf32>
    %163 = arith.truncf %162 : vector<4x128xf32> to vector<4x128xbf16>
    %c25 = arith.constant 25 : index
    %c0_144 = arith.constant 0 : index
    %164 = vector.load %arg15[%c25, %c0_144] : memref<56x128xbf16, #tpu.memory_space<vmem>>, vector<4x128xbf16>
    tpu.vector_store %arg15[%c25, %c0_144], %163 {strides = array<i32>} : memref<56x128xbf16, #tpu.memory_space<vmem>>, vector<4x128xbf16>,
    %c96_145 = arith.constant 96 : index
    %c0_146 = arith.constant 0 : index
    %165 = tpu.strided_load %arg13[%c96_145, %c0_146] {strides = array<i32: 2, 1>} : memref<256x128xf32, #tpu.memory_space<vmem>>, vector<4x128xf32>
    %c97_147 = arith.constant 97 : index
    %c0_148 = arith.constant 0 : index
    %166 = tpu.strided_load %arg13[%c97_147, %c0_148] {strides = array<i32: 2, 1>} : memref<256x128xf32, #tpu.memory_space<vmem>>, vector<4x128xf32>
    %c112_149 = arith.constant 112 : index
    %c0_150 = arith.constant 0 : index
    %167 = tpu.strided_load %arg13[%c112_149, %c0_150] {strides = array<i32: 2, 1>} : memref<256x128xf32, #tpu.memory_space<vmem>>, vector<4x128xf32>
    %c113_151 = arith.constant 113 : index
    %c0_152 = arith.constant 0 : index
    %168 = tpu.strided_load %arg13[%c113_151, %c0_152] {strides = array<i32: 2, 1>} : memref<256x128xf32, #tpu.memory_space<vmem>>, vector<4x128xf32>
    %169 = arith.maximumf %165, %166 : vector<4x128xf32>
    %170 = arith.maximumf %167, %168 : vector<4x128xf32>
    %171 = arith.maximumf %169, %170 : vector<4x128xf32>
    %172 = arith.truncf %171 : vector<4x128xf32> to vector<4x128xbf16>
    %c33_153 = arith.constant 33 : index
    %c0_154 = arith.constant 0 : index
    %173 = vector.load %arg15[%c33_153, %c0_154] : memref<56x128xbf16, #tpu.memory_space<vmem>>, vector<4x128xbf16>
    tpu.vector_store %arg15[%c33_153, %c0_154], %172 {strides = array<i32>} : memref<56x128xbf16, #tpu.memory_space<vmem>>, vector<4x128xbf16>,
    %c0_155 = arith.constant 0 : index
    %c0_156 = arith.constant 0 : index
    %174 = vector.load %arg15[%c0_155, %c0_156] : memref<56x128xbf16, #tpu.memory_space<vmem>>, vector<32x128xbf16>
    %c0_157 = arith.constant 0 : index
    %c0_158 = arith.constant 0 : index
    %c0_159 = arith.constant 0 : index
    %175 = vector.load %arg6[%c0_157, %c0_158, %c0_159] : memref<9x128x128xbf16, #tpu.memory_space<vmem>>, vector<1x128x128xbf16>
    %176 = vector.shape_cast %175 : vector<1x128x128xbf16> to vector<128x128xbf16>
    %cst_160 = arith.constant dense<0.000000e+00> : vector<32x128xf32>
    %177 = tpu.matmul %174, %176, %cst_160 {dimension_numbers = #tpu.dot_dimension_numbers<[1], [0], [0], [1], [0, 0, 1, 1], [], []>} : vector<32x128xbf16>, vector<128x128xbf16>, vector<32x128xf32> -> vector<32x128xf32>
    %c1_161 = arith.constant 1 : index
    %c0_162 = arith.constant 0 : index
    %178 = vector.load %arg15[%c1_161, %c0_162] : memref<56x128xbf16, #tpu.memory_space<vmem>>, vector<32x128xbf16>
    %c1_163 = arith.constant 1 : index
    %c0_164 = arith.constant 0 : index
    %c0_165 = arith.constant 0 : index
    %179 = vector.load %arg6[%c1_163, %c0_164, %c0_165] : memref<9x128x128xbf16, #tpu.memory_space<vmem>>, vector<1x128x128xbf16>
    %180 = vector.shape_cast %179 : vector<1x128x128xbf16> to vector<128x128xbf16>
    %cst_166 = arith.constant dense<0.000000e+00> : vector<32x128xf32>
    %181 = tpu.matmul %178, %180, %cst_166 {dimension_numbers = #tpu.dot_dimension_numbers<[1], [0], [0], [1], [0, 0, 1, 1], [], []>} : vector<32x128xbf16>, vector<128x128xbf16>, vector<32x128xf32> -> vector<32x128xf32>
    %182 = arith.addf %177, %181 : vector<32x128xf32>
    %c2_167 = arith.constant 2 : index
    %c0_168 = arith.constant 0 : index
    %183 = vector.load %arg15[%c2_167, %c0_168] : memref<56x128xbf16, #tpu.memory_space<vmem>>, vector<32x128xbf16>
    %c2_169 = arith.constant 2 : index
    %c0_170 = arith.constant 0 : index
    %c0_171 = arith.constant 0 : index
    %184 = vector.load %arg6[%c2_169, %c0_170, %c0_171] : memref<9x128x128xbf16, #tpu.memory_space<vmem>>, vector<1x128x128xbf16>
    %185 = vector.shape_cast %184 : vector<1x128x128xbf16> to vector<128x128xbf16>
    %cst_172 = arith.constant dense<0.000000e+00> : vector<32x128xf32>
    %186 = tpu.matmul %183, %185, %cst_172 {dimension_numbers = #tpu.dot_dimension_numbers<[1], [0], [0], [1], [0, 0, 1, 1], [], []>} : vector<32x128xbf16>, vector<128x128xbf16>, vector<32x128xf32> -> vector<32x128xf32>
    %187 = arith.addf %182, %186 : vector<32x128xf32>
    %c8_173 = arith.constant 8 : index
    %c0_174 = arith.constant 0 : index
    %188 = vector.load %arg15[%c8_173, %c0_174] : memref<56x128xbf16, #tpu.memory_space<vmem>>, vector<32x128xbf16>
    %c3_175 = arith.constant 3 : index
    %c0_176 = arith.constant 0 : index
    %c0_177 = arith.constant 0 : index
    %189 = vector.load %arg6[%c3_175, %c0_176, %c0_177] : memref<9x128x128xbf16, #tpu.memory_space<vmem>>, vector<1x128x128xbf16>
    %190 = vector.shape_cast %189 : vector<1x128x128xbf16> to vector<128x128xbf16>
    %cst_178 = arith.constant dense<0.000000e+00> : vector<32x128xf32>
    %191 = tpu.matmul %188, %190, %cst_178 {dimension_numbers = #tpu.dot_dimension_numbers<[1], [0], [0], [1], [0, 0, 1, 1], [], []>} : vector<32x128xbf16>, vector<128x128xbf16>, vector<32x128xf32> -> vector<32x128xf32>
    %192 = arith.addf %187, %191 : vector<32x128xf32>
    %c9_179 = arith.constant 9 : index
    %c0_180 = arith.constant 0 : index
    %193 = vector.load %arg15[%c9_179, %c0_180] : memref<56x128xbf16, #tpu.memory_space<vmem>>, vector<32x128xbf16>
    %c4_181 = arith.constant 4 : index
    %c0_182 = arith.constant 0 : index
    %c0_183 = arith.constant 0 : index
    %194 = vector.load %arg6[%c4_181, %c0_182, %c0_183] : memref<9x128x128xbf16, #tpu.memory_space<vmem>>, vector<1x128x128xbf16>
    %195 = vector.shape_cast %194 : vector<1x128x128xbf16> to vector<128x128xbf16>
    %cst_184 = arith.constant dense<0.000000e+00> : vector<32x128xf32>
    %196 = tpu.matmul %193, %195, %cst_184 {dimension_numbers = #tpu.dot_dimension_numbers<[1], [0], [0], [1], [0, 0, 1, 1], [], []>} : vector<32x128xbf16>, vector<128x128xbf16>, vector<32x128xf32> -> vector<32x128xf32>
    %197 = arith.addf %192, %196 : vector<32x128xf32>
    %c10 = arith.constant 10 : index
    %c0_185 = arith.constant 0 : index
    %198 = vector.load %arg15[%c10, %c0_185] : memref<56x128xbf16, #tpu.memory_space<vmem>>, vector<32x128xbf16>
    %c5_186 = arith.constant 5 : index
    %c0_187 = arith.constant 0 : index
    %c0_188 = arith.constant 0 : index
    %199 = vector.load %arg6[%c5_186, %c0_187, %c0_188] : memref<9x128x128xbf16, #tpu.memory_space<vmem>>, vector<1x128x128xbf16>
    %200 = vector.shape_cast %199 : vector<1x128x128xbf16> to vector<128x128xbf16>
    %cst_189 = arith.constant dense<0.000000e+00> : vector<32x128xf32>
    %201 = tpu.matmul %198, %200, %cst_189 {dimension_numbers = #tpu.dot_dimension_numbers<[1], [0], [0], [1], [0, 0, 1, 1], [], []>} : vector<32x128xbf16>, vector<128x128xbf16>, vector<32x128xf32> -> vector<32x128xf32>
    %202 = arith.addf %197, %201 : vector<32x128xf32>
    %c16_190 = arith.constant 16 : index
    %c0_191 = arith.constant 0 : index
    %203 = vector.load %arg15[%c16_190, %c0_191] : memref<56x128xbf16, #tpu.memory_space<vmem>>, vector<32x128xbf16>
    %c6_192 = arith.constant 6 : index
    %c0_193 = arith.constant 0 : index
    %c0_194 = arith.constant 0 : index
    %204 = vector.load %arg6[%c6_192, %c0_193, %c0_194] : memref<9x128x128xbf16, #tpu.memory_space<vmem>>, vector<1x128x128xbf16>
    %205 = vector.shape_cast %204 : vector<1x128x128xbf16> to vector<128x128xbf16>
    %cst_195 = arith.constant dense<0.000000e+00> : vector<32x128xf32>
    %206 = tpu.matmul %203, %205, %cst_195 {dimension_numbers = #tpu.dot_dimension_numbers<[1], [0], [0], [1], [0, 0, 1, 1], [], []>} : vector<32x128xbf16>, vector<128x128xbf16>, vector<32x128xf32> -> vector<32x128xf32>
    %207 = arith.addf %202, %206 : vector<32x128xf32>
    %c17_196 = arith.constant 17 : index
    %c0_197 = arith.constant 0 : index
    %208 = vector.load %arg15[%c17_196, %c0_197] : memref<56x128xbf16, #tpu.memory_space<vmem>>, vector<32x128xbf16>
    %c7_198 = arith.constant 7 : index
    %c0_199 = arith.constant 0 : index
    %c0_200 = arith.constant 0 : index
    %209 = vector.load %arg6[%c7_198, %c0_199, %c0_200] : memref<9x128x128xbf16, #tpu.memory_space<vmem>>, vector<1x128x128xbf16>
    %210 = vector.shape_cast %209 : vector<1x128x128xbf16> to vector<128x128xbf16>
    %cst_201 = arith.constant dense<0.000000e+00> : vector<32x128xf32>
    %211 = tpu.matmul %208, %210, %cst_201 {dimension_numbers = #tpu.dot_dimension_numbers<[1], [0], [0], [1], [0, 0, 1, 1], [], []>} : vector<32x128xbf16>, vector<128x128xbf16>, vector<32x128xf32> -> vector<32x128xf32>
    %212 = arith.addf %207, %211 : vector<32x128xf32>
    %c18_202 = arith.constant 18 : index
    %c0_203 = arith.constant 0 : index
    %213 = vector.load %arg15[%c18_202, %c0_203] : memref<56x128xbf16, #tpu.memory_space<vmem>>, vector<32x128xbf16>
    %c8_204 = arith.constant 8 : index
    %c0_205 = arith.constant 0 : index
    %c0_206 = arith.constant 0 : index
    %214 = vector.load %arg6[%c8_204, %c0_205, %c0_206] : memref<9x128x128xbf16, #tpu.memory_space<vmem>>, vector<1x128x128xbf16>
    %215 = vector.shape_cast %214 : vector<1x128x128xbf16> to vector<128x128xbf16>
    %cst_207 = arith.constant dense<0.000000e+00> : vector<32x128xf32>
    %216 = tpu.matmul %213, %215, %cst_207 {dimension_numbers = #tpu.dot_dimension_numbers<[1], [0], [0], [1], [0, 0, 1, 1], [], []>} : vector<32x128xbf16>, vector<128x128xbf16>, vector<32x128xf32> -> vector<32x128xf32>
    %217 = arith.addf %212, %216 : vector<32x128xf32>
    %c0_208 = arith.constant 0 : index
    %c0_209 = arith.constant 0 : index
    %218 = vector.load %arg7[%c0_208, %c0_209] : memref<1x128xf32, #tpu.memory_space<vmem>>, vector<1x128xf32>
    %219 = vector.broadcast %218 : vector<1x128xf32> to vector<32x128xf32>
    %220 = arith.addf %217, %219 : vector<32x128xf32>
    %cst_210 = arith.constant 0.000000e+00 : f32
    %221 = vector.broadcast %cst_210 : f32 to vector<32x128xf32>
    %222 = arith.maximumf %220, %221 : vector<32x128xf32>
    %c0_211 = arith.constant 0 : index
    %c0_212 = arith.constant 0 : index
    %223 = vector.load %arg13[%c0_211, %c0_212] : memref<256x128xf32, #tpu.memory_space<vmem>>, vector<32x128xf32>
    tpu.vector_store %arg13[%c0_211, %c0_212], %222 {strides = array<i32>} : memref<256x128xf32, #tpu.memory_space<vmem>>, vector<32x128xf32>,
    %c0_213 = arith.constant 0 : index
    %c0_214 = arith.constant 0 : index
    %224 = tpu.strided_load %arg13[%c0_213, %c0_214] {strides = array<i32: 2, 1>} : memref<256x128xf32, #tpu.memory_space<vmem>>, vector<2x128xf32>
    %c1_215 = arith.constant 1 : index
    %c0_216 = arith.constant 0 : index
    %225 = tpu.strided_load %arg13[%c1_215, %c0_216] {strides = array<i32: 2, 1>} : memref<256x128xf32, #tpu.memory_space<vmem>>, vector<2x128xf32>
    %c8_217 = arith.constant 8 : index
    %c0_218 = arith.constant 0 : index
    %226 = tpu.strided_load %arg13[%c8_217, %c0_218] {strides = array<i32: 2, 1>} : memref<256x128xf32, #tpu.memory_space<vmem>>, vector<2x128xf32>
    %c9_219 = arith.constant 9 : index
    %c0_220 = arith.constant 0 : index
    %227 = tpu.strided_load %arg13[%c9_219, %c0_220] {strides = array<i32: 2, 1>} : memref<256x128xf32, #tpu.memory_space<vmem>>, vector<2x128xf32>
    %228 = arith.maximumf %224, %225 : vector<2x128xf32>
    %229 = arith.maximumf %226, %227 : vector<2x128xf32>
    %230 = arith.maximumf %228, %229 : vector<2x128xf32>
    %231 = arith.truncf %230 : vector<2x128xf32> to vector<2x128xbf16>
    %c9_221 = arith.constant 9 : index
    %c0_222 = arith.constant 0 : index
    %232 = vector.load %arg16[%c9_221, %c0_222] : memref<40x128xbf16, #tpu.memory_space<vmem>>, vector<2x128xbf16>
    tpu.vector_store %arg16[%c9_221, %c0_222], %231 {strides = array<i32>} : memref<40x128xbf16, #tpu.memory_space<vmem>>, vector<2x128xbf16>,
    %c16_223 = arith.constant 16 : index
    %c0_224 = arith.constant 0 : index
    %233 = tpu.strided_load %arg13[%c16_223, %c0_224] {strides = array<i32: 2, 1>} : memref<256x128xf32, #tpu.memory_space<vmem>>, vector<2x128xf32>
    %c17_225 = arith.constant 17 : index
    %c0_226 = arith.constant 0 : index
    %234 = tpu.strided_load %arg13[%c17_225, %c0_226] {strides = array<i32: 2, 1>} : memref<256x128xf32, #tpu.memory_space<vmem>>, vector<2x128xf32>
    %c24 = arith.constant 24 : index
    %c0_227 = arith.constant 0 : index
    %235 = tpu.strided_load %arg13[%c24, %c0_227] {strides = array<i32: 2, 1>} : memref<256x128xf32, #tpu.memory_space<vmem>>, vector<2x128xf32>
    %c25_228 = arith.constant 25 : index
    %c0_229 = arith.constant 0 : index
    %236 = tpu.strided_load %arg13[%c25_228, %c0_229] {strides = array<i32: 2, 1>} : memref<256x128xf32, #tpu.memory_space<vmem>>, vector<2x128xf32>
    %237 = arith.maximumf %233, %234 : vector<2x128xf32>
    %238 = arith.maximumf %235, %236 : vector<2x128xf32>
    %239 = arith.maximumf %237, %238 : vector<2x128xf32>
    %240 = arith.truncf %239 : vector<2x128xf32> to vector<2x128xbf16>
    %c17_230 = arith.constant 17 : index
    %c0_231 = arith.constant 0 : index
    %241 = vector.load %arg16[%c17_230, %c0_231] : memref<40x128xbf16, #tpu.memory_space<vmem>>, vector<2x128xbf16>
    tpu.vector_store %arg16[%c17_230, %c0_231], %240 {strides = array<i32>} : memref<40x128xbf16, #tpu.memory_space<vmem>>, vector<2x128xbf16>,
    %c0_232 = arith.constant 0 : index
    %c0_233 = arith.constant 0 : index
    %242 = vector.load %arg16[%c0_232, %c0_233] : memref<40x128xbf16, #tpu.memory_space<vmem>>, vector<16x128xbf16>
    %c0_234 = arith.constant 0 : index
    %c0_235 = arith.constant 0 : index
    %c0_236 = arith.constant 0 : index
    %243 = vector.load %arg8[%c0_234, %c0_235, %c0_236] : memref<9x128x256xbf16, #tpu.memory_space<vmem>>, vector<1x128x256xbf16>
    %244 = vector.shape_cast %243 : vector<1x128x256xbf16> to vector<128x256xbf16>
    %cst_237 = arith.constant dense<0.000000e+00> : vector<16x256xf32>
    %245 = tpu.matmul %242, %244, %cst_237 {dimension_numbers = #tpu.dot_dimension_numbers<[1], [0], [0], [1], [0, 0, 1, 1], [], []>} : vector<16x128xbf16>, vector<128x256xbf16>, vector<16x256xf32> -> vector<16x256xf32>
    %c1_238 = arith.constant 1 : index
    %c0_239 = arith.constant 0 : index
    %246 = vector.load %arg16[%c1_238, %c0_239] : memref<40x128xbf16, #tpu.memory_space<vmem>>, vector<16x128xbf16>
    %c1_240 = arith.constant 1 : index
    %c0_241 = arith.constant 0 : index
    %c0_242 = arith.constant 0 : index
    %247 = vector.load %arg8[%c1_240, %c0_241, %c0_242] : memref<9x128x256xbf16, #tpu.memory_space<vmem>>, vector<1x128x256xbf16>
    %248 = vector.shape_cast %247 : vector<1x128x256xbf16> to vector<128x256xbf16>
    %cst_243 = arith.constant dense<0.000000e+00> : vector<16x256xf32>
    %249 = tpu.matmul %246, %248, %cst_243 {dimension_numbers = #tpu.dot_dimension_numbers<[1], [0], [0], [1], [0, 0, 1, 1], [], []>} : vector<16x128xbf16>, vector<128x256xbf16>, vector<16x256xf32> -> vector<16x256xf32>
    %250 = arith.addf %245, %249 : vector<16x256xf32>
    %c2_244 = arith.constant 2 : index
    %c0_245 = arith.constant 0 : index
    %251 = vector.load %arg16[%c2_244, %c0_245] : memref<40x128xbf16, #tpu.memory_space<vmem>>, vector<16x128xbf16>
    %c2_246 = arith.constant 2 : index
    %c0_247 = arith.constant 0 : index
    %c0_248 = arith.constant 0 : index
    %252 = vector.load %arg8[%c2_246, %c0_247, %c0_248] : memref<9x128x256xbf16, #tpu.memory_space<vmem>>, vector<1x128x256xbf16>
    %253 = vector.shape_cast %252 : vector<1x128x256xbf16> to vector<128x256xbf16>
    %cst_249 = arith.constant dense<0.000000e+00> : vector<16x256xf32>
    %254 = tpu.matmul %251, %253, %cst_249 {dimension_numbers = #tpu.dot_dimension_numbers<[1], [0], [0], [1], [0, 0, 1, 1], [], []>} : vector<16x128xbf16>, vector<128x256xbf16>, vector<16x256xf32> -> vector<16x256xf32>
    %255 = arith.addf %250, %254 : vector<16x256xf32>
    %c8_250 = arith.constant 8 : index
    %c0_251 = arith.constant 0 : index
    %256 = vector.load %arg16[%c8_250, %c0_251] : memref<40x128xbf16, #tpu.memory_space<vmem>>, vector<16x128xbf16>
    %c3_252 = arith.constant 3 : index
    %c0_253 = arith.constant 0 : index
    %c0_254 = arith.constant 0 : index
    %257 = vector.load %arg8[%c3_252, %c0_253, %c0_254] : memref<9x128x256xbf16, #tpu.memory_space<vmem>>, vector<1x128x256xbf16>
    %258 = vector.shape_cast %257 : vector<1x128x256xbf16> to vector<128x256xbf16>
    %cst_255 = arith.constant dense<0.000000e+00> : vector<16x256xf32>
    %259 = tpu.matmul %256, %258, %cst_255 {dimension_numbers = #tpu.dot_dimension_numbers<[1], [0], [0], [1], [0, 0, 1, 1], [], []>} : vector<16x128xbf16>, vector<128x256xbf16>, vector<16x256xf32> -> vector<16x256xf32>
    %260 = arith.addf %255, %259 : vector<16x256xf32>
    %c9_256 = arith.constant 9 : index
    %c0_257 = arith.constant 0 : index
    %261 = vector.load %arg16[%c9_256, %c0_257] : memref<40x128xbf16, #tpu.memory_space<vmem>>, vector<16x128xbf16>
    %c4_258 = arith.constant 4 : index
    %c0_259 = arith.constant 0 : index
    %c0_260 = arith.constant 0 : index
    %262 = vector.load %arg8[%c4_258, %c0_259, %c0_260] : memref<9x128x256xbf16, #tpu.memory_space<vmem>>, vector<1x128x256xbf16>
    %263 = vector.shape_cast %262 : vector<1x128x256xbf16> to vector<128x256xbf16>
    %cst_261 = arith.constant dense<0.000000e+00> : vector<16x256xf32>
    %264 = tpu.matmul %261, %263, %cst_261 {dimension_numbers = #tpu.dot_dimension_numbers<[1], [0], [0], [1], [0, 0, 1, 1], [], []>} : vector<16x128xbf16>, vector<128x256xbf16>, vector<16x256xf32> -> vector<16x256xf32>
    %265 = arith.addf %260, %264 : vector<16x256xf32>
    %c10_262 = arith.constant 10 : index
    %c0_263 = arith.constant 0 : index
    %266 = vector.load %arg16[%c10_262, %c0_263] : memref<40x128xbf16, #tpu.memory_space<vmem>>, vector<16x128xbf16>
    %c5_264 = arith.constant 5 : index
    %c0_265 = arith.constant 0 : index
    %c0_266 = arith.constant 0 : index
    %267 = vector.load %arg8[%c5_264, %c0_265, %c0_266] : memref<9x128x256xbf16, #tpu.memory_space<vmem>>, vector<1x128x256xbf16>
    %268 = vector.shape_cast %267 : vector<1x128x256xbf16> to vector<128x256xbf16>
    %cst_267 = arith.constant dense<0.000000e+00> : vector<16x256xf32>
    %269 = tpu.matmul %266, %268, %cst_267 {dimension_numbers = #tpu.dot_dimension_numbers<[1], [0], [0], [1], [0, 0, 1, 1], [], []>} : vector<16x128xbf16>, vector<128x256xbf16>, vector<16x256xf32> -> vector<16x256xf32>
    %270 = arith.addf %265, %269 : vector<16x256xf32>
    %c16_268 = arith.constant 16 : index
    %c0_269 = arith.constant 0 : index
    %271 = vector.load %arg16[%c16_268, %c0_269] : memref<40x128xbf16, #tpu.memory_space<vmem>>, vector<16x128xbf16>
    %c6_270 = arith.constant 6 : index
    %c0_271 = arith.constant 0 : index
    %c0_272 = arith.constant 0 : index
    %272 = vector.load %arg8[%c6_270, %c0_271, %c0_272] : memref<9x128x256xbf16, #tpu.memory_space<vmem>>, vector<1x128x256xbf16>
    %273 = vector.shape_cast %272 : vector<1x128x256xbf16> to vector<128x256xbf16>
    %cst_273 = arith.constant dense<0.000000e+00> : vector<16x256xf32>
    %274 = tpu.matmul %271, %273, %cst_273 {dimension_numbers = #tpu.dot_dimension_numbers<[1], [0], [0], [1], [0, 0, 1, 1], [], []>} : vector<16x128xbf16>, vector<128x256xbf16>, vector<16x256xf32> -> vector<16x256xf32>
    %275 = arith.addf %270, %274 : vector<16x256xf32>
    %c17_274 = arith.constant 17 : index
    %c0_275 = arith.constant 0 : index
    %276 = vector.load %arg16[%c17_274, %c0_275] : memref<40x128xbf16, #tpu.memory_space<vmem>>, vector<16x128xbf16>
    %c7_276 = arith.constant 7 : index
    %c0_277 = arith.constant 0 : index
    %c0_278 = arith.constant 0 : index
    %277 = vector.load %arg8[%c7_276, %c0_277, %c0_278] : memref<9x128x256xbf16, #tpu.memory_space<vmem>>, vector<1x128x256xbf16>
    %278 = vector.shape_cast %277 : vector<1x128x256xbf16> to vector<128x256xbf16>
    %cst_279 = arith.constant dense<0.000000e+00> : vector<16x256xf32>
    %279 = tpu.matmul %276, %278, %cst_279 {dimension_numbers = #tpu.dot_dimension_numbers<[1], [0], [0], [1], [0, 0, 1, 1], [], []>} : vector<16x128xbf16>, vector<128x256xbf16>, vector<16x256xf32> -> vector<16x256xf32>
    %280 = arith.addf %275, %279 : vector<16x256xf32>
    %c18_280 = arith.constant 18 : index
    %c0_281 = arith.constant 0 : index
    %281 = vector.load %arg16[%c18_280, %c0_281] : memref<40x128xbf16, #tpu.memory_space<vmem>>, vector<16x128xbf16>
    %c8_282 = arith.constant 8 : index
    %c0_283 = arith.constant 0 : index
    %c0_284 = arith.constant 0 : index
    %282 = vector.load %arg8[%c8_282, %c0_283, %c0_284] : memref<9x128x256xbf16, #tpu.memory_space<vmem>>, vector<1x128x256xbf16>
    %283 = vector.shape_cast %282 : vector<1x128x256xbf16> to vector<128x256xbf16>
    %cst_285 = arith.constant dense<0.000000e+00> : vector<16x256xf32>
    %284 = tpu.matmul %281, %283, %cst_285 {dimension_numbers = #tpu.dot_dimension_numbers<[1], [0], [0], [1], [0, 0, 1, 1], [], []>} : vector<16x128xbf16>, vector<128x256xbf16>, vector<16x256xf32> -> vector<16x256xf32>
    %285 = arith.addf %280, %284 : vector<16x256xf32>
    %c0_286 = arith.constant 0 : index
    %c0_287 = arith.constant 0 : index
    %286 = vector.load %arg9[%c0_286, %c0_287] : memref<1x256xf32, #tpu.memory_space<vmem>>, vector<1x256xf32>
    %287 = vector.broadcast %286 : vector<1x256xf32> to vector<16x256xf32>
    %288 = arith.addf %285, %287 : vector<16x256xf32>
    %cst_288 = arith.constant 0.000000e+00 : f32
    %289 = vector.broadcast %cst_288 : f32 to vector<16x256xf32>
    %290 = arith.maximumf %288, %289 : vector<16x256xf32>
    %291 = arith.truncf %290 : vector<16x256xf32> to vector<16x256xbf16>
    %c0_289 = arith.constant 0 : index
    %c0_290 = arith.constant 0 : index
    %292 = vector.load %arg10[%c0_289, %c0_290] : memref<256x256xbf16, #tpu.memory_space<vmem>>, vector<256x256xbf16>
    %cst_291 = arith.constant dense<0.000000e+00> : vector<16x256xf32>
    %293 = tpu.matmul %291, %292, %cst_291 {dimension_numbers = #tpu.dot_dimension_numbers<[1], [0], [0], [1], [0, 0, 1, 1], [], []>} : vector<16x256xbf16>, vector<256x256xbf16>, vector<16x256xf32> -> vector<16x256xf32>
    %c0_292 = arith.constant 0 : index
    %c0_293 = arith.constant 0 : index
    %294 = vector.load %arg11[%c0_292, %c0_293] : memref<1x256xf32, #tpu.memory_space<vmem>>, vector<1x256xf32>
    %295 = vector.broadcast %294 : vector<1x256xf32> to vector<16x256xf32>
    %296 = arith.addf %293, %295 : vector<16x256xf32>
    %cst_294 = arith.constant 0.000000e+00 : f32
    %297 = vector.broadcast %cst_294 : f32 to vector<8x256xf32>
    %c0_295 = arith.constant 0 : index
    %c0_296 = arith.constant 0 : index
    %c0_297 = arith.constant 0 : index
    %298 = vector.load %arg12[%c0_295, %c0_296, %c0_297] : memref<1x8x256xf32, #tpu.memory_space<vmem>>, vector<1x8x256xf32>
    %299 = vector.shape_cast %298 : vector<1x8x256xf32> to vector<8x256xf32>
    %300 = vector.shape_cast %297 : vector<8x256xf32> to vector<1x8x256xf32>
    tpu.vector_store %arg12[%c0_295, %c0_296, %c0_297], %300 {strides = array<i32>} : memref<1x8x256xf32, #tpu.memory_space<vmem>>, vector<1x8x256xf32>,
    %301 = vector.extract_strided_slice %296 {offsets = [0, 0], sizes = [2, 256], strides = [1, 1]} : vector<16x256xf32> to vector<2x256xf32>
    %c0_298 = arith.constant 0 : index
    %c0_299 = arith.constant 0 : index
    %c0_300 = arith.constant 0 : index
    %302 = vector.load %arg12[%c0_298, %c0_299, %c0_300] : memref<1x8x256xf32, #tpu.memory_space<vmem>>, vector<1x2x256xf32>
    %303 = vector.shape_cast %302 : vector<1x2x256xf32> to vector<2x256xf32>
    %304 = vector.shape_cast %301 : vector<2x256xf32> to vector<1x2x256xf32>
    tpu.vector_store %arg12[%c0_298, %c0_299, %c0_300], %304 {strides = array<i32>} : memref<1x8x256xf32, #tpu.memory_space<vmem>>, vector<1x2x256xf32>,
    %305 = vector.extract_strided_slice %296 {offsets = [8, 0], sizes = [2, 256], strides = [1, 1]} : vector<16x256xf32> to vector<2x256xf32>
    %c0_301 = arith.constant 0 : index
    %c2_302 = arith.constant 2 : index
    %c0_303 = arith.constant 0 : index
    %306 = vector.load %arg12[%c0_301, %c2_302, %c0_303] : memref<1x8x256xf32, #tpu.memory_space<vmem>>, vector<1x2x256xf32>
    %307 = vector.shape_cast %306 : vector<1x2x256xf32> to vector<2x256xf32>
    %308 = vector.shape_cast %305 : vector<2x256xf32> to vector<1x2x256xf32>
    tpu.vector_store %arg12[%c0_301, %c2_302, %c0_303], %308 {strides = array<i32>} : memref<1x8x256xf32, #tpu.memory_space<vmem>>, vector<1x2x256xf32>,
    return
  }
  func.func @transform_0(%arg0: i32) -> (i32, i32, i32) {
    %c0_i32 = arith.constant 0 : i32
    %c0_i32_0 = arith.constant 0 : i32
    %c0_i32_1 = arith.constant 0 : i32
    return %arg0, %c0_i32, %c0_i32_0 : i32, i32, i32
  }
  func.func @transform_1(%arg0: i32) -> (i32, i32) {
    %c0_i32 = arith.constant 0 : i32
    %c0_i32_0 = arith.constant 0 : i32
    %c0_i32_1 = arith.constant 0 : i32
    return %c0_i32, %c0_i32_0 : i32, i32
  }
  func.func @transform_2(%arg0: i32) -> (i32, i32) {
    %c0_i32 = arith.constant 0 : i32
    %c0_i32_0 = arith.constant 0 : i32
    %c0_i32_1 = arith.constant 0 : i32
    return %c0_i32, %c0_i32_0 : i32, i32
  }
  func.func @transform_3(%arg0: i32) -> (i32, i32, i32) {
    %c0_i32 = arith.constant 0 : i32
    %c0_i32_0 = arith.constant 0 : i32
    %c0_i32_1 = arith.constant 0 : i32
    %c0_i32_2 = arith.constant 0 : i32
    return %c0_i32, %c0_i32_0, %c0_i32_1 : i32, i32, i32
  }
  func.func @transform_4(%arg0: i32) -> (i32, i32) {
    %c0_i32 = arith.constant 0 : i32
    %c0_i32_0 = arith.constant 0 : i32
    %c0_i32_1 = arith.constant 0 : i32
    return %c0_i32, %c0_i32_0 : i32, i32
  }
  func.func @transform_5(%arg0: i32) -> (i32, i32, i32) {
    %c0_i32 = arith.constant 0 : i32
    %c0_i32_0 = arith.constant 0 : i32
    %c0_i32_1 = arith.constant 0 : i32
    %c0_i32_2 = arith.constant 0 : i32
    return %c0_i32, %c0_i32_0, %c0_i32_1 : i32, i32, i32
  }
  func.func @transform_6(%arg0: i32) -> (i32, i32) {
    %c0_i32 = arith.constant 0 : i32
    %c0_i32_0 = arith.constant 0 : i32
    %c0_i32_1 = arith.constant 0 : i32
    return %c0_i32, %c0_i32_0 : i32, i32
  }
  func.func @transform_7(%arg0: i32) -> (i32, i32, i32) {
    %c0_i32 = arith.constant 0 : i32
    %c0_i32_0 = arith.constant 0 : i32
    %c0_i32_1 = arith.constant 0 : i32
    %c0_i32_2 = arith.constant 0 : i32
    return %c0_i32, %c0_i32_0, %c0_i32_1 : i32, i32, i32
  }
  func.func @transform_8(%arg0: i32) -> (i32, i32) {
    %c0_i32 = arith.constant 0 : i32
    %c0_i32_0 = arith.constant 0 : i32
    %c0_i32_1 = arith.constant 0 : i32
    return %c0_i32, %c0_i32_0 : i32, i32
  }
  func.func @transform_9(%arg0: i32) -> (i32, i32) {
    %c0_i32 = arith.constant 0 : i32
    %c0_i32_0 = arith.constant 0 : i32
    %c0_i32_1 = arith.constant 0 : i32
    return %c0_i32, %c0_i32_0 : i32, i32
  }
  func.func @transform_10(%arg0: i32) -> (i32, i32) {
    %c0_i32 = arith.constant 0 : i32
    %c0_i32_0 = arith.constant 0 : i32
    %c0_i32_1 = arith.constant 0 : i32
    return %c0_i32, %c0_i32_0 : i32, i32
  }
  func.func @transform_11(%arg0: i32) -> (i32, i32, i32) {
    %c0_i32 = arith.constant 0 : i32
    %c0_i32_0 = arith.constant 0 : i32
    %c0_i32_1 = arith.constant 0 : i32
    return %arg0, %c0_i32, %c0_i32_0 : i32, i32, i32
  }
}

</mosaic_0001>

<bundles_post_ra>
// kernel: _lambda_.1
= control target key start
LH: loop header
LB: loop body
LE: loop exit
PB: predicated region body
PF: predicated region fallthrough
CT: control target
= control target key end

     0   :  { %16 = vsyncpa [#allocation7], 0  ;;  %s7923_s17 = smov 0   ;;  %s9975_s0 = inlined_call_operand.vmem [shape: bf16[2,256,128], index: 0, kind: input, shape index: {}]   ;;  %s9976_s1 = inlined_call_operand.vmem [shape: bf16[128,128], index: 1, kind: input, shape index: {}]   ;;  %s9977_s2 = inlined_call_operand.vmem [shape: f32[1,128], index: 2, kind: input, shape index: {}]   ;;  %s9978_s3 = inlined_call_operand.hbm [shape: bf16[9,128,128], index: 3, kind: input, shape index: {}]   ;;  %s9979_s4 = inlined_call_operand.vmem [shape: f32[1,128], index: 4, kind: input, shape index: {}]   ;;  %s9980_s5 = inlined_call_operand.vmem [shape: bf16[9,128,128], index: 5, kind: input, shape index: {}]   ;;  %s9981_s6 = inlined_call_operand.vmem [shape: f32[1,128], index: 6, kind: input, shape index: {}]   ;;  %s9982_s7 = inlined_call_operand.vmem [shape: bf16[9,128,256], index: 7, kind: input, shape index: {}]   ;;  %s9983_s8 = inlined_call_operand.vmem [shape: f32[1,256], index: 8, kind: input, shape index: {}]   ;;  %s9984_s9 = inlined_call_operand.vmem [shape: bf16[256,256], index: 9, kind: input, shape index: {}]   ;;  %s9985_s10 = inlined_call_operand.vmem [shape: f32[1,256], index: 10, kind: input, shape index: {}]   ;;  %s9986_s11 = inlined_call_operand.vmem [shape: f32[2,8,256], index: 11, kind: output, shape index: {}]  }
   0x1 LB: > { %s306_s20 = sshll.u32 %s9978_s3, 4  ;;  %s5538_s21 = sadd.s32 4294967295, %s7856_s17   ;;  %s7856_s17 = sphi %s7923_s17, %s22_s17   ;;  %s307_s20 = int_to_ptr.hbm [resolvable:$true] %s306_s20 }
   0x2   : > { %p5540_p0 = scmp.ge.s32.totalorder %s7856_s17, 1  ;;  %p289_p1 = scmp.lt.s32.totalorder %s7856_s17, 3 }
   0x3   : > { %p7791_p2 = scmp.eq.s32.totalorder %s5538_s21, 0  ;;  %s7858_s22 = smov [#allocation6]  }
   0x4   : > { %p290_p3 = pnand %p5540_p0, %p289_p1  ;;  %s308_s23 = sshll.u32 %s7858_s22, 4  ;;  %s309_s23 = int_to_ptr.vmem [resolvable:$true] %s308_s23 }
   0x5   : > { %s7859_s24 = smov 64   ;;  %s7860_s25 = smov 4  }
   0x6   : > { %p7787_p4 = pneg %p290_p3  ;;  %353 = sbr.rel (%p290_p3) target bundleno = 1594 (0x63a), region = 64 }
   0x8   : > { %p7788_p5 = pnand %p7791_p2, %p7787_p4 }
   0xa   : > { %7790 = dma.hbm_to_vmem [thread:$0]  (!%p7788_p5), %s307_s20, 9216, %s309_s23, [#allocation7], %s7859_s24, %s7859_s24, %s7860_s25  }
   0xb   : > { %7844 = dma.done.wait (%p7791_p2), [#allocation7], 9216  }
   0xc   : > { %7846 = vsyncadd (%p7791_p2), [#allocation7], 4294958080  ;;  %v7360_v0 = vld [vmem:[%s9976_s1 + $0x38] sm:$0xff]  ;;  %v7359_v1 = vld [vmem:[%s9976_s1 + $0x30] sm:$0xff]  ;;  %p394_p6 = scmp.lt.s32.totalorder %s5538_s21, 1  ;;  %v7861_v32 = vmov 0  }
   0xd   : > { %634 = vmatpush.bf16.msra.mxu0 %v7360_v0  ;;  %v7358_v2 = vld [vmem:[%s9976_s1 + $0x28] sm:$0xff]  ;;  %v7357_v3 = vld [vmem:[%s9976_s1 + $0x20] sm:$0xff]  ;;  %v7356_v4 = vld [vmem:[%s9976_s1 + $0x18] sm:$0xff]  ;;  %405 = vst [vmem:[#allocation3] sm:$0xf] %v7861_v32  ;;  %vm808_vm0 = vcmask 1043456  }
   0xe   : > { %v7355_v5 = vld [vmem:[%s9976_s1 + $0x10] sm:$0xff]  ;;  %s9996_s21 = smov (!%p394_p6, %s5538_s21), 1  ;;  %v7354_v6 = vld [vmem:[%s9976_s1 + $0x8] sm:$0xff]  ;;  %v7353_v7 = vld [vmem:[%s9976_s1] sm:$0xff]  ;;  %406 = vst [vmem:[#allocation3 + $0x4] sm:$0xf] %v7861_v32 }
   0xf   : > { %s7335_s23 = sshll.u32 %s9996_s21, 7  ;;  %v7375_v15 = vld [vmem:[#allocation6 + $0x38] sm:$0xff]  ;;  %v7374_v16 = vld [vmem:[#allocation6 + $0x30] sm:$0xff]  ;;  %v7373_v18 = vld [vmem:[#allocation6 + $0x28] sm:$0xff]  ;;  %407 = vst [vmem:[#allocation3 + $0x8] sm:$0xf] %v7861_v32 }
  0x10   : > { %s7964_s28 = scalar_lea.vmem %s9975_s0, %s7335_s23  ;;  %1339 = vmatpush.bf16.msra.mxu2 %v7375_v15  ;;  %v7372_v19 = vld [vmem:[#allocation6 + $0x20] sm:$0xff]  ;;  %v7371_v20 = vld [vmem:[#allocation6 + $0x18] sm:$0xff]  ;;  %v7370_v23 = vld [vmem:[#allocation6 + $0x10] sm:$0xff]  ;;  %408 = vst [vmem:[#allocation3 + $0xc] sm:$0xf] %v7861_v32  ;;  %vm814_vm2 = vcmask 1040384  }
  0x11   : > { %635 = vmatpush.bf16.msra.mxu0 %v7359_v1  ;;  %v7337_v8 = vld [vmem:[%s7964_s28] sm:$0xff]  ;;  %v7338_v9 = vld [vmem:[%s7964_s28 + $0x8] sm:$0xff]  ;;  %v7339_v10 = vld [vmem:[%s7964_s28 + $0x10] sm:$0xff]  ;;  %409 = vst [vmem:[#allocation3 + $0x10] sm:$0xf] %v7861_v32  ;;  %vm1409_vm6 = vcmask 1046528  }
  0x12   : > { %v7340_v11 = vld [vmem:[%s7964_s28 + $0x18] sm:$0xff]  ;;  %v7341_v12 = vld [vmem:[%s7964_s28 + $0x20] sm:$0xff]  ;;  %v7342_v13 = vld [vmem:[%s7964_s28 + $0x28] sm:$0xff]  ;;  %410 = vst [vmem:[#allocation3 + $0x14] sm:$0xf] %v7861_v32  ;;  %vm2854_vm8 = vcmask 1042432  }
  0x13   : > { %v7343_v14 = vld [vmem:[%s7964_s28 + $0x30] sm:$0xff]  ;;  %v7344_v17 = vld [vmem:[%s7964_s28 + $0x38] sm:$0xff]  ;;  %v7977_v21 = vld [vmem:[%s9977_s2] ss:$0 sm:$0xff]  ;;  %411 = vst [vmem:[#allocation3 + $0x18] sm:$0xf] %v7861_v32 }
  0x14   : > { %1340 = vmatpush.bf16.msra.mxu2 %v7374_v16  ;;  %v7391_v22 = vld [vmem:[#allocation6 + $0xb8] sm:$0xff]  ;;  %v7390_v28 = vld [vmem:[#allocation6 + $0xb0] sm:$0xff]  ;;  %v7369_v29 = vld [vmem:[#allocation6 + $0x8] sm:$0xff]  ;;  %412 = vst [vmem:[#allocation3 + $0x1c] sm:$0xf] %v7861_v32  ;;  %vm3903_vm11 = vcmask 1041408  }
  0x15   : > { %636 = vmatpush.bf16.msra.mxu0 %v7358_v2  ;;  %v7345_v24 = vld [vmem:[%s7964_s28 + $0x40] sm:$0xff]  ;;  %1483 = vmatpush.bf16.msra.mxu3 %v7391_v22  ;;  %v7382_v31 = vld [vmem:[#allocation6 + $0x70] sm:$0xff]  ;;  %v7389_v33 = vld [vmem:[#allocation6 + $0xa8] sm:$0xff]  ;;  %413 = vst [vmem:[#allocation3 + $0x20] sm:$0xf] %v7861_v32  ;;  %s7336_s16 = sshll.u32 %s9996_s21, 4 }
  0x16   : > { %v7383_v25 = vld [vmem:[#allocation6 + $0x78] sm:$0xff]  ;;  %v7368_v34 = vld [vmem:[#allocation6] sm:$0xff]  ;;  %v7381_v35 = vld [vmem:[#allocation6 + $0x68] sm:$0xff]  ;;  %414 = vst [vmem:[#allocation3 + $0x24] sm:$0xf] %v7861_v32  ;;  %s403_s20 = scalar_lea.vmem %s9986_s11, %s7336_s16 }
  0x17   : > { %1234 = vmatpush.bf16.msra.mxu1 %v7383_v25  ;;  %v7388_v38 = vld [vmem:[#allocation6 + $0xa0] sm:$0xff]  ;;  %v7387_v42 = vld [vmem:[#allocation6 + $0x98] sm:$0xff]  ;;  %415 = vst [vmem:[#allocation3 + $0x28] sm:$0xf] %v7861_v32  ;;  %v7386_v47 = vld [vmem:[#allocation6 + $0x90] sm:$0xff] }
  0x18   : > { %1341 = vmatpush.bf16.msra.mxu2 %v7373_v18  ;;  %v7989_v40 = vld [vmem:[#allocation3] sm:$0xff]   ;;  %v7346_v43 = vld [vmem:[%s7964_s28 + $0x48] sm:$0xff]  ;;  %416 = vst [vmem:[#allocation3 + $0x2c] sm:$0xf] %v7861_v32  ;;  %v7378_v49 = vld [vmem:[#allocation6 + $0x50] sm:$0xff] }
  0x19   : > { %637 = vmatpush.bf16.msra.mxu0 %v7357_v3  ;;  %1484 = vmatpush.bf16.msra.mxu3 %v7390_v28  ;;  %v7380_v41 = vld [vmem:[#allocation6 + $0x60] sm:$0xff]  ;;  %v7379_v44 = vld [vmem:[#allocation6 + $0x58] sm:$0xff]  ;;  %417 = vst [vmem:[#allocation3 + $0x30] sm:$0xf] %v7861_v32  ;;  %v7385_v50 = vld [vmem:[#allocation6 + $0x88] sm:$0xff]  ;;  %v1111_v28 = vshrl.u32 %v7989_v40, 16 }
  0x1a   : > { %418 = vst [vmem:[#allocation3 + $0x34] sm:$0xf] %v7861_v32  ;;  %v7377_v51 = vld [vmem:[#allocation6 + $0x48] sm:$0xff]  ;;  %v7384_v54 = vld [vmem:[#allocation6 + $0x80] sm:$0xff]  ;;  %vm809_vm1 = vsmask.f32 7938 }
  0x1b   : > { %1235 = vmatpush.bf16.msra.mxu1 %v7382_v31  ;;  %419 = vst [vmem:[#allocation3 + $0x38] sm:$0xf] %v7861_v32  ;;  %v7376_v56 = vld [vmem:[#allocation6 + $0x40] sm:$0xff]  ;;  %v7347_v57 = vld [vmem:[%s7964_s28 + $0x50] sm:$0xff]  ;;  %vm815_vm3 = vsmask.f32 256  ;;  %vm8024_vm4 = vmand %vm808_vm0, %vm809_vm1 }
  0x1c   : > { %1342 = vmatpush.bf16.msra.mxu2 %v7372_v19  ;;  %420 = vst [vmem:[#allocation3 + $0x3c] sm:$0xf] %v7861_v32  ;;  %vm8028_vm5 = vmand %vm814_vm2, %vm815_vm3  ;;  %v7348_v15 = vld [vmem:[%s7964_s28 + $0x58] sm:$0xff]  ;;  %v7756_v25 = vld [vmem:[#allocation3] sm:$0xe] }
  0x1d   : > { %638 = vmatpush.bf16.msra.mxu0 %v7356_v4  ;;  %1485 = vmatpush.bf16.msra.mxu3 %v7389_v33  ;;  %421 = vst [vmem:[#allocation3 + $0x40] sm:$0xf] %v7861_v32  ;;  %vm1109_vm7 = vsmask.f32 7424  ;;  %vm2855_vm9 = vsmask.f32 2306 }
  0x1e   : > { %422 = vst [vmem:[#allocation3 + $0x44] sm:$0xf] %v7861_v32  ;;  %vm8408_vm10 = vmand %vm2854_vm8, %vm2855_vm9  ;;  %vm3904_vm12 = vsmask.f32 1282 }
  0x1f   : > { %1236 = vmatpush.bf16.msra.mxu1 %v7381_v35  ;;  %423 = vst [vmem:[#allocation3 + $0x48] sm:$0xf] %v7861_v32  ;;  %vm9131_vm13 = vmand %vm3903_vm11, %vm3904_vm12 }
  0x20   : > { %1343 = vmatpush.bf16.msra.mxu2 %v7371_v20  ;;  %424 = vst [vmem:[#allocation3 + $0x4c] sm:$0xf] %v7861_v32 }
  0x21   : > { %639 = vmatpush.bf16.msra.mxu0 %v7355_v5  ;;  %1486 = vmatpush.bf16.msra.mxu3 %v7388_v38  ;;  %425 = vst [vmem:[#allocation3 + $0x50] sm:$0xf] %v7861_v32 }
  0x22   : > { %426 = vst [vmem:[#allocation4] sm:$0xf] %v7861_v32 }
  0x23   : > { %1237 = vmatpush.bf16.msra.mxu1 %v7380_v41  ;;  %427 = vst [vmem:[#allocation4 + $0x4] sm:$0xf] %v7861_v32 }
  0x24   : > { %1344 = vmatpush.bf16.msra.mxu2 %v7370_v23  ;;  %428 = vst [vmem:[#allocation4 + $0x8] sm:$0xf] %v7861_v32  ;;  %v7755_v23 = vld [vmem:[#allocation3] sm:$0xf0] }
  0x25   : > { %640 = vmatpush.bf16.msra.mxu0 %v7354_v6  ;;  %1487 = vmatpush.bf16.msra.mxu3 %v7387_v42  ;;  %429 = vst [vmem:[#allocation4 + $0xc] sm:$0xf] %v7861_v32 }
  0x26   : > { %430 = vst [vmem:[#allocation4 + $0x10] sm:$0xf] %v7861_v32 }
  0x27   : > { %1238 = vmatpush.bf16.msra.mxu1 %v7379_v44  ;;  %431 = vst [vmem:[#allocation4 + $0x14] sm:$0xf] %v7861_v32 }
  0x28   : > { %1345 = vmatpush.bf16.msra.mxu2 %v7369_v29  ;;  %432 = vst [vmem:[#allocation4 + $0x18] sm:$0xf] %v7861_v32 }
  0x29   : > { %641 = vmatpush.bf16.msra.mxu0 %v7353_v7  ;;  %1488 = vmatpush.bf16.msra.mxu3 %v7386_v47  ;;  %433 = vst [vmem:[#allocation5] sm:$0xf] %v7861_v32  ;;  %v7446_v47 = vld [vmem:[#allocation6 + $0x1b8] sm:$0xff] }
  0x2a   : > { %434 = vst [vmem:[#allocation5 + $0x4] sm:$0xf] %v7861_v32 }
  0x2b   : > { %1239 = vmatpush.bf16.msra.mxu1 %v7378_v49  ;;  %435 = vst [vmem:[#allocation5 + $0x8] sm:$0xf] %v7861_v32 }
  0x2c   : > { %642 = vmatmul.bf16.vlgmr.msra.gmra.mxu0 %v7337_v8  ;;  %1346 = vmatpush.bf16.msra.mxu2 %v7368_v34  ;;  %436 = vst [vmem:[#allocation5 + $0xc] sm:$0xf] %v7861_v32 }
  0x2d   : > { %1489 = vmatpush.bf16.msra.mxu3 %v7385_v50  ;;  %437 = vst [vmem:[#allocation5 + $0x10] sm:$0xf] %v7861_v32  ;;  %2296 = vmatpush.bf16.msrb.mxu0 %v7446_v47 }
  0x2f   : > { %1347 = vmatmul.bf16.vlgmr.msra.gmra.mxu2 %v7989_v40  ;;  %1240 = vmatpush.bf16.msra.mxu1 %v7377_v51 }
  0x31   : > { %1490 = vmatpush.bf16.msra.mxu3 %v7384_v54 }
  0x33   : > { %1241 = vmatpush.bf16.msra.mxu1 %v7376_v56 }
  0x3c   : > { %647 = vmatmul.bf16.gmra.mxu0 %v7338_v9 }
  0x4c   : > { %652 = vmatmul.bf16.gmra.mxu0 %v7339_v10 }
  0x5c   : > { %657 = vmatmul.bf16.gmra.mxu0 %v7340_v11 }
  0x6c   : > { %662 = vmatmul.bf16.gmra.mxu0 %v7341_v12  ;;  %v811_v12 = vld [vmem:[#allocation3 + $0x8] sm:$0xf] }
  0x7c   : > { %667 = vmatmul.bf16.gmra.mxu0 %v7342_v13 }
  0x8c   : > { %672 = vmatmul.bf16.gmra.mxu0 %v7343_v14  ;;  %v817_v14 = vld [vmem:[#allocation3 + $0xc] sm:$0x1] }
  0x9c   : > { %677 = vmatmul.bf16.gmra.mxu0 %v7344_v17 }
  0xa9   : > { %v643_v26 = vpop.f32.mrf.mxu0 }
  0xaa   : > { %v644_v27 = vadd.f32 %v7977_v21, %v643_v26  ;;  %v1113_v26 = vshll.u32 %v7989_v40, 16  ;;  %v7349_v40 = vld [vmem:[%s7964_s28 + $0x60] sm:$0xff] }
  0xac   : > { %v723_v30 = vmax.f32 %v644_v27, 0.0  ;;  %682 = vmatmul.bf16.gmra.mxu0 %v7345_v24  ;;  %v7757_v27 = vor.u32 %v7756_v25, %v7755_v23  ;;  %v1115_v29 = vrot.slane %v1113_v26, 1  ;;  %v7351_v25 = vld [vmem:[%s7964_s28 + $0x70] sm:$0xff]  ;;  %v7439_v26 = vld [vmem:[#allocation6 + $0x180] sm:$0xff] }
  0xae   : > { %755 = vst [vmem:[#allocation2] sm:$0xff] %v723_v30  ;;  %v1410_v33 = vrot.slane %v7757_v27, 1 }
  0xb1   : > { %v645_v36 = vpop.f32.mrf.mxu0 }
  0xb2   : > { %v646_v37 = vadd.f32 %v7977_v21, %v645_v36  ;;  %v1116_v36 = vor.u32 %v1115_v29, %v1111_v28 }
  0xb4   : > { %v724_v39 = vmax.f32 %v646_v37, 0.0 }
  0xb6   : > { %756 = vst [vmem:[#allocation2 + $0x8] sm:$0xff] %v724_v39 }
  0xb9   : > { %v648_v45 = vpop.f32.mrf.mxu0 }
  0xba   : > { %v649_v46 = vadd.f32 %v7977_v21, %v648_v45 }
  0xbc   : > { %v725_v48 = vmax.f32 %v649_v46, 0.0  ;;  %687 = vmatmul.bf16.gmra.mxu0 %v7346_v43 }
  0xbd   : > { %v787_v60 = vld [vmem:[#allocation2] ss:$2 sm:$0xff]  ;;  %v789_v61 = vld [vmem:[#allocation2 + $0x1] ss:$2 sm:$0xff] }
  0xbe   : > { %757 = vst [vmem:[#allocation2 + $0x10] sm:$0xff] %v725_v48  ;;  %v794_v1 = vmax.f32 %v787_v60, %v789_v61 }
  0xc1   : > { %v650_v52 = vpop.f32.mrf.mxu0 }
  0xc2   : > { %v651_v53 = vadd.f32 %v7977_v21, %v650_v52 }
  0xc4   : > { %v726_v55 = vmax.f32 %v651_v53, 0.0  ;;  %v7445_v53 = vld [vmem:[#allocation6 + $0x1b0] sm:$0xff] }
  0xc5   : > { %2297 = vmatpush.bf16.msrb.mxu0 %v7445_v53 }
  0xc6   : > { %758 = vst [vmem:[#allocation2 + $0x18] sm:$0xff] %v726_v55 }
  0xc9   : > { %v653_v58 = vpop.f32.mrf.mxu0 }
  0xca   : > { %v654_v59 = vadd.f32 %v7977_v21, %v653_v58 }
  0xcc   : > { %v727_v62 = vmax.f32 %v654_v59, 0.0  ;;  %692 = vmatmul.bf16.gmra.mxu0 %v7347_v57  ;;  %v7444_v59 = vld [vmem:[#allocation6 + $0x1a8] sm:$0xff] }
  0xcd   : > { %v791_v63 = vld [vmem:[#allocation2 + $0x10] ss:$2 sm:$0xff]  ;;  %v793_v0 = vld [vmem:[#allocation2 + $0x11] ss:$2 sm:$0xff]  ;;  %2298 = vmatpush.bf16.msrb.mxu0 %v7444_v59 }
  0xce   : > { %v795_v2 = vmax.f32 %v791_v63, %v793_v0  ;;  %759 = vst [vmem:[#allocation2 + $0x20] sm:$0xff] %v727_v62  ;;  %v842_v62 = vld [vmem:[#allocation3 + $0x10] sm:$0xf]  ;;  %v845_v63 = vld [vmem:[#allocation3 + $0x14] sm:$0x1] }
  0xd0   : > { %v796_v3 = vmax.f32 %v794_v1, %v795_v2  ;;  %v7350_v2 = vld [vmem:[%s7964_s28 + $0x68] sm:$0xff] }
  0xd1   : > { %v655_v4 = vpop.f32.mrf.mxu0 }
  0xd2   : > { %v797_v5 = vpack.c.bf16 %v796_v3, %v796_v3  ;;  %v656_v6 = vadd.f32 %v7977_v21, %v655_v4  ;;  %v7443_v3 = vld [vmem:[#allocation6 + $0x1a0] sm:$0xff] }
  0xd3   : > { %2299 = vmatpush.bf16.msrb.mxu0 %v7443_v3 }
  0xd4   : > { %v799_v7 = vshrl.u32 %v797_v5, 16  ;;  %v728_v8 = vmax.f32 %v656_v6, 0.0  ;;  %v802_v10 = vshll.u32 %v797_v5, 16 }
  0xd6   : > { %v801_v9 = vrot.slane %v799_v7, 7  ;;  %760 = vst [vmem:[#allocation2 + $0x28] sm:$0xff] %v728_v8 }
  0xd8   : > { %v804_v16 = vor.u32 %v802_v10, %v801_v9  ;;  %v805_v17 = vrot.slane %v801_v9, 4  ;;  %v7442_v9 = vld [vmem:[#allocation6 + $0x198] sm:$0xff]  ;;  %v7441_v10 = vld [vmem:[#allocation6 + $0x190] sm:$0xff] }
  0xd9   : > { %v658_v18 = vpop.f32.mrf.mxu0  ;;  %2300 = vmatpush.bf16.msrb.mxu0 %v7442_v9 }
  0xda   : > { %v659_v19 = vadd.f32 %v7977_v21, %v658_v18  ;;  %v812_v20 = vsel %vm8024_vm4, %v804_v16, %v811_v12  ;;  %v818_v22 = vsel %vm8028_vm5, %v805_v17, %v817_v14  ;;  %v7440_v17 = vld [vmem:[#allocation6 + $0x188] sm:$0xff] }
  0xdb   : > { %813 = vst [vmem:[#allocation3 + $0x8] sm:$0xf] %v812_v20 }
  0xdc   : > { %v729_v24 = vmax.f32 %v659_v19, 0.0  ;;  %697 = vmatmul.bf16.gmra.mxu0 %v7348_v15  ;;  %819 = vst [vmem:[#allocation3 + $0xc] sm:$0x1] %v818_v22 }
  0xdd   : > { %v821_v44 = vld [vmem:[#allocation2 + $0x20] ss:$2 sm:$0xff]  ;;  %v823_v45 = vld [vmem:[#allocation2 + $0x21] ss:$2 sm:$0xff]  ;;  %2301 = vmatpush.bf16.msrb.mxu0 %v7441_v10 }
  0xde   : > { %761 = vst [vmem:[#allocation2 + $0x30] sm:$0xff] %v729_v24  ;;  %v828_v50 = vmax.f32 %v821_v44, %v823_v45  ;;  %v870_v45 = vld [vmem:[#allocation3 + $0x18] sm:$0xf] }
  0xe1   : > { %v660_v30 = vpop.f32.mrf.mxu0  ;;  %2302 = vmatpush.bf16.msrb.mxu0 %v7440_v17 }
  0xe2   : > { %v661_v31 = vadd.f32 %v7977_v21, %v660_v30 }
  0xe3   : > { %v8041_v32 = vld [vmem:[#allocation3 + $0x8] sm:$0xff] }
  0xe4   : > { %v730_v34 = vmax.f32 %v661_v31, 0.0  ;;  %1352 = vmatmul.bf16.gmra.mxu2 %v8041_v32  ;;  %v1411_v35 = vrot.slane %v8041_v32, 1  ;;  %v1118_v37 = vshll.u32 %v8041_v32, 16  ;;  %v1122_v19 = vshrl.u32 %v8041_v32, 16 }
  0xe5   : > { %2303 = vmatpush.bf16.msrb.mxu0 %v7439_v26 }
  0xe6   : > { %762 = vst [vmem:[#allocation2 + $0x38] sm:$0xff] %v730_v34  ;;  %v1412_v38 = vsel %vm1409_vm6, %v1410_v33, %v1411_v35  ;;  %v8049_v39 = vrot.slane %v1118_v37, 1 }
  0xe7   : > { %1491 = vmatmul.bf16.vlgmr.msra.gmra.mxu3 %v1412_v38 }
  0xe8   : > { %v1121_v42 = vsel %vm1109_vm7, %v1116_v36, %v8049_v39  ;;  %v1124_v23 = vor.u32 %v1122_v19, %v8049_v39 }
  0xe9   : > { %v663_v41 = vpop.f32.mrf.mxu0  ;;  %1242 = vmatmul.bf16.vlgmr.msra.gmra.mxu1 %v1121_v42 }
  0xea   : > { %v664_v43 = vadd.f32 %v7977_v21, %v663_v41 }
  0xec   : > { %v731_v46 = vmax.f32 %v664_v43, 0.0  ;;  %702 = vmatmul.bf16.gmra.mxu0 %v7349_v40 }
  0xed   : > { %v825_v48 = vld [vmem:[#allocation2 + $0x30] ss:$2 sm:$0xff]  ;;  %v827_v49 = vld [vmem:[#allocation2 + $0x31] ss:$2 sm:$0xff] }
  0xee   : > { %v829_v51 = vmax.f32 %v825_v48, %v827_v49  ;;  %763 = vst [vmem:[#allocation2 + $0x40] sm:$0xff] %v731_v46  ;;  %v873_v46 = vld [vmem:[#allocation3 + $0x1c] sm:$0x1] }
  0xef   : > { %v7352_v49 = vld [vmem:[%s7964_s28 + $0x78] sm:$0xff] }
  0xf0   : > { %v830_v52 = vmax.f32 %v828_v50, %v829_v51 }
  0xf1   : > { %v665_v54 = vpop.f32.mrf.mxu0 }
  0xf2   : > { %v831_v55 = vpack.c.bf16 %v830_v52, %v830_v52  ;;  %v666_v56 = vadd.f32 %v7977_v21, %v665_v54 }
  0xf4   : > { %v833_v57 = vshrl.u32 %v831_v55, 16  ;;  %v732_v58 = vmax.f32 %v666_v56, 0.0  ;;  %v836_v61 = vshll.u32 %v831_v55, 16 }
  0xf6   : > { %v835_v60 = vrot.slane %v833_v57, 7  ;;  %764 = vst [vmem:[#allocation2 + $0x48] sm:$0xff] %v732_v58 }
  0xf8   : > { %v838_v0 = vor.u32 %v836_v61, %v835_v60  ;;  %v839_v1 = vrot.slane %v835_v60, 4 }
  0xf9   : > { %v668_v4 = vpop.f32.mrf.mxu0 }
  0xfa   : > { %v669_v5 = vadd.f32 %v7977_v21, %v668_v4  ;;  %v843_v6 = vsel %vm8024_vm4, %v838_v0, %v842_v62  ;;  %v846_v7 = vsel %vm8028_vm5, %v839_v1, %v845_v63 }
  0xfb   : > { %844 = vst [vmem:[#allocation3 + $0x10] sm:$0xf] %v843_v6 }
  0xfc   : > { %v733_v8 = vmax.f32 %v669_v5, 0.0  ;;  %707 = vmatmul.bf16.gmra.mxu0 %v7350_v2  ;;  %847 = vst [vmem:[#allocation3 + $0x14] sm:$0x1] %v846_v7 }
  0xfd   : > { %v849_v30 = vld [vmem:[#allocation2 + $0x40] ss:$2 sm:$0xff]  ;;  %v851_v31 = vld [vmem:[#allocation2 + $0x41] ss:$2 sm:$0xff] }
  0xfe   : > { %765 = vst [vmem:[#allocation2 + $0x50] sm:$0xff] %v733_v8 }
 0x101   : > { %v670_v12 = vpop.f32.mrf.mxu0 }
 0x102   : > { %v671_v14 = vadd.f32 %v7977_v21, %v670_v12 }
 0x103   : > { %v8063_v15 = vld [vmem:[#allocation3 + $0x10] sm:$0xff] }
 0x104   : > { %v734_v16 = vmax.f32 %v671_v14, 0.0  ;;  %1357 = vmatmul.bf16.gmra.mxu2 %v8063_v15  ;;  %v1413_v18 = vrot.slane %v8063_v15, 1  ;;  %v1126_v20 = vshll.u32 %v8063_v15, 16  ;;  %v1130_v60 = vshrl.u32 %v8063_v15, 16  ;;  %v7431_v4 = vld [vmem:[#allocation3 + $0x10] sm:$0xff] }
 0x106   : > { %766 = vst [vmem:[#allocation2 + $0x58] sm:$0xff] %v734_v16  ;;  %v1414_v22 = vsel %vm1409_vm6, %v1411_v35, %v1413_v18  ;;  %v1128_v24 = vrot.slane %v1126_v20, 1  ;;  %v856_v35 = vmax.f32 %v849_v30, %v851_v31 }
 0x107   : > { %1496 = vmatmul.bf16.gmra.mxu3 %v1414_v22 }
 0x108   : > { %v1129_v28 = vsel %vm1109_vm7, %v1124_v23, %v1128_v24  ;;  %v1132_v63 = vor.u32 %v1130_v60, %v1128_v24  ;;  %v898_v23 = vld [vmem:[#allocation3 + $0x20] sm:$0xf]  ;;  %v901_v24 = vld [vmem:[#allocation3 + $0x24] sm:$0x1] }
 0x109   : > { %v673_v27 = vpop.f32.mrf.mxu0  ;;  %1247 = vmatmul.bf16.gmra.mxu1 %v1129_v28 }
 0x10a   : > { %v674_v29 = vadd.f32 %v7977_v21, %v673_v27  ;;  %v8089_v27 = vpop.f32.mrf.mxu2 }
 0x10c   : > { %v735_v33 = vmax.f32 %v674_v29, 0.0  ;;  %712 = vmatmul.bf16.gmra.mxu0 %v7351_v25 }
 0x10d   : > { %v853_v32 = vld [vmem:[#allocation2 + $0x50] ss:$2 sm:$0xff]  ;;  %v855_v34 = vld [vmem:[#allocation2 + $0x51] ss:$2 sm:$0xff] }
 0x10e   : > { %v857_v36 = vmax.f32 %v853_v32, %v855_v34  ;;  %767 = vst [vmem:[#allocation2 + $0x60] sm:$0xff] %v735_v33 }
 0x110   : > { %v858_v37 = vmax.f32 %v856_v35, %v857_v36 }
 0x111   : > { %v675_v38 = vpop.f32.mrf.mxu0 }
 0x112   : > { %v859_v39 = vpack.c.bf16 %v858_v37, %v858_v37  ;;  %v676_v40 = vadd.f32 %v7977_v21, %v675_v38  ;;  %v1350_v34 = vpop.f32.mrf.mxu2 }
 0x114   : > { %v861_v41 = vshrl.u32 %v859_v39, 16  ;;  %v736_v42 = vmax.f32 %v676_v40, 0.0  ;;  %v864_v44 = vshll.u32 %v859_v39, 16 }
 0x116   : > { %v863_v43 = vrot.slane %v861_v41, 7  ;;  %768 = vst [vmem:[#allocation2 + $0x68] sm:$0xff] %v736_v42 }
 0x118   : > { %v866_v47 = vor.u32 %v864_v44, %v863_v43  ;;  %v867_v48 = vrot.slane %v863_v43, 4 }
 0x119   : > { %v678_v50 = vpop.f32.mrf.mxu0 }
 0x11a   : > { %v679_v51 = vadd.f32 %v7977_v21, %v678_v50  ;;  %v871_v52 = vsel %vm8024_vm4, %v866_v47, %v870_v45  ;;  %v874_v53 = vsel %vm8028_vm5, %v867_v48, %v873_v46 }
 0x11b   : > { %872 = vst [vmem:[#allocation3 + $0x18] sm:$0xf] %v871_v52 }
 0x11c   : > { %v737_v54 = vmax.f32 %v679_v51, 0.0  ;;  %717 = vmatmul.bf16.gmra.mxu0 %v7352_v49  ;;  %875 = vst [vmem:[#allocation3 + $0x1c] sm:$0x1] %v874_v53 }
 0x11d   : > { %v877_v5 = vld [vmem:[#allocation2 + $0x60] ss:$2 sm:$0xff]  ;;  %v879_v6 = vld [vmem:[#allocation2 + $0x61] ss:$2 sm:$0xff] }
 0x11e   : > { %769 = vst [vmem:[#allocation2 + $0x70] sm:$0xff] %v737_v54  ;;  %v884_v10 = vmax.f32 %v877_v5, %v879_v6 }
 0x121   : > { %v680_v55 = vpop.f32.mrf.mxu0 }
 0x122   : > { %v681_v56 = vadd.f32 %v7977_v21, %v680_v55 }
 0x123   : > { %v7363_v57 = vld [vmem:[#allocation3 + $0x18] sm:$0xff] }
 0x124   : > { %v738_v58 = vmax.f32 %v681_v56, 0.0  ;;  %1362 = vmatmul.bf16.gmra.mxu2 %v7363_v57  ;;  %v1415_v59 = vrot.slane %v7363_v57, 1  ;;  %v1134_v61 = vshll.u32 %v7363_v57, 16  ;;  %v7432_v30 = vld [vmem:[#allocation3 + $0x18] sm:$0xff]  ;;  %v1138_v40 = vshrl.u32 %v7363_v57, 16 }
 0x126   : > { %770 = vst [vmem:[#allocation2 + $0x78] sm:$0xff] %v738_v58  ;;  %v1416_v62 = vsel %vm1409_vm6, %v1413_v18, %v1415_v59  ;;  %v1136_v0 = vrot.slane %v1134_v61, 1 }
 0x127   : > { %1501 = vmatmul.bf16.gmra.mxu3 %v1416_v62 }
 0x128   : > { %v1137_v2 = vsel %vm1109_vm7, %v1132_v63, %v1136_v0  ;;  %v1140_v43 = vor.u32 %v1138_v40, %v1136_v0  ;;  %v926_v0 = vld [vmem:[#allocation3 + $0x28] sm:$0xf] }
 0x129   : > { %v683_v1 = vpop.f32.mrf.mxu0  ;;  %1252 = vmatmul.bf16.gmra.mxu1 %v1137_v2 }
 0x12a   : > { %v684_v3 = vadd.f32 %v7977_v21, %v683_v1  ;;  %v929_v1 = vld [vmem:[#allocation3 + $0x2c] sm:$0x1] }
 0x12c   : > { %v739_v7 = vmax.f32 %v684_v3, 0.0  ;;  %2304 = vmatmul.bf16.vlgmr.msrb.gmra.mxu0 %v7431_v4 }
 0x12d   : > { %v881_v8 = vld [vmem:[#allocation2 + $0x70] ss:$2 sm:$0xff]  ;;  %v883_v9 = vld [vmem:[#allocation2 + $0x71] ss:$2 sm:$0xff] }
 0x12e   : > { %v885_v12 = vmax.f32 %v881_v8, %v883_v9  ;;  %771 = vst [vmem:[#allocation2 + $0x80] sm:$0xff] %v739_v7  ;;  %v7422_v9 = vld [vmem:[#allocation6 + $0x138] sm:$0xff] }
 0x12f   : > { %1943 = vmatpush.bf16.msrb.mxu2 %v7422_v9 }
 0x130   : > { %v886_v14 = vmax.f32 %v884_v10, %v885_v12  ;;  %v7407_v10 = vld [vmem:[#allocation6 + $0xf8] sm:$0xff] }
 0x131   : > { %v685_v15 = vpop.f32.mrf.mxu0  ;;  %1677 = vmatpush.bf16.msrb.mxu1 %v7407_v10 }
 0x132   : > { %v887_v16 = vpack.c.bf16 %v886_v14, %v886_v14  ;;  %v686_v17 = vadd.f32 %v7977_v21, %v685_v15 }
 0x134   : > { %v889_v18 = vshrl.u32 %v887_v16, 16  ;;  %v740_v19 = vmax.f32 %v686_v17, 0.0  ;;  %v892_v22 = vshll.u32 %v887_v16, 16 }
 0x136   : > { %v891_v20 = vrot.slane %v889_v18, 7  ;;  %772 = vst [vmem:[#allocation2 + $0x88] sm:$0xff] %v740_v19 }
 0x138   : > { %v894_v25 = vor.u32 %v892_v22, %v891_v20  ;;  %v895_v26 = vrot.slane %v891_v20, 4 }
 0x139   : > { %v688_v28 = vpop.f32.mrf.mxu0 }
 0x13a   : > { %v689_v29 = vadd.f32 %v7977_v21, %v688_v28  ;;  %v899_v31 = vsel %vm8024_vm4, %v894_v25, %v898_v23  ;;  %v902_v33 = vsel %vm8028_vm5, %v895_v26, %v901_v24 }
 0x13b   : > { %900 = vst [vmem:[#allocation3 + $0x20] sm:$0xf] %v899_v31 }
 0x13c   : > { %v741_v32 = vmax.f32 %v689_v29, 0.0  ;;  %2309 = vmatmul.bf16.gmra.mxu0 %v7432_v30  ;;  %903 = vst [vmem:[#allocation3 + $0x24] sm:$0x1] %v902_v33 }
 0x13d   : > { %v905_v49 = vld [vmem:[#allocation2 + $0x80] ss:$2 sm:$0xff]  ;;  %v907_v50 = vld [vmem:[#allocation2 + $0x81] ss:$2 sm:$0xff] }
 0x13e   : > { %773 = vst [vmem:[#allocation2 + $0x90] sm:$0xff] %v741_v32  ;;  %v912_v54 = vmax.f32 %v905_v49, %v907_v50 }
 0x141   : > { %v690_v35 = vpop.f32.mrf.mxu0 }
 0x142   : > { %v691_v36 = vadd.f32 %v7977_v21, %v690_v35 }
 0x143   : > { %v8097_v37 = vld [vmem:[#allocation3 + $0x20] sm:$0xff] }
 0x144   : > { %v742_v38 = vmax.f32 %v691_v36, 0.0  ;;  %1367 = vmatmul.bf16.gmra.mxu2 %v8097_v37  ;;  %v1417_v39 = vrot.slane %v8097_v37, 1  ;;  %v1142_v41 = vshll.u32 %v8097_v37, 16  ;;  %v7433_v48 = vld [vmem:[#allocation3 + $0x20] sm:$0xff]  ;;  %v1146_v19 = vshrl.u32 %v8097_v37, 16 }
 0x146   : > { %774 = vst [vmem:[#allocation2 + $0x98] sm:$0xff] %v742_v38  ;;  %v1418_v42 = vsel %vm1409_vm6, %v1415_v59, %v1417_v39  ;;  %v1144_v44 = vrot.slane %v1142_v41, 1 }
 0x147   : > { %1506 = vmatmul.bf16.gmra.mxu3 %v1418_v42 }
 0x148   : > { %v1145_v46 = vsel %vm1109_vm7, %v1140_v43, %v1144_v44  ;;  %v1148_v24 = vor.u32 %v1146_v19, %v1144_v44  ;;  %v7417_v19 = vld [vmem:[#allocation6 + $0x110] sm:$0xff] }
 0x149   : > { %v693_v45 = vpop.f32.mrf.mxu0  ;;  %1257 = vmatmul.bf16.gmra.mxu1 %v1145_v46 }
 0x14a   : > { %v694_v47 = vadd.f32 %v7977_v21, %v693_v45 }
 0x14c   : > { %v743_v51 = vmax.f32 %v694_v47, 0.0  ;;  %2314 = vmatmul.bf16.gmra.mxu0 %v7433_v48 }
 0x14d   : > { %v909_v52 = vld [vmem:[#allocation2 + $0x90] ss:$2 sm:$0xff]  ;;  %v911_v53 = vld [vmem:[#allocation2 + $0x91] ss:$2 sm:$0xff] }
 0x14e   : > { %v913_v55 = vmax.f32 %v909_v52, %v911_v53  ;;  %775 = vst [vmem:[#allocation2 + $0xa0] sm:$0xff] %v743_v51  ;;  %v954_v51 = vld [vmem:[#allocation3 + $0x30] sm:$0xf]  ;;  %v957_v52 = vld [vmem:[#allocation3 + $0x34] sm:$0x1] }
 0x150   : > { %v914_v56 = vmax.f32 %v912_v54, %v913_v55  ;;  %v7421_v55 = vld [vmem:[#allocation6 + $0x130] sm:$0xff] }
 0x151   : > { %v695_v57 = vpop.f32.mrf.mxu0  ;;  %1944 = vmatpush.bf16.msrb.mxu2 %v7421_v55  ;;  %v7429_v55 = vld [vmem:[#allocation6 + $0x170] sm:$0xff] }
 0x152   : > { %v915_v58 = vpack.c.bf16 %v914_v56, %v914_v56  ;;  %v696_v59 = vadd.f32 %v7977_v21, %v695_v57  ;;  %v7406_v56 = vld [vmem:[#allocation6 + $0xf0] sm:$0xff] }
 0x153   : > { %1678 = vmatpush.bf16.msrb.mxu1 %v7406_v56 }
 0x154   : > { %v917_v60 = vshrl.u32 %v915_v58, 16  ;;  %v744_v61 = vmax.f32 %v696_v59, 0.0  ;;  %v920_v63 = vshll.u32 %v915_v58, 16 }
 0x156   : > { %v919_v62 = vrot.slane %v917_v60, 7  ;;  %776 = vst [vmem:[#allocation2 + $0xa8] sm:$0xff] %v744_v61 }
 0x158   : > { %v922_v2 = vor.u32 %v920_v63, %v919_v62  ;;  %v923_v3 = vrot.slane %v919_v62, 4  ;;  %v7420_v62 = vld [vmem:[#allocation6 + $0x128] sm:$0xff] }
 0x159   : > { %v698_v4 = vpop.f32.mrf.mxu0  ;;  %1945 = vmatpush.bf16.msrb.mxu2 %v7420_v62  ;;  %v7405_v63 = vld [vmem:[#allocation6 + $0xe8] sm:$0xff] }
 0x15a   : > { %v699_v5 = vadd.f32 %v7977_v21, %v698_v4  ;;  %v927_v6 = vsel %vm8024_vm4, %v922_v2, %v926_v0  ;;  %v930_v7 = vsel %vm8028_vm5, %v923_v3, %v929_v1  ;;  %1679 = vmatpush.bf16.msrb.mxu1 %v7405_v63  ;;  %v7419_v0 = vld [vmem:[#allocation6 + $0x120] sm:$0xff] }
 0x15b   : > { %928 = vst [vmem:[#allocation3 + $0x28] sm:$0xf] %v927_v6  ;;  %v7418_v6 = vld [vmem:[#allocation6 + $0x118] sm:$0xff] }
 0x15c   : > { %v745_v8 = vmax.f32 %v699_v5, 0.0  ;;  %931 = vst [vmem:[#allocation3 + $0x2c] sm:$0x1] %v930_v7 }
 0x15d   : > { %v933_v33 = vld [vmem:[#allocation2 + $0xa0] ss:$2 sm:$0xff]  ;;  %v935_v32 = vld [vmem:[#allocation2 + $0xa1] ss:$2 sm:$0xff]  ;;  %1946 = vmatpush.bf16.msrb.mxu2 %v7419_v0 }
 0x15e   : > { %777 = vst [vmem:[#allocation2 + $0xb0] sm:$0xff] %v745_v8 }
 0x161   : > { %v700_v12 = vpop.f32.mrf.mxu0  ;;  %1947 = vmatpush.bf16.msrb.mxu2 %v7418_v6 }
 0x162   : > { %v701_v14 = vadd.f32 %v7977_v21, %v700_v12 }
 0x163   : > { %v8112_v15 = vld [vmem:[#allocation3 + $0x28] sm:$0xff] }
 0x164   : > { %v7434_v16 = vld [vmem:[#allocation3 + $0x28] sm:$0xff]  ;;  %v746_v17 = vmax.f32 %v701_v14, 0.0  ;;  %1372 = vmatmul.bf16.gmra.mxu2 %v8112_v15  ;;  %v1419_v18 = vrot.slane %v8112_v15, 1  ;;  %v1150_v20 = vshll.u32 %v8112_v15, 16  ;;  %v1154_v8 = vshrl.u32 %v8112_v15, 16 }
 0x165   : > { %2319 = vmatmul.bf16.gmra.mxu0 %v7434_v16  ;;  %1948 = vmatpush.bf16.msrb.mxu2 %v7417_v19 }
 0x166   : > { %778 = vst [vmem:[#allocation2 + $0xb8] sm:$0xff] %v746_v17  ;;  %v1243_v22 = vpop.f32.mrf.mxu1  ;;  %v1420_v23 = vsel %vm1409_vm6, %v1417_v39, %v1419_v18  ;;  %v8121_v25 = vrot.slane %v1150_v20, 1  ;;  %v940_v39 = vmax.f32 %v933_v33, %v935_v32 }
 0x167   : > { %v1349_v26 = vadd.f32 %v8089_v27, %v1243_v22  ;;  %v8124_v28 = vpop.f32.mrf.mxu2  ;;  %1511 = vmatmul.bf16.gmra.mxu3 %v1420_v23 }
 0x168   : > { %v1153_v30 = vsel %vm1109_vm7, %v1148_v24, %v8121_v25  ;;  %v1156_v14 = vor.u32 %v1154_v8, %v8121_v25  ;;  %v7416_v25 = vld [vmem:[#allocation6 + $0x108] sm:$0xff] }
 0x169   : > { %v703_v29 = vpop.f32.mrf.mxu0  ;;  %1262 = vmatmul.bf16.gmra.mxu1 %v1153_v30  ;;  %1949 = vmatpush.bf16.msrb.mxu2 %v7416_v25 }
 0x16a   : > { %v704_v31 = vadd.f32 %v7977_v21, %v703_v29  ;;  %v1492_v34 = vpop.f32.mrf.mxu3 }
 0x16b   : > { %v8129_v36 = vadd.f32 %v1492_v34, %v1349_v26 }
 0x16c   : > { %v747_v35 = vmax.f32 %v704_v31, 0.0 }
 0x16d   : > { %v937_v37 = vld [vmem:[#allocation2 + $0xb0] ss:$2 sm:$0xff]  ;;  %v939_v38 = vld [vmem:[#allocation2 + $0xb1] ss:$2 sm:$0xff] }
 0x16e   : > { %v941_v27 = vmax.f32 %v937_v37, %v939_v38  ;;  %779 = vst [vmem:[#allocation2 + $0xc0] sm:$0xff] %v747_v35  ;;  %v1245_v40 = vpop.f32.mrf.mxu1  ;;  %v7415_v35 = vld [vmem:[#allocation6 + $0x100] sm:$0xff] }
 0x16f   : > { %v1355_v42 = vpop.f32.mrf.mxu2  ;;  %1950 = vmatpush.bf16.msrb.mxu2 %v7415_v35 }
 0x170   : > { %v942_v41 = vmax.f32 %v940_v39, %v941_v27 }
 0x171   : > { %v705_v43 = vpop.f32.mrf.mxu0 }
 0x172   : > { %v943_v44 = vpack.c.bf16 %v942_v41, %v942_v41  ;;  %v706_v45 = vadd.f32 %v7977_v21, %v705_v43  ;;  %v1494_v46 = vpop.f32.mrf.mxu3 }
 0x174   : > { %v945_v47 = vshrl.u32 %v943_v44, 16  ;;  %v748_v48 = vmax.f32 %v706_v45, 0.0  ;;  %v948_v50 = vshll.u32 %v943_v44, 16  ;;  %v982_v44 = vld [vmem:[#allocation3 + $0x38] sm:$0xf] }
 0x175   : > { %v985_v45 = vld [vmem:[#allocation3 + $0x3c] sm:$0x1] }
 0x176   : > { %v947_v49 = vrot.slane %v945_v47, 7  ;;  %780 = vst [vmem:[#allocation2 + $0xc8] sm:$0xff] %v748_v48  ;;  %v7404_v48 = vld [vmem:[#allocation6 + $0xe0] sm:$0xff] }
 0x177   : > { %1680 = vmatpush.bf16.msrb.mxu1 %v7404_v48 }
 0x178   : > { %v950_v53 = vor.u32 %v948_v50, %v947_v49  ;;  %v951_v54 = vrot.slane %v947_v49, 4  ;;  %v7430_v50 = vld [vmem:[#allocation6 + $0x178] sm:$0xff] }
 0x179   : > { %v708_v57 = vpop.f32.mrf.mxu0  ;;  %2102 = vmatpush.bf16.msrb.mxu3 %v7430_v50 }
 0x17a   : > { %v709_v58 = vadd.f32 %v7977_v21, %v708_v57  ;;  %v955_v59 = vsel %vm8024_vm4, %v950_v53, %v954_v51  ;;  %v958_v60 = vsel %vm8028_vm5, %v951_v54, %v957_v52  ;;  %v7403_v54 = vld [vmem:[#allocation6 + $0xd8] sm:$0xff] }
 0x17b   : > { %956 = vst [vmem:[#allocation3 + $0x30] sm:$0xf] %v955_v59  ;;  %1681 = vmatpush.bf16.msrb.mxu1 %v7403_v54  ;;  %v7402_v59 = vld [vmem:[#allocation6 + $0xd0] sm:$0xff] }
 0x17c   : > { %v749_v61 = vmax.f32 %v709_v58, 0.0  ;;  %959 = vst [vmem:[#allocation3 + $0x34] sm:$0x1] %v958_v60  ;;  %v7428_v58 = vld [vmem:[#allocation6 + $0x168] sm:$0xff] }
 0x17d   : > { %v961_v24 = vld [vmem:[#allocation2 + $0xc0] ss:$2 sm:$0xff]  ;;  %v963_v15 = vld [vmem:[#allocation2 + $0xc1] ss:$2 sm:$0xff]  ;;  %2103 = vmatpush.bf16.msrb.mxu3 %v7429_v55 }
 0x17e   : > { %781 = vst [vmem:[#allocation2 + $0xd0] sm:$0xff] %v749_v61 }
 0x17f   : > { %1682 = vmatpush.bf16.msrb.mxu1 %v7402_v59 }
 0x181   : > { %v710_v1 = vpop.f32.mrf.mxu0  ;;  %2104 = vmatpush.bf16.msrb.mxu3 %v7428_v58 }
 0x182   : > { %v711_v2 = vadd.f32 %v7977_v21, %v710_v1 }
 0x183   : > { %v8138_v3 = vld [vmem:[#allocation3 + $0x30] sm:$0xff] }
 0x184   : > { %v7435_v4 = vld [vmem:[#allocation3 + $0x30] sm:$0xff]  ;;  %v750_v5 = vmax.f32 %v711_v2, 0.0  ;;  %1377 = vmatmul.bf16.gmra.mxu2 %v8138_v3  ;;  %v1421_v7 = vrot.slane %v8138_v3, 1  ;;  %v1158_v9 = vshll.u32 %v8138_v3, 16  ;;  %v1162_v1 = vshrl.u32 %v8138_v3, 16 }
 0x185   : > { %2324 = vmatmul.bf16.gmra.mxu0 %v7435_v4 }
 0x186   : > { %782 = vst [vmem:[#allocation2 + $0xd8] sm:$0xff] %v750_v5  ;;  %v1248_v10 = vpop.f32.mrf.mxu1  ;;  %v1422_v12 = vsel %vm1409_vm6, %v1419_v18, %v1421_v7  ;;  %v8150_v16 = vrot.slane %v1158_v9, 1  ;;  %v7758_v9 = vld [vmem:[#allocation3 + $0x8] sm:$0xff]  }
 0x187   : > { %v1354_v17 = vadd.f32 %v8124_v28, %v1248_v10  ;;  %1516 = vmatmul.bf16.gmra.mxu3 %v1422_v12  ;;  %v968_v28 = vmax.f32 %v961_v24, %v963_v15  ;;  %v1358_v4 = vpop.f32.mrf.mxu2  ;;  %v7427_v10 = vld [vmem:[#allocation6 + $0x160] sm:$0xff]  ;;  %v1822_v3 = vshll.u32 %v7758_v9, 16 }
 0x188   : > { %v1161_v22 = vsel %vm1109_vm7, %v1156_v14, %v8150_v16  ;;  %v1164_v6 = vor.u32 %v1162_v1, %v8150_v16  ;;  %v8179_v14 = vld [vmem:[#allocation3 + $0x10] sm:$0xff]  ;;  %2105 = vmatpush.bf16.msrb.mxu3 %v7427_v10  ;;  %v7426_v16 = vld [vmem:[#allocation6 + $0x158] sm:$0xff] }
 0x189   : > { %v713_v20 = vpop.f32.mrf.mxu0  ;;  %1267 = vmatmul.bf16.gmra.mxu1 %v1161_v22  ;;  %v1827_v24 = vshll.u32 %v8179_v14, 16  ;;  %v8207_v10 = vld [vmem:[#allocation3 + $0x20] sm:$0xff] }
 0x18a   : > { %v714_v23 = vadd.f32 %v7977_v21, %v713_v20  ;;  %v1497_v26 = vpop.f32.mrf.mxu3 }
 0x18b   : > { %v8156_v29 = vadd.f32 %v1497_v26, %v1354_v17 }
 0x18c   : > { %v751_v18 = vmax.f32 %v714_v23, 0.0  ;;  %2106 = vmatpush.bf16.msrb.mxu3 %v7426_v16  ;;  %v1843_v16 = vshll.u32 %v8207_v10, 16 }
 0x18d   : > { %v965_v30 = vld [vmem:[#allocation2 + $0xd0] ss:$2 sm:$0xff]  ;;  %v967_v31 = vld [vmem:[#allocation2 + $0xd1] ss:$2 sm:$0xff] }
 0x18e   : > { %v969_v33 = vmax.f32 %v965_v30, %v967_v31  ;;  %783 = vst [vmem:[#allocation2 + $0xe0] sm:$0xff] %v751_v18  ;;  %v1250_v32 = vpop.f32.mrf.mxu1  ;;  %v1824_v30 = vrot.slane %v1822_v3, 1  ;;  %v7425_v31 = vld [vmem:[#allocation6 + $0x150] sm:$0xff] }
 0x18f   : > { %v1829_v32 = vrot.slane %v1827_v24, 1  ;;  %v8198_v54 = vpop.f32.mrf.mxu2  ;;  %v7760_v24 = vld [vmem:[#allocation3 + $0x8] sm:$0xe] }
 0x190   : > { %v970_v34 = vmax.f32 %v968_v28, %v969_v33  ;;  %v1820_v33 = vshrl.u32 %v7758_v9, 16  ;;  %2107 = vmatpush.bf16.msrb.mxu3 %v7425_v31  ;;  %v7461_v31 = vld [vmem:[#allocation6 + $0x1f8] sm:$0xff] }
 0x191   : > { %v715_v37 = vpop.f32.mrf.mxu0 }
 0x192   : > { %v971_v38 = vpack.c.bf16 %v970_v34, %v970_v34  ;;  %v716_v39 = vadd.f32 %v7977_v21, %v715_v37  ;;  %v1499_v27 = vpop.f32.mrf.mxu3  ;;  %v1825_v37 = vor.u32 %v1824_v30, %v1820_v33  ;;  %v2030_v30 = vrot.slane %v8179_v14, 1  ;;  %v8220_v33 = vld [vmem:[#allocation3 + $0x28] sm:$0xff] }
 0x194   : > { %v973_v40 = vshrl.u32 %v971_v38, 16  ;;  %v752_v41 = vmax.f32 %v716_v39, 0.0  ;;  %v976_v43 = vshll.u32 %v971_v38, 16  ;;  %v7424_v38 = vld [vmem:[#allocation6 + $0x148] sm:$0xff]  ;;  %v1830_v27 = vsel %vm1109_vm7, %v1825_v37, %v1829_v32  ;;  %v7468_v37 = vld [vmem:[#allocation6 + $0x230] sm:$0xff] }
 0x195   : > { %2108 = vmatpush.bf16.msrb.mxu3 %v7424_v38 }
 0x196   : > { %v975_v42 = vrot.slane %v973_v40, 7  ;;  %784 = vst [vmem:[#allocation2 + $0xe8] sm:$0xff] %v752_v41  ;;  %v7401_v40 = vld [vmem:[#allocation6 + $0xc8] sm:$0xff]  ;;  %v7423_v41 = vld [vmem:[#allocation6 + $0x140] sm:$0xff] }
 0x197   : > { %1683 = vmatpush.bf16.msrb.mxu1 %v7401_v40 }
 0x198   : > { %v978_v46 = vor.u32 %v976_v43, %v975_v42  ;;  %v979_v47 = vrot.slane %v975_v42, 4 }
 0x199   : > { %v718_v49 = vpop.f32.mrf.mxu0  ;;  %2109 = vmatpush.bf16.msrb.mxu3 %v7423_v41 }
 0x19a   : > { %v719_v51 = vadd.f32 %v7977_v21, %v718_v49  ;;  %v983_v52 = vsel %vm8024_vm4, %v978_v46, %v982_v44  ;;  %v986_v53 = vsel %vm8028_vm5, %v979_v47, %v985_v45  ;;  %v7400_v44 = vld [vmem:[#allocation6 + $0xc0] sm:$0xff]  ;;  %v1010_v45 = vld [vmem:[#allocation3 + $0x40] sm:$0xf]  ;;  %v8189_v49 = vld [vmem:[#allocation3 + $0x18] sm:$0xff] }
 0x19b   : > { %984 = vst [vmem:[#allocation3 + $0x38] sm:$0xf] %v983_v52  ;;  %v1013_v46 = vld [vmem:[#allocation3 + $0x44] sm:$0x1]  ;;  %1684 = vmatpush.bf16.msrb.mxu1 %v7400_v44  ;;  %v7460_v44 = vld [vmem:[#allocation6 + $0x1f0] sm:$0xff] }
 0x19c   : > { %v753_v56 = vmax.f32 %v719_v51, 0.0  ;;  %987 = vst [vmem:[#allocation3 + $0x3c] sm:$0x1] %v986_v53  ;;  %v1835_v53 = vshll.u32 %v8189_v49, 16 }
 0x19d   : > { %v989_v20 = vld [vmem:[#allocation2 + $0xe0] ss:$2 sm:$0xff] }
 0x19e   : > { %785 = vst [vmem:[#allocation2 + $0xf0] sm:$0xff] %v753_v56  ;;  %v1831_v56 = vshrl.u32 %v8179_v14, 16  ;;  %v1847_v14 = vshrl.u32 %v8207_v10, 16 }
 0x19f   : > { %2562 = vmatpush.bf16.msra.mxu1 %v7461_v31 }
 0x1a0   : > { %v1833_v59 = vor.u32 %v1831_v56, %v1829_v32 }
 0x1a1   : > { %v720_v57 = vpop.f32.mrf.mxu0 }
 0x1a2   : > { %v721_v60 = vadd.f32 %v7977_v21, %v720_v57  ;;  %v1837_v57 = vrot.slane %v1835_v53, 1 }
 0x1a3   : > { %v8165_v61 = vld [vmem:[#allocation3 + $0x38] sm:$0xff]  ;;  %2563 = vmatpush.bf16.msra.mxu1 %v7460_v44 }
 0x1a4   : > { %v7436_v62 = vld [vmem:[#allocation3 + $0x38] sm:$0xff]  ;;  %v754_v63 = vmax.f32 %v721_v60, 0.0  ;;  %1382 = vmatmul.bf16.gmra.mxu2 %v8165_v61  ;;  %v1423_v0 = vrot.slane %v8165_v61, 1  ;;  %v1166_v2 = vshll.u32 %v8165_v61, 16 }
 0x1a5   : > { %2329 = vmatmul.bf16.gmra.mxu0 %v7436_v62 }
 0x1a6   : > { %786 = vst [vmem:[#allocation2 + $0xf8] sm:$0xff] %v754_v63  ;;  %v1253_v5 = vpop.f32.mrf.mxu1  ;;  %v1424_v21 = vsel %vm1409_vm6, %v1421_v7, %v1423_v0  ;;  %v8177_v8 = vrot.slane %v1166_v2, 1  ;;  %v991_v7 = vld [vmem:[#allocation2 + $0xe1] ss:$2 sm:$0xff]  ;;  %v1838_v63 = vsel %vm1109_vm7, %v1833_v59, %v1837_v57 }
 0x1a7   : > { %v1359_v12 = vadd.f32 %v1358_v4, %v1253_v5  ;;  %1521 = vmatmul.bf16.gmra.mxu3 %v1424_v21  ;;  %v996_v18 = vmax.f32 %v989_v20, %v991_v7  ;;  %v1363_v2 = vpop.f32.mrf.mxu2  ;;  %v1170_v21 = vshrl.u32 %v8165_v61, 16  ;;  %v7469_v61 = vld [vmem:[#allocation6 + $0x238] sm:$0xff]  ;;  %v7467_v59 = vld [vmem:[#allocation6 + $0x228] sm:$0xff] }
 0x1a8   : > { %v1169_v19 = vsel %vm1109_vm7, %v1164_v6, %v8177_v8  ;;  %2721 = vmatpush.bf16.msra.mxu2 %v7469_v61 }
 0x1a9   : > { %v8181_v17 = vpop.f32.mrf.mxu0  ;;  %1272 = vmatmul.bf16.gmra.mxu1 %v1169_v19  ;;  %v1172_v19 = vor.u32 %v1170_v21, %v8177_v8 }
 0x1aa   : > { %v1502_v22 = vpop.f32.mrf.mxu3 }
 0x1ab   : > { %v8185_v23 = vadd.f32 %v1502_v22, %v1359_v12 }
 0x1ac   : > { %2722 = vmatpush.bf16.msra.mxu2 %v7468_v37  ;;  %v7462_v37 = vld [vmem:[#allocation6 + $0x200] sm:$0xff] }
 0x1ad   : > { %v993_v15 = vld [vmem:[#allocation2 + $0xf0] ss:$2 sm:$0xff]  ;;  %v995_v26 = vld [vmem:[#allocation2 + $0xf1] ss:$2 sm:$0xff] }
 0x1ae   : > { %v997_v25 = vmax.f32 %v993_v15, %v995_v26  ;;  %v8200_v55 = vpop.f32.mrf.mxu1  ;;  %v1839_v15 = vshrl.u32 %v8189_v49, 16  ;;  %v1845_v26 = vrot.slane %v1843_v16, 1  ;;  %v2036_v16 = vrot.slane %v8220_v33, 1 }
 0x1af   : > { %v8224_v38 = vpop.f32.mrf.mxu2 }
 0x1b0   : > { %v998_v28 = vmax.f32 %v996_v18, %v997_v25  ;;  %v7759_v18 = vld [vmem:[#allocation3 + $0x8] sm:$0xf0]  ;;  %v1841_v25 = vor.u32 %v1839_v15, %v1837_v57  ;;  %v1849_v40 = vor.u32 %v1847_v14, %v1845_v26  ;;  %2723 = vmatpush.bf16.msra.mxu2 %v7467_v59  ;;  %v7465_v15 = vld [vmem:[#allocation6 + $0x218] sm:$0xff] }
 0x1b1   : > { %v2307_v34 = vpop.f32.mrf.mxu0 }
 0x1b2   : > { %v999_v35 = vpack.c.bf16 %v998_v28, %v998_v28  ;;  %v8203_v11 = vpop.f32.mrf.mxu3  ;;  %v1846_v8 = vsel %vm1109_vm7, %v1841_v25, %v1845_v26  ;;  %v7392_v34 = vld [vmem:[#allocation3 + $0x8] sm:$0xff] }
 0x1b4   : > { %v1001_v39 = vshrl.u32 %v999_v35, 16  ;;  %1951 = vmatmul.bf16.vlgmr.msrb.gmra.mxu2 %v1830_v27  ;;  %v1004_v43 = vshll.u32 %v999_v35, 16  ;;  %v1851_v35 = vshll.u32 %v8220_v33, 16 }
 0x1b6   : > { %v1003_v42 = vrot.slane %v1001_v39, 7  ;;  %v1853_v27 = vrot.slane %v1851_v35, 1 }
 0x1b8   : > { %v1006_v47 = vor.u32 %v1004_v43, %v1003_v42  ;;  %v1007_v48 = vrot.slane %v1003_v42, 4  ;;  %v1854_v42 = vsel %vm1109_vm7, %v1849_v40, %v1853_v27  ;;  %v2032_v43 = vrot.slane %v8189_v49, 1 }
 0x1b9   : > { %v8191_v50 = vpop.f32.mrf.mxu0 }
 0x1ba   : > { %v1011_v51 = vsel %vm8024_vm4, %v1006_v47, %v1010_v45  ;;  %v1014_v52 = vsel %vm8028_vm5, %v1007_v48, %v1013_v46  ;;  %v8233_v48 = vld [vmem:[#allocation3 + $0x30] sm:$0xff] }
 0x1bb   : > { %1012 = vst [vmem:[#allocation3 + $0x40] sm:$0xf] %v1011_v51  ;;  %v2033_v51 = vsel %vm1409_vm6, %v2030_v30, %v2032_v43  ;;  %v1859_v57 = vshll.u32 %v8233_v48, 16 }
 0x1bc   : > { %1015 = vst [vmem:[#allocation3 + $0x44] sm:$0x1] %v1014_v52  ;;  %v7393_v52 = vld [vmem:[#allocation3 + $0x10] sm:$0xff] }
 0x1bd   : > { %v1861_v49 = vrot.slane %v1859_v57, 1 }
 0x1c1   : > { %v2312_v58 = vpop.f32.mrf.mxu0 }
 0x1c2   : > { %v1048_v60 = vld [vmem:[#allocation3 + $0x40] sm:$0x1]  ;;  %v1855_v58 = vshrl.u32 %v8220_v33, 16  ;;  %v7463_v33 = vld [vmem:[#allocation6 + $0x208] sm:$0xff] }
 0x1c3   : > { %v7437_v62 = vld [vmem:[#allocation3 + $0x40] sm:$0xff]  ;;  %v1099_v13 = vunpack.c.l.b16 %v1048_v60 }
 0x1c4   : > { %1956 = vmatmul.bf16.gmra.mxu2 %v1838_v63  ;;  %2334 = vmatmul.bf16.gmra.mxu0 %v7437_v62  ;;  %v1857_v60 = vor.u32 %v1855_v58, %v1853_v27  ;;  %v7459_v63 = vld [vmem:[#allocation6 + $0x1e8] sm:$0xff]  ;;  %v8255_v61 = vld [vmem:[#allocation3 + $0x40] sm:$0xff]  ;;  %v1758_v27 = vld [vmem:[#allocation3 + $0x48] sm:$0x1] }
 0x1c5   : > { %v1108_v1 = vpack.c.b16 %v1099_v13, %v1099_v13  ;;  %v2034_v13 = vrot.slane %v8207_v10, 1  ;;  %2564 = vmatpush.bf16.msra.mxu1 %v7459_v63 }
 0x1c6   : > { %v1258_v4 = vpop.f32.mrf.mxu1  ;;  %v1862_v62 = vsel %vm1109_vm7, %v1857_v60, %v1861_v49  ;;  %v7456_v60 = vld [vmem:[#allocation6 + $0x1d0] sm:$0xff] }
 0x1c7   : > { %v1425_v5 = vrot.slane %v1108_v1, 1  ;;  %v1174_v6 = vshll.u32 %v1108_v1, 16  ;;  %v1364_v9 = vadd.f32 %v1363_v2, %v1258_v4  ;;  %v1368_v45 = vpop.f32.mrf.mxu2  ;;  %v8242_v1 = vld [vmem:[#allocation3 + $0x38] sm:$0xff]  ;;  %v2035_v2 = vsel %vm1409_vm6, %v2032_v43, %v2034_v13 }
 0x1c8   : > { %v7394_v4 = vld [vmem:[#allocation3 + $0x18] sm:$0xff]  ;;  %v1867_v21 = vshll.u32 %v8242_v1, 16  ;;  %v2037_v25 = vsel %vm1409_vm6, %v2034_v13, %v2036_v16  ;;  %v2038_v43 = vrot.slane %v8233_v48, 1  ;;  %v2040_v13 = vrot.slane %v8242_v1, 1 }
 0x1c9   : > { %v1426_v12 = vsel %vm1409_vm6, %v1423_v0, %v1425_v5  ;;  %v1176_v3 = vrot.slane %v1174_v6, 1  ;;  %v7761_v0 = vor.u32 %v7760_v24, %v7759_v18  ;;  %v7466_v6 = vld [vmem:[#allocation6 + $0x220] sm:$0xff] }
 0x1ca   : > { %1526 = vmatmul.bf16.gmra.mxu3 %v1426_v12  ;;  %v1507_v20 = vpop.f32.mrf.mxu3  ;;  %2724 = vmatpush.bf16.msra.mxu2 %v7466_v6  ;;  %v1863_v12 = vshrl.u32 %v8233_v48, 16  ;;  %v1869_v10 = vrot.slane %v1867_v21, 1  ;;  %v7458_v24 = vld [vmem:[#allocation6 + $0x1e0] sm:$0xff]  ;;  %v2041_v21 = vsel %vm1409_vm6, %v2038_v43, %v2040_v13  ;;  %v7397_v6 = vld [vmem:[#allocation3 + $0x30] sm:$0xff] }
 0x1cb   : > { %v1177_v7 = vsel %vm1109_vm7, %v1172_v19, %v1176_v3  ;;  %v8214_v22 = vadd.f32 %v1507_v20, %v1364_v9  ;;  %v2029_v28 = vrot.slane %v7761_v0, 1  ;;  %2565 = vmatpush.bf16.msra.mxu1 %v7458_v24  ;;  %v7464_v0 = vld [vmem:[#allocation6 + $0x210] sm:$0xff] }
 0x1cc   : > { %1277 = vmatmul.bf16.gmra.mxu1 %v1177_v7  ;;  %v1865_v19 = vor.u32 %v1863_v12, %v1861_v49 }
 0x1cd   : > { %v2031_v32 = vsel %vm1409_vm6, %v2029_v28, %v2030_v30  ;;  %v1875_v28 = vshll.u32 %v8255_v61, 16 }
 0x1ce   : > { %v8226_v39 = vpop.f32.mrf.mxu1  ;;  %v1870_v7 = vsel %vm1109_vm7, %v1865_v19, %v1869_v10  ;;  %2725 = vmatpush.bf16.msra.mxu2 %v7465_v15  ;;  %v7764_v19 = vld [vmem:[#allocation3 + $0x10] sm:$0xe] }
 0x1cf   : > { %v8245_v5 = vpop.f32.mrf.mxu2  ;;  %v1877_v35 = vrot.slane %v1875_v28, 1  ;;  %v7398_v28 = vld [vmem:[#allocation3 + $0x38] sm:$0xff] }
 0x1d2   : > { %v8229_v41 = vpop.f32.mrf.mxu3  ;;  %2726 = vmatpush.bf16.msra.mxu2 %v7464_v0  ;;  %v7455_v0 = vld [vmem:[#allocation6 + $0x1c8] sm:$0xff] }
 0x1d4   : > { %1961 = vmatmul.bf16.gmra.mxu2 %v1846_v8  ;;  %v7395_v8 = vld [vmem:[#allocation3 + $0x20] sm:$0xff] }
 0x1d6   : > { %2727 = vmatpush.bf16.msra.mxu2 %v7463_v33  ;;  %v7454_v33 = vld [vmem:[#allocation6 + $0x1c0] sm:$0xff] }
 0x1da   : > { %2110 = vmatmul.bf16.vlgmr.msrb.gmra.mxu3 %v2031_v32  ;;  %2728 = vmatpush.bf16.msra.mxu2 %v7462_v37 }
 0x1dc   : > { %1685 = vmatmul.bf16.vlgmr.msrb.gmra.mxu1 %v7392_v34  ;;  %v1871_v34 = vshrl.u32 %v8242_v1, 16 }
 0x1de   : > { %v1873_v14 = vor.u32 %v1871_v34, %v1869_v10  ;;  %v7763_v10 = vld [vmem:[#allocation3 + $0x10] sm:$0xf0]  ;;  %v8285_v34 = vld [vmem:[#allocation3 + $0x20] sm:$0xff] }
 0x1df   : > { %v2651_v37 = vrot.slane %v8285_v34, 1 }
 0x1e0   : > { %v1878_v40 = vsel %vm1109_vm7, %v1873_v14, %v1877_v35 }
 0x1e4   : > { %1966 = vmatmul.bf16.gmra.mxu2 %v1854_v42  ;;  %v7457_v42 = vld [vmem:[#allocation6 + $0x1d8] sm:$0xff] }
 0x1e5   : > { %2566 = vmatpush.bf16.msra.mxu1 %v7457_v42 }
 0x1e6   : > { %v1263_v46 = vpop.f32.mrf.mxu1 }
 0x1e7   : > { %v1369_v47 = vadd.f32 %v1368_v45, %v1263_v46  ;;  %v1373_v20 = vpop.f32.mrf.mxu2  ;;  %v1809_v45 = vunpack.c.l.b16 %v1758_v27  ;;  %v2039_v46 = vsel %vm1409_vm6, %v2036_v16, %v2038_v43  ;;  %v7765_v16 = vor.u32 %v7764_v19, %v7763_v10 }
 0x1e9   : > { %2567 = vmatpush.bf16.msra.mxu1 %v7456_v60  ;;  %v2648_v1 = vrot.slane %v7765_v16, 1 }
 0x1ea   : > { %2115 = vmatmul.bf16.gmra.mxu3 %v2033_v51  ;;  %v1512_v53 = vpop.f32.mrf.mxu3  ;;  %v1818_v51 = vpack.c.b16 %v1809_v45, %v1809_v45 }
 0x1eb   : > { %v8236_v56 = vadd.f32 %v1512_v53, %v1369_v47  ;;  %v7396_v47 = vld [vmem:[#allocation3 + $0x28] sm:$0xff]  ;;  %v1879_v53 = vshrl.u32 %v8255_v61, 16 }
 0x1ec   : > { %1690 = vmatmul.bf16.gmra.mxu1 %v7393_v52  ;;  %v1883_v52 = vshll.u32 %v1818_v51, 16 }
 0x1ed   : > { %v1881_v49 = vor.u32 %v1879_v53, %v1877_v35  ;;  %2568 = vmatpush.bf16.msra.mxu1 %v7455_v0 }
 0x1ee   : > { %v8248_v9 = vpop.f32.mrf.mxu1  ;;  %v1885_v59 = vrot.slane %v1883_v52, 1 }
 0x1ef   : > { %v8261_v32 = vpop.f32.mrf.mxu2 }
 0x1f1   : > { %2569 = vmatpush.bf16.msra.mxu1 %v7454_v33  ;;  %v2454_v33 = vshll.u32 %v8285_v34, 16 }
 0x1f2   : > { %v8251_v3 = vpop.f32.mrf.mxu3 }
 0x1f4   : > { %1971 = vmatmul.bf16.gmra.mxu2 %v1862_v62  ;;  %v1886_v62 = vsel %vm1109_vm7, %v1881_v49, %v1885_v59  ;;  %v7762_v49 = vld [vmem:[#allocation3 + $0x10] sm:$0xff]  }
 0x1fa   : > { %2120 = vmatmul.bf16.gmra.mxu3 %v2035_v2 }
 0x1fc   : > { %1695 = vmatmul.bf16.gmra.mxu1 %v7394_v4 }
 0x204   : > { %1976 = vmatmul.bf16.gmra.mxu2 %v1870_v7  ;;  %v8279_v7 = vld [vmem:[#allocation3 + $0x18] sm:$0xff] }
 0x205   : > { %v2649_v15 = vrot.slane %v8279_v7, 1 }
 0x206   : > { %v1268_v26 = vpop.f32.mrf.mxu1 }
 0x207   : > { %v1374_v18 = vadd.f32 %v1373_v20, %v1268_v26  ;;  %v1378_v44 = vpop.f32.mrf.mxu2  ;;  %v7438_v26 = vld [vmem:[#allocation3 + $0x48] sm:$0xff]  ;;  %v2652_v27 = vsel %vm1409_vm6, %v2649_v15, %v2651_v37 }
 0x208   : > { %2339 = vmatmul.bf16.gmra.mxu0 %v7438_v26  ;;  %v8307_v26 = vld [vmem:[#allocation3 + $0x30] sm:$0xff] }
 0x20a   : > { %2125 = vmatmul.bf16.gmra.mxu3 %v2037_v25  ;;  %v1517_v30 = vpop.f32.mrf.mxu3  ;;  %v2042_v25 = vrot.slane %v8255_v61, 1 }
 0x20b   : > { %v8258_v31 = vadd.f32 %v1517_v30, %v1374_v18  ;;  %v2650_v18 = vsel %vm1409_vm6, %v2648_v1, %v2649_v15 }
 0x20c   : > { %1700 = vmatmul.bf16.gmra.mxu1 %v7395_v8  ;;  %v2043_v30 = vsel %vm1409_vm6, %v2040_v13, %v2042_v25  ;;  %v2441_v13 = vshll.u32 %v7762_v49, 16 }
 0x20e   : > { %v8268_v57 = vpop.f32.mrf.mxu1 }
 0x20f   : > { %v8270_v58 = vpop.f32.mrf.mxu2 }
 0x212   : > { %v8272_v48 = vpop.f32.mrf.mxu3 }
 0x214   : > { %1981 = vmatmul.bf16.gmra.mxu2 %v1878_v40  ;;  %v2044_v40 = vrot.slane %v1818_v51, 1 }
 0x21a   : > { %2130 = vmatmul.bf16.gmra.mxu3 %v2039_v46  ;;  %v7399_v46 = vld [vmem:[#allocation3 + $0x40] sm:$0xff] }
 0x21c   : > { %1705 = vmatmul.bf16.gmra.mxu1 %v7396_v47  ;;  %v8294_v47 = vld [vmem:[#allocation3 + $0x28] sm:$0xff] }
 0x21d   : > { %v2653_v60 = vrot.slane %v8294_v47, 1 }
 0x224   : > { %1986 = vmatmul.bf16.gmra.mxu2 %v1886_v62 }
 0x226   : > { %v1273_v63 = vpop.f32.mrf.mxu1 }
 0x227   : > { %v1379_v2 = vadd.f32 %v1378_v44, %v1273_v63  ;;  %v1383_v4 = vpop.f32.mrf.mxu2  ;;  %v2045_v44 = vsel %vm1409_vm6, %v2042_v25, %v2044_v40  ;;  %v2446_v63 = vshll.u32 %v8279_v7, 16 }
 0x22a   : > { %2135 = vmatmul.bf16.gmra.mxu3 %v2041_v21  ;;  %v1522_v12 = vpop.f32.mrf.mxu3  ;;  %v2443_v21 = vrot.slane %v2441_v13, 1 }
 0x22b   : > { %v8277_v20 = vadd.f32 %v1522_v12, %v1379_v2  ;;  %v2654_v2 = vsel %vm1409_vm6, %v2651_v37, %v2653_v60  ;;  %v2448_v12 = vrot.slane %v2446_v63, 1 }
 0x22c   : > { %1710 = vmatmul.bf16.gmra.mxu1 %v7397_v6  ;;  %v2439_v6 = vshrl.u32 %v7762_v49, 16 }
 0x22e   : > { %v8288_v14 = vpop.f32.mrf.mxu1  ;;  %v2444_v16 = vor.u32 %v2443_v21, %v2439_v6 }
 0x22f   : > { %v1385_v24 = vpop.f32.mrf.mxu2 }
 0x230   : > { %v2449_v1 = vsel %vm1109_vm7, %v2444_v16, %v2448_v12 }
 0x232   : > { %v8291_v61 = vpop.f32.mrf.mxu3 }
 0x234   : > { %2729 = vmatmul.bf16.vlgmr.msra.gmra.mxu2 %v2650_v18 }
 0x237   : > { %v1952_v8 = vpop.f32.mrf.mxu2 }
 0x23a   : > { %2140 = vmatmul.bf16.gmra.mxu3 %v2043_v30  ;;  %v2655_v30 = vrot.slane %v8307_v26, 1 }
 0x23c   : > { %1715 = vmatmul.bf16.gmra.mxu1 %v7398_v28 }
 0x23f   : > { %v1954_v35 = vpop.f32.mrf.mxu2 }
 0x240   : > { %v2656_v35 = vsel %vm1409_vm6, %v2653_v60, %v2655_v30 }
 0x244   : > { %2734 = vmatmul.bf16.gmra.mxu2 %v2652_v27  ;;  %v2456_v27 = vrot.slane %v2454_v33, 1 }
 0x247   : > { %v1957_v42 = vpop.f32.mrf.mxu2 }
 0x249   : > { %v1278_v43 = vpop.f32.mrf.mxu1 }
 0x24a   : > { %v1384_v45 = vadd.f32 %v1383_v4, %v1278_v43  ;;  %2145 = vmatmul.bf16.gmra.mxu3 %v2045_v44 }
 0x24c   : > { %1720 = vmatmul.bf16.gmra.mxu1 %v7399_v46 }
 0x24d   : > { %v1527_v52 = vpop.f32.mrf.mxu3 }
 0x24e   : > { %v8296_v53 = vadd.f32 %v1527_v52, %v1384_v45  ;;  %v8317_v52 = vld [vmem:[#allocation3 + $0x38] sm:$0xff] }
 0x24f   : > { %v1959_v59 = vpop.f32.mrf.mxu2 }
 0x251   : > { %v1280_v62 = vpop.f32.mrf.mxu1 }
 0x252   : > { %v8299_v51 = vadd.f32 %v1385_v24, %v1280_v62  ;;  %v2657_v62 = vrot.slane %v8317_v52, 1 }
 0x254   : > { %2739 = vmatmul.bf16.gmra.mxu2 %v2654_v2  ;;  %v2658_v63 = vsel %vm1409_vm6, %v2655_v30, %v2657_v62 }
 0x255   : > { %v8303_v4 = vpop.f32.mrf.mxu3 }
 0x257   : > { %v1962_v10 = vpop.f32.mrf.mxu2 }
 0x259   : > { %v1686_v19 = vpop.f32.mrf.mxu1 }
 0x25a   : > { %v1726_v15 = vadd.f32 %v1686_v19, %v8129_v36  ;;  %v2450_v36 = vshrl.u32 %v8279_v7, 16  ;;  %v2462_v7 = vshll.u32 %v8294_v47, 16 }
 0x25c   : > { %2570 = vmatmul.bf16.vlgmr.msra.gmra.mxu1 %v2449_v1  ;;  %v1992_v24 = vadd.f32 %v1952_v8, %v1726_v15  ;;  %v2452_v43 = vor.u32 %v2450_v36, %v2448_v12  ;;  %v2464_v21 = vrot.slane %v2462_v7, 1  ;;  %v8329_v1 = vld [vmem:[#allocation3 + $0x40] sm:$0xff] }
 0x25d   : > { %v2111_v18 = vpop.f32.mrf.mxu3 }
 0x25e   : > { %v8309_v25 = vadd.f32 %v2111_v18, %v1992_v24  ;;  %v2457_v45 = vsel %vm1109_vm7, %v2452_v43, %v2456_v27  ;;  %v1361_v24 = vadd.f32 %v8198_v54, %v8200_v55 }
 0x25f   : > { %v1964_v0 = vpop.f32.mrf.mxu2 }
 0x260   : > { %v1537_v18 = vadd.f32 %v8203_v11, %v1361_v24 }
 0x261   : > { %v1688_v28 = vpop.f32.mrf.mxu1 }
 0x264   : > { %2744 = vmatmul.bf16.gmra.mxu2 %v2656_v35 }
 0x265   : > { %v2113_v37 = vpop.f32.mrf.mxu3 }
 0x266   : > { %v2466_v37 = vshrl.u32 %v8294_v47, 16 }
 0x267   : > { %v1967_v40 = vpop.f32.mrf.mxu2 }
 0x268   : > { %v2468_v55 = vor.u32 %v2466_v37, %v2464_v21 }
 0x269   : > { %v1691_v8 = vpop.f32.mrf.mxu1 }
 0x26a   : > { %v1728_v44 = vadd.f32 %v1691_v8, %v8156_v29  ;;  %v2458_v29 = vshrl.u32 %v8285_v34, 16  ;;  %v2659_v34 = vrot.slane %v8329_v1, 1 }
 0x26c   : > { %2575 = vmatmul.bf16.gmra.mxu1 %v2457_v45  ;;  %v1994_v46 = vadd.f32 %v1957_v42, %v1728_v44  ;;  %v2460_v12 = vor.u32 %v2458_v29, %v2456_v27  ;;  %v7453_v44 = vld [vmem:[#allocation3 + $0x48] sm:$0xff] }
 0x26d   : > { %v2116_v49 = vpop.f32.mrf.mxu3  ;;  %v2661_v47 = vrot.slane %v7453_v44, 1 }
 0x26e   : > { %v8319_v59 = vadd.f32 %v2116_v49, %v1994_v46  ;;  %v2465_v16 = vsel %vm1109_vm7, %v2460_v12, %v2464_v21 }
 0x26f   : > { %v1969_v60 = vpop.f32.mrf.mxu2 }
 0x271   : > { %v1693_v13 = vpop.f32.mrf.mxu1 }
 0x272   : > { %v2478_v13 = vshll.u32 %v8317_v52, 16 }
 0x274   : > { %2749 = vmatmul.bf16.gmra.mxu2 %v2658_v63  ;;  %v2480_v63 = vrot.slane %v2478_v13, 1  ;;  %v2498_v13 = vshrl.u32 %v7453_v44, 16 }
 0x275   : > { %v2118_v2 = vpop.f32.mrf.mxu3 }
 0x277   : > { %v1972_v6 = vpop.f32.mrf.mxu2 }
 0x279   : > { %v1696_v42 = vpop.f32.mrf.mxu1 }
 0x27a   : > { %v1730_v19 = vadd.f32 %v1696_v42, %v8185_v23  ;;  %v2470_v23 = vshll.u32 %v8307_v26, 16  ;;  %v2377_v42 = vld [vmem:[#allocation3 + $0x50] sm:$0x1] }
 0x27b   : > { %v2428_v12 = vunpack.c.l.b16 %v2377_v42 }
 0x27c   : > { %2580 = vmatmul.bf16.gmra.mxu1 %v2465_v16  ;;  %v8327_v15 = vadd.f32 %v1962_v10, %v1730_v19  ;;  %v2660_v10 = vsel %vm1409_vm6, %v2657_v62, %v2659_v34  ;;  %v2472_v36 = vrot.slane %v2470_v23, 1 }
 0x27d   : > { %v2437_v16 = vpack.c.b16 %v2428_v12, %v2428_v12 }
 0x27e   : > { %v2473_v8 = vsel %vm1109_vm7, %v2468_v55, %v2472_v36  ;;  %v2494_v55 = vshll.u32 %v7453_v44, 16  ;;  %v2121_v44 = vpop.f32.mrf.mxu3 }
 0x27f   : > { %v8334_v30 = vpop.f32.mrf.mxu2  ;;  %v2663_v24 = vrot.slane %v2437_v16, 1 }
 0x281   : > { %v1698_v28 = vpop.f32.mrf.mxu1 }
 0x282   : > { %v1731_v33 = vadd.f32 %v1698_v28, %v1537_v18  ;;  %v2664_v18 = vsel %vm1409_vm6, %v2661_v47, %v2663_v24 }
 0x284   : > { %v8338_v35 = vadd.f32 %v1964_v0, %v1731_v33  ;;  %2754 = vmatmul.bf16.gmra.mxu2 %v2660_v10  ;;  %v1366_v0 = vadd.f32 %v8224_v38, %v8226_v39 }
 0x286   : > { %v1539_v45 = vadd.f32 %v8229_v41, %v1366_v0 }
 0x287   : > { %v1977_v27 = vpop.f32.mrf.mxu2 }
 0x289   : > { %v1701_v54 = vpop.f32.mrf.mxu1 }
 0x28a   : > { %v1732_v11 = vadd.f32 %v1701_v54, %v8214_v22  ;;  %v2662_v22 = vsel %vm1409_vm6, %v2659_v34, %v2661_v47 }
 0x28c   : > { %2585 = vmatmul.bf16.gmra.mxu1 %v2473_v8  ;;  %v8344_v43 = vadd.f32 %v1967_v40, %v1732_v11  ;;  %v2474_v40 = vshrl.u32 %v8307_v26, 16  ;;  %v2486_v26 = vshll.u32 %v8329_v1, 16  ;;  %v2490_v11 = vshrl.u32 %v8329_v1, 16 }
 0x28e   : > { %v2476_v38 = vor.u32 %v2474_v40, %v2472_v36  ;;  %v2488_v34 = vrot.slane %v2486_v26, 1  ;;  %v8393_v26 = vld [vmem:[%s9979_s4] ss:$0 sm:$0xff] }
 0x28f   : > { %v8349_v46 = vpop.f32.mrf.mxu2 }
 0x290   : > { %v2481_v41 = vsel %vm1109_vm7, %v2476_v38, %v2480_v63  ;;  %v2492_v8 = vor.u32 %v2490_v11, %v2488_v34 }
 0x291   : > { %v1703_v49 = vpop.f32.mrf.mxu1 }
 0x292   : > { %v1733_v62 = vadd.f32 %v1703_v49, %v1539_v45 }
 0x294   : > { %v8352_v7 = vadd.f32 %v1969_v60, %v1733_v62  ;;  %2759 = vmatmul.bf16.gmra.mxu2 %v2662_v22  ;;  %v2502_v22 = vshll.u32 %v2437_v16, 16 }
 0x297   : > { %v1982_v2 = vpop.f32.mrf.mxu2 }
 0x299   : > { %v1706_v29 = vpop.f32.mrf.mxu1 }
 0x29a   : > { %v1734_v39 = vadd.f32 %v1706_v29, %v8236_v56  ;;  %v2482_v56 = vshrl.u32 %v8317_v52, 16  ;;  %v2496_v52 = vrot.slane %v2494_v55, 1 }
 0x29c   : > { %2590 = vmatmul.bf16.gmra.mxu1 %v2481_v41  ;;  %v8358_v21 = vadd.f32 %v1972_v6, %v1734_v39  ;;  %v2484_v6 = vor.u32 %v2482_v56, %v2480_v63  ;;  %v2500_v40 = vor.u32 %v2498_v13, %v2496_v52  ;;  %v2504_v63 = vrot.slane %v2502_v22, 1 }
 0x29e   : > { %v2489_v10 = vsel %vm1109_vm7, %v2484_v6, %v2488_v34  ;;  %v2505_v38 = vsel %vm1109_vm7, %v2500_v40, %v2504_v63  ;;  %v2123_v34 = vpop.f32.mrf.mxu3 }
 0x29f   : > { %v8360_v60 = vpop.f32.mrf.mxu2 }
 0x2a1   : > { %v8362_v19 = vpop.f32.mrf.mxu1 }
 0x2a4   : > { %2764 = vmatmul.bf16.gmra.mxu2 %v2664_v18 }
 0x2a6   : > { %v2126_v55 = vpop.f32.mrf.mxu3 }
 0x2a7   : > { %v1987_v28 = vpop.f32.mrf.mxu2 }
 0x2a9   : > { %v1711_v33 = vpop.f32.mrf.mxu1 }
 0x2aa   : > { %v1736_v23 = vadd.f32 %v1711_v33, %v8258_v31  ;;  %v2497_v31 = vsel %vm1109_vm7, %v2492_v8, %v2496_v52  ;;  %v2347_v33 = vadd.f32 %v8191_v50, %v8319_v59 }
 0x2ac   : > { %2595 = vmatmul.bf16.gmra.mxu1 %v2489_v10  ;;  %v8369_v37 = vadd.f32 %v1977_v27, %v1736_v23  ;;  %v7485_v23 = vld [vmem:[%s9980_s5 + $0x78] sm:$0xff] }
 0x2ad   : > { %3038 = vmatpush.bf16.msra.mxu3 %v7485_v23 }
 0x2af   : > { %v8371_v36 = vpop.f32.mrf.mxu2 }
 0x2b1   : > { %v8373_v54 = vpop.f32.mrf.mxu1 }
 0x2b7   : > { %v2730_v0 = vpop.f32.mrf.mxu2 }
 0x2b9   : > { %v1716_v45 = vpop.f32.mrf.mxu1 }
 0x2ba   : > { %v1738_v47 = vadd.f32 %v1716_v45, %v8277_v20 }
 0x2bc   : > { %2600 = vmatmul.bf16.gmra.mxu1 %v2497_v31  ;;  %v8378_v49 = vadd.f32 %v1982_v2, %v1738_v47  ;;  %v2345_v2 = vadd.f32 %v8181_v17, %v8309_v25  ;;  %v2315_v17 = vpop.f32.mrf.mxu0  ;;  %v2155_v47 = vadd.f32 %v2121_v44, %v8327_v15  ;;  %v2128_v31 = vpop.f32.mrf.mxu3 }
 0x2bf   : > { %v2732_v27 = vpop.f32.mrf.mxu2 }
 0x2c0   : > { %v2349_v27 = vadd.f32 %v2315_v17, %v2155_v47 }
 0x2c1   : > { %v8380_v62 = vpop.f32.mrf.mxu1 }
 0x2c4   : > { %v2317_v45 = vpop.f32.mrf.mxu0 }
 0x2c7   : > { %v2735_v29 = vpop.f32.mrf.mxu2 }
 0x2c9   : > { %v1721_v1 = vpop.f32.mrf.mxu1 }
 0x2ca   : > { %v1740_v39 = vadd.f32 %v1721_v1, %v8296_v53 }
 0x2cc   : > { %2605 = vmatmul.bf16.gmra.mxu1 %v2505_v38  ;;  %v8384_v20 = vadd.f32 %v1987_v28, %v1740_v39  ;;  %v7484_v38 = vld [vmem:[%s9980_s5 + $0x70] sm:$0xff]  ;;  %v2320_v39 = vpop.f32.mrf.mxu0 }
 0x2cd   : > { %3039 = vmatpush.bf16.msra.mxu3 %v7484_v38 }
 0x2cf   : > { %v2737_v41 = vpop.f32.mrf.mxu2 }
 0x2d0   : > { %v2156_v41 = vadd.f32 %v2123_v34, %v8338_v35  ;;  %v2857_v34 = vld [vmem:[#allocation4 + $0x4] sm:$0x7]  ;;  %v7492_v35 = vld [vmem:[%s9980_s5 + $0xb0] sm:$0xff] }
 0x2d1   : > { %v8386_v42 = vpop.f32.mrf.mxu1 }
 0x2d7   : > { %v2740_v28 = vpop.f32.mrf.mxu2 }
 0x2d9   : > { %v2571_v12 = vpop.f32.mrf.mxu1 }
 0x2da   : > { %v2611_v16 = vadd.f32 %v2571_v12, %v2345_v2 }
 0x2dc   : > { %v2770_v24 = vadd.f32 %v2730_v0, %v2611_v16 }
 0x2de   : > { %v2790_v53 = vadd.f32 %v8393_v26, %v2770_v24  ;;  %v2350_v24 = vadd.f32 %v2317_v45, %v2156_v41 }
 0x2df   : > { %v2742_v52 = vpop.f32.mrf.mxu2 }
 0x2e0   : > { %v2806_v18 = vmax.f32 %v2790_v53, 0.0 }
 0x2e1   : > { %v2573_v56 = vpop.f32.mrf.mxu1 }
 0x2e2   : > { %2822 = vst [vmem:[#allocation2] sm:$0xff] %v2806_v18 }
 0x2e7   : > { %v2745_v2 = vpop.f32.mrf.mxu2 }
 0x2e9   : > { %v2576_v25 = vpop.f32.mrf.mxu1  ;;  %v2838_v50 = vld [vmem:[#allocation2] ss:$2 sm:$0xf]  ;;  %v2839_v59 = vld [vmem:[#allocation2 + $0x1] ss:$2 sm:$0xf] }
 0x2ea   : > { %v2613_v6 = vadd.f32 %v2576_v25, %v2347_v33  ;;  %v2842_v63 = vmax.f32 %v2838_v50, %v2839_v59  ;;  %v2131_v33 = vpop.f32.mrf.mxu3 }
 0x2ec   : > { %v2772_v10 = vadd.f32 %v2735_v29, %v2613_v6 }
 0x2ee   : > { %v2792_v11 = vadd.f32 %v8393_v26, %v2772_v10 }
 0x2f0   : > { %v2808_v8 = vmax.f32 %v2792_v11, 0.0  ;;  %v2322_v11 = vpop.f32.mrf.mxu0 }
 0x2f1   : > { %v2578_v0 = vpop.f32.mrf.mxu1 }
 0x2f2   : > { %2824 = vst [vmem:[#allocation2 + $0x10] sm:$0xff] %v2808_v8  ;;  %v2747_v8 = vpop.f32.mrf.mxu2 }
 0x2f9   : > { %v2840_v13 = vld [vmem:[#allocation2 + $0x10] ss:$2 sm:$0xf]  ;;  %v2841_v22 = vld [vmem:[#allocation2 + $0x11] ss:$2 sm:$0xf]  ;;  %v2581_v40 = vpop.f32.mrf.mxu1 }
 0x2fa   : > { %v2843_v29 = vmax.f32 %v2840_v13, %v2841_v22  ;;  %v2615_v1 = vadd.f32 %v2581_v40, %v2349_v27  ;;  %v7483_v13 = vld [vmem:[%s9980_s5 + $0x68] sm:$0xff]  ;;  %v2325_v22 = vpop.f32.mrf.mxu0 }
 0x2fb   : > { %3040 = vmatpush.bf16.msra.mxu3 %v7483_v13  ;;  %v7522_v13 = vld [vmem:[%s9980_s5 + $0x1a0] sm:$0xff] }
 0x2fc   : > { %v2844_v12 = vmax.f32 %v2842_v63, %v2843_v29  ;;  %v2774_v15 = vadd.f32 %v2740_v28, %v2615_v1  ;;  %v2157_v28 = vadd.f32 %v2126_v55, %v8344_v43  ;;  %v2158_v43 = vadd.f32 %v2128_v31, %v8352_v7  ;;  %v2133_v55 = vpop.f32.mrf.mxu3  ;;  %v2750_v63 = vpop.f32.mrf.mxu2 }
 0x2fd   : > { %v1371_v29 = vadd.f32 %v8245_v5, %v8248_v9 }
 0x2fe   : > { %v2845_v44 = vpack.c.bf16 %v2844_v12, %v2844_v12  ;;  %v2794_v16 = vadd.f32 %v8393_v26, %v2774_v15  ;;  %v2351_v50 = vadd.f32 %v2320_v39, %v2157_v28  ;;  %v2352_v38 = vadd.f32 %v2322_v11, %v2158_v43  ;;  %v7482_v28 = vld [vmem:[%s9980_s5 + $0x60] sm:$0xff] }
 0x2ff   : > { %v1541_v41 = vadd.f32 %v8251_v3, %v1371_v29  ;;  %v2159_v15 = vadd.f32 %v2131_v33, %v8358_v21  ;;  %v7524_v21 = vld [vmem:[%s9980_s5 + $0x1b0] sm:$0xff]  ;;  %3041 = vmatpush.bf16.msra.mxu3 %v7482_v28 }
 0x300   : > { %v2847_v53 = vshrl.u32 %v2845_v44, 16  ;;  %v2810_v18 = vmax.f32 %v2794_v16, 0.0  ;;  %v2850_v6 = vshll.u32 %v2845_v44, 16 }
 0x301   : > { %v2583_v56 = vpop.f32.mrf.mxu1  ;;  %v1735_v7 = vadd.f32 %v8362_v19, %v1541_v41 }
 0x302   : > { %2826 = vst [vmem:[#allocation2 + $0x20] sm:$0xff] %v2810_v18  ;;  %v2616_v17 = vadd.f32 %v2583_v56, %v2350_v24  ;;  %v2849_v25 = vrot.slane %v2847_v53, 7  ;;  %v2327_v5 = vpop.f32.mrf.mxu0  ;;  %v2353_v18 = vadd.f32 %v2325_v22, %v2159_v15 }
 0x303   : > { %v2001_v3 = vadd.f32 %v8334_v30, %v1735_v7  ;;  %v7523_v30 = vld [vmem:[%s9980_s5 + $0x1a8] sm:$0xff] }
 0x304   : > { %v2775_v23 = vadd.f32 %v2742_v52, %v2616_v17  ;;  %v2852_v10 = vor.u32 %v2850_v6, %v2849_v25  ;;  %v2136_v44 = vpop.f32.mrf.mxu3  ;;  %v2752_v19 = vpop.f32.mrf.mxu2 }
 0x306   : > { %v2795_v0 = vadd.f32 %v8393_v26, %v2775_v23  ;;  %v2858_v45 = vsel %vm8408_vm10, %v2852_v10, %v2857_v34  ;;  %v2160_v23 = vadd.f32 %v2133_v55, %v2001_v3 }
 0x307   : > { %2859 = vst [vmem:[#allocation4 + $0x4] sm:$0x7] %v2858_v45 }
 0x308   : > { %v2811_v47 = vmax.f32 %v2795_v0, 0.0 }
 0x309   : > { %v2586_v59 = vpop.f32.mrf.mxu1  ;;  %v2860_v9 = vld [vmem:[#allocation2 + $0x20] ss:$2 sm:$0xf]  ;;  %v2861_v24 = vld [vmem:[#allocation2 + $0x21] ss:$2 sm:$0xf] }
 0x30a   : > { %2827 = vst [vmem:[#allocation2 + $0x28] sm:$0xff] %v2811_v47  ;;  %v2617_v27 = vadd.f32 %v2586_v59, %v2351_v50  ;;  %v2864_v25 = vmax.f32 %v2860_v9, %v2861_v24  ;;  %v2330_v45 = vpop.f32.mrf.mxu0  ;;  %v1376_v47 = vadd.f32 %v8261_v32, %v8268_v57  ;;  %v2161_v32 = vadd.f32 %v2136_v44, %v8369_v37  ;;  %v7520_v37 = vld [vmem:[%s9980_s5 + $0x190] sm:$0xff] }
 0x30c   : > { %v2776_v52 = vadd.f32 %v2745_v2, %v2617_v27  ;;  %v7525_v2 = vld [vmem:[%s9980_s5 + $0x1b8] sm:$0xff]  ;;  %v2138_v50 = vpop.f32.mrf.mxu3  ;;  %v2354_v27 = vadd.f32 %v2327_v5, %v2160_v23  ;;  %v2755_v29 = vpop.f32.mrf.mxu2 }
 0x30d   : > { %3619 = vmatpush.bf16.msrb.mxu2 %v7525_v2  ;;  %v7481_v5 = vld [vmem:[%s9980_s5 + $0x58] sm:$0xff] }
 0x30e   : > { %v2796_v40 = vadd.f32 %v8393_v26, %v2776_v52  ;;  %v1543_v52 = vadd.f32 %v8272_v48, %v1376_v47  ;;  %3042 = vmatpush.bf16.msra.mxu3 %v7481_v5 }
 0x310   : > { %v2812_v1 = vmax.f32 %v2796_v40, 0.0  ;;  %v1737_v57 = vadd.f32 %v8373_v54, %v1543_v52  ;;  %v7509_v52 = vld [vmem:[%s9980_s5 + $0x138] sm:$0xff] }
 0x311   : > { %v2588_v39 = vpop.f32.mrf.mxu1  ;;  %3620 = vmatpush.bf16.msrb.mxu2 %v7524_v21  ;;  %v1381_v21 = vadd.f32 %v8270_v58, %v8288_v14  ;;  %3425 = vmatpush.bf16.msra.mxu0 %v7509_v52  ;;  %v7503_v52 = vld [vmem:[%s9980_s5 + $0x108] sm:$0xff] }
 0x312   : > { %2828 = vst [vmem:[#allocation2 + $0x30] sm:$0xff] %v2812_v1  ;;  %v2618_v12 = vadd.f32 %v2588_v39, %v2352_v38  ;;  %v2876_v1 = vld [vmem:[#allocation4 + $0x8] sm:$0x7]  ;;  %v2003_v15 = vadd.f32 %v8349_v46, %v1737_v57  ;;  %v2332_v54 = vpop.f32.mrf.mxu0  ;;  %v7519_v46 = vld [vmem:[%s9980_s5 + $0x188] sm:$0xff] }
 0x313   : > { %v7521_v39 = vld [vmem:[%s9980_s5 + $0x198] sm:$0xff] }
 0x314   : > { %v2777_v31 = vadd.f32 %v2747_v8, %v2618_v12  ;;  %v2141_v44 = vpop.f32.mrf.mxu3  ;;  %v2162_v9 = vadd.f32 %v2138_v50, %v2003_v15  ;;  %v2757_v3 = vpop.f32.mrf.mxu2 }
 0x315   : > { %3621 = vmatpush.bf16.msrb.mxu2 %v7523_v30  ;;  %v2163_v58 = vadd.f32 %v2141_v44, %v8378_v49 }
 0x316   : > { %v2797_v16 = vadd.f32 %v8393_v26, %v2777_v31  ;;  %v2355_v31 = vadd.f32 %v2330_v45, %v2161_v32  ;;  %v7477_v32 = vld [vmem:[%s9980_s5 + $0x38] sm:$0xff] }
 0x318   : > { %v2813_v53 = vmax.f32 %v2797_v16, 0.0 }
 0x319   : > { %v2862_v56 = vld [vmem:[#allocation2 + $0x30] ss:$2 sm:$0xf]  ;;  %v2863_v33 = vld [vmem:[#allocation2 + $0x31] ss:$2 sm:$0xf]  ;;  %v2591_v17 = vpop.f32.mrf.mxu1  ;;  %3622 = vmatpush.bf16.msrb.mxu2 %v7522_v13 }
 0x31a   : > { %v2865_v6 = vmax.f32 %v2862_v56, %v2863_v33  ;;  %2829 = vst [vmem:[#allocation2 + $0x38] sm:$0xff] %v2813_v53  ;;  %v2619_v34 = vadd.f32 %v2591_v17, %v2353_v18  ;;  %v7480_v53 = vld [vmem:[%s9980_s5 + $0x50] sm:$0xff]  ;;  %v2356_v56 = vadd.f32 %v2332_v54, %v2162_v9  ;;  %v7518_v33 = vld [vmem:[%s9980_s5 + $0x180] sm:$0xff]  ;;  %v2335_v17 = vpop.f32.mrf.mxu0 }
 0x31b   : > { %3043 = vmatpush.bf16.msra.mxu3 %v7480_v53  ;;  %v2357_v50 = vadd.f32 %v2335_v17, %v2163_v58 }
 0x31c   : > { %v2778_v10 = vadd.f32 %v2750_v63, %v2619_v34  ;;  %v2866_v11 = vmax.f32 %v2864_v25, %v2865_v6  ;;  %v7479_v6 = vld [vmem:[%s9980_s5 + $0x48] sm:$0xff]  ;;  %v1545_v34 = vadd.f32 %v8291_v61, %v1381_v21  ;;  %v2143_v30 = vpop.f32.mrf.mxu3 }
 0x31d   : > { %3623 = vmatpush.bf16.msrb.mxu2 %v7521_v39 }
 0x31e   : > { %v2798_v8 = vadd.f32 %v8393_v26, %v2778_v10  ;;  %v2867_v0 = vpack.c.bf16 %v2866_v11, %v2866_v11  ;;  %v1739_v14 = vadd.f32 %v8380_v62, %v1545_v34  ;;  %v7478_v10 = vld [vmem:[%s9980_s5 + $0x40] sm:$0xff]  ;;  %v7505_v34 = vld [vmem:[%s9980_s5 + $0x118] sm:$0xff] }
 0x31f   : > { %3044 = vmatpush.bf16.msra.mxu3 %v7479_v6  ;;  %v7513_v6 = vld [vmem:[%s9980_s5 + $0x158] sm:$0xff] }
 0x320   : > { %v2814_v59 = vmax.f32 %v2798_v8, 0.0  ;;  %v2869_v43 = vshrl.u32 %v2867_v0, 16  ;;  %v2872_v63 = vshll.u32 %v2867_v0, 16  ;;  %v2760_v8 = vpop.f32.mrf.mxu2  ;;  %v2005_v61 = vadd.f32 %v8360_v60, %v1739_v14 }
 0x321   : > { %v2593_v55 = vpop.f32.mrf.mxu1  ;;  %3624 = vmatpush.bf16.msrb.mxu2 %v7520_v37 }
 0x322   : > { %2830 = vst [vmem:[#allocation2 + $0x40] sm:$0xff] %v2814_v59  ;;  %v2620_v22 = vadd.f32 %v2593_v55, %v2354_v27  ;;  %v2871_v40 = vrot.slane %v2869_v43, 7  ;;  %v7517_v55 = vld [vmem:[%s9980_s5 + $0x178] sm:$0xff]  ;;  %v2164_v60 = vadd.f32 %v2143_v30, %v2005_v61 }
 0x323   : > { %3045 = vmatpush.bf16.msra.mxu3 %v7478_v10  ;;  %3524 = vmatpush.bf16.msrb.mxu1 %v7517_v55  ;;  %v7512_v10 = vld [vmem:[%s9980_s5 + $0x150] sm:$0xff] }
 0x324   : > { %v2779_v38 = vadd.f32 %v2752_v19, %v2620_v22  ;;  %v2874_v41 = vor.u32 %v2872_v63, %v2871_v40  ;;  %v2337_v22 = vpop.f32.mrf.mxu0  ;;  %v2146_v57 = vpop.f32.mrf.mxu3 }
 0x325   : > { %3625 = vmatpush.bf16.msrb.mxu2 %v7519_v46  ;;  %v2165_v46 = vadd.f32 %v2146_v57, %v8384_v20  ;;  %v7502_v57 = vld [vmem:[%s9980_s5 + $0x100] sm:$0xff] }
 0x326   : > { %v2799_v12 = vadd.f32 %v8393_v26, %v2779_v38  ;;  %v2877_v48 = vsel %vm8408_vm10, %v2874_v41, %v2876_v1  ;;  %v7508_v1 = vld [vmem:[%s9980_s5 + $0x130] sm:$0xff] }
 0x327   : > { %2878 = vst [vmem:[#allocation4 + $0x8] sm:$0x7] %v2877_v48  ;;  %3107 = vmatpush.bf16.msrb.mxu3 %v7477_v32  ;;  %v7476_v41 = vld [vmem:[%s9980_s5 + $0x30] sm:$0xff]  ;;  %v2358_v48 = vadd.f32 %v2337_v22, %v2164_v60  ;;  %3426 = vmatpush.bf16.msra.mxu0 %v7508_v1  ;;  %v7510_v32 = vld [vmem:[%s9980_s5 + $0x140] sm:$0xff] }
 0x328   : > { %v2815_v7 = vmax.f32 %v2799_v12, 0.0  ;;  %v2762_v37 = vpop.f32.mrf.mxu2 }
 0x329   : > { %v2596_v2 = vpop.f32.mrf.mxu1  ;;  %3626 = vmatpush.bf16.msrb.mxu2 %v7518_v33  ;;  %v2879_v0 = vld [vmem:[#allocation2 + $0x40] ss:$2 sm:$0xf]  ;;  %v2880_v45 = vld [vmem:[#allocation2 + $0x41] ss:$2 sm:$0xf] }
 0x32a   : > { %2831 = vst [vmem:[#allocation2 + $0x48] sm:$0xff] %v2815_v7  ;;  %v2621_v16 = vadd.f32 %v2596_v2, %v2355_v31  ;;  %v2883_v27 = vmax.f32 %v2879_v0, %v2880_v45  ;;  %v7515_v7 = vld [vmem:[%s9980_s5 + $0x168] sm:$0xff]  ;;  %v1547_v2 = vadd.f32 %v8303_v4, %v8299_v51  ;;  %v7514_v51 = vld [vmem:[%s9980_s5 + $0x160] sm:$0xff] }
 0x32b   : > { %v7507_v31 = vld [vmem:[%s9980_s5 + $0x128] sm:$0xff]  ;;  %3108 = vmatpush.bf16.msrb.mxu3 %v7476_v41  ;;  %v7506_v4 = vld [vmem:[%s9980_s5 + $0x120] sm:$0xff] }
 0x32c   : > { %v2780_v24 = vadd.f32 %v2755_v29, %v2621_v16  ;;  %v7516_v29 = vld [vmem:[%s9980_s5 + $0x170] sm:$0xff]  ;;  %v2340_v9 = vpop.f32.mrf.mxu0  ;;  %v1741_v53 = vadd.f32 %v8386_v42, %v1547_v2  ;;  %3427 = vmatpush.bf16.msra.mxu0 %v7507_v31  ;;  %v2148_v17 = vpop.f32.mrf.mxu3 }
 0x32d   : > { %3525 = vmatpush.bf16.msrb.mxu1 %v7516_v29  ;;  %v2359_v42 = vadd.f32 %v2340_v9, %v2165_v46  ;;  %v7471_v46 = vld [vmem:[%s9980_s5 + $0x8] sm:$0xff] }
 0x32e   : > { %v2800_v18 = vadd.f32 %v8393_v26, %v2780_v24  ;;  %v2895_v24 = vld [vmem:[#allocation4 + $0xc] sm:$0x7]  ;;  %v2007_v33 = vadd.f32 %v8371_v36, %v1741_v53  ;;  %v7540_v9 = vld [vmem:[%s9980_s5 + $0x228] sm:$0xff] }
 0x330   : > { %v2816_v19 = vmax.f32 %v2800_v18, 0.0  ;;  %3428 = vmatpush.bf16.msra.mxu0 %v7506_v4  ;;  %v3320_v4 = vld [vmem:[#allocation4 + $0x4] sm:$0xf] }
 0x331   : > { %v2598_v25 = vpop.f32.mrf.mxu1  ;;  %3526 = vmatpush.bf16.msrb.mxu1 %v7515_v7  ;;  %v7542_v7 = vld [vmem:[%s9980_s5 + $0x238] sm:$0xff] }
 0x332   : > { %2832 = vst [vmem:[#allocation2 + $0x50] sm:$0xff] %v2816_v19  ;;  %v2622_v28 = vadd.f32 %v2598_v25, %v2356_v56  ;;  %v8526_v56 = vld [vmem:[#allocation4] sm:$0xff]  }
 0x333   : > { %v2971_v14 = vshll.u32 %v8526_v56, 16 }
 0x334   : > { %v2781_v23 = vadd.f32 %v2757_v3, %v2622_v28  ;;  %v7475_v3 = vld [vmem:[%s9980_s5 + $0x28] sm:$0xff]  ;;  %v2765_v28 = vpop.f32.mrf.mxu2  ;;  %3429 = vmatpush.bf16.msra.mxu0 %v7505_v34 }
 0x335   : > { %3109 = vmatpush.bf16.msrb.mxu3 %v7475_v3  ;;  %3527 = vmatpush.bf16.msrb.mxu1 %v7514_v51  ;;  %v2973_v0 = vrot.slane %v2971_v14, 1  ;;  %v2914_v51 = vld [vmem:[#allocation4 + $0x10] sm:$0x7]  ;;  %v7537_v14 = vld [vmem:[%s9980_s5 + $0x210] sm:$0xff] }
 0x336   : > { %v2801_v11 = vadd.f32 %v8393_v26, %v2781_v23  ;;  %v2166_v23 = vadd.f32 %v2148_v17, %v2007_v33  ;;  %v3347_v17 = vunpack.c.l.b16 %v3320_v4  ;;  %v7501_v4 = vld [vmem:[%s9980_s5 + $0xf8] sm:$0xff] }
 0x338   : > { %v2817_v47 = vmax.f32 %v2801_v11, 0.0  ;;  %v7504_v11 = vld [vmem:[%s9980_s5 + $0x110] sm:$0xff] }
 0x339   : > { %v2881_v49 = vld [vmem:[#allocation2 + $0x50] ss:$2 sm:$0xf]  ;;  %v2882_v59 = vld [vmem:[#allocation2 + $0x51] ss:$2 sm:$0xf]  ;;  %v2601_v62 = vpop.f32.mrf.mxu1  ;;  %3528 = vmatpush.bf16.msrb.mxu1 %v7513_v6  ;;  %3430 = vmatpush.bf16.msra.mxu0 %v7504_v11 }
 0x33a   : > { %v2884_v13 = vmax.f32 %v2881_v49, %v2882_v59  ;;  %2833 = vst [vmem:[#allocation2 + $0x58] sm:$0xff] %v2817_v47  ;;  %v2623_v43 = vadd.f32 %v2601_v62, %v2357_v50  ;;  %v2969_v50 = vshrl.u32 %v8526_v56, 16  ;;  %v7538_v6 = vld [vmem:[%s9980_s5 + $0x218] sm:$0xff]  ;;  %v7536_v11 = vld [vmem:[%s9980_s5 + $0x208] sm:$0xff] }
 0x33c   : > { %v2782_v40 = vadd.f32 %v2760_v8, %v2623_v43  ;;  %v2885_v63 = vmax.f32 %v2883_v27, %v2884_v13  ;;  %v2342_v8 = vpop.f32.mrf.mxu0  ;;  %v7511_v27 = vld [vmem:[%s9980_s5 + $0x148] sm:$0xff]  ;;  %v2974_v43 = vor.u32 %v2973_v0, %v2969_v50  ;;  %v2767_v60 = vpop.f32.mrf.mxu2 }
 0x33d   : > { %v2360_v59 = vadd.f32 %v2342_v8, %v2166_v23  ;;  %3529 = vmatpush.bf16.msrb.mxu1 %v7512_v10  ;;  %3431 = vmatpush.bf16.msra.mxu0 %v7503_v52  ;;  %v7491_v10 = vld [vmem:[%s9980_s5 + $0xa8] sm:$0xff] }
 0x33e   : > { %v2802_v38 = vadd.f32 %v8393_v26, %v2782_v40  ;;  %v2886_v39 = vpack.c.bf16 %v2885_v63, %v2885_v63  ;;  %v7474_v63 = vld [vmem:[%s9980_s5 + $0x20] sm:$0xff] }
 0x33f   : > { %3110 = vmatpush.bf16.msrb.mxu3 %v7474_v63 }
 0x340   : > { %v2818_v12 = vmax.f32 %v2802_v38, 0.0  ;;  %v2888_v15 = vshrl.u32 %v2886_v39, 16  ;;  %v2891_v5 = vshll.u32 %v2886_v39, 16 }
 0x341   : > { %v2603_v54 = vpop.f32.mrf.mxu1  ;;  %3530 = vmatpush.bf16.msrb.mxu1 %v7511_v27  ;;  %3432 = vmatpush.bf16.msra.mxu0 %v7502_v57  ;;  %v7535_v57 = vld [vmem:[%s9980_s5 + $0x200] sm:$0xff] }
 0x342   : > { %2834 = vst [vmem:[#allocation2 + $0x60] sm:$0xff] %v2818_v12  ;;  %v2624_v44 = vadd.f32 %v2603_v54, %v2358_v48  ;;  %v2890_v16 = vrot.slane %v2888_v15, 7  ;;  %v7473_v15 = vld [vmem:[%s9980_s5 + $0x18] sm:$0xff] }
 0x343   : > { %3111 = vmatpush.bf16.msrb.mxu3 %v7473_v15 }
 0x344   : > { %v2783_v18 = vadd.f32 %v2762_v37, %v2624_v44  ;;  %v2893_v21 = vor.u32 %v2891_v5, %v2890_v16  ;;  %v7541_v44 = vld [vmem:[%s9980_s5 + $0x230] sm:$0xff] }
 0x345   : > { %3531 = vmatpush.bf16.msrb.mxu1 %v7510_v32  ;;  %3846 = vmatpush.bf16.msrb.mxu0 %v7542_v7 }
 0x346   : > { %v2803_v20 = vadd.f32 %v8393_v26, %v2783_v18  ;;  %v2896_v19 = vsel %vm8408_vm10, %v2893_v21, %v2895_v24  ;;  %v7470_v18 = vld [vmem:[%s9980_s5] sm:$0xff] }
 0x347   : > { %2897 = vst [vmem:[#allocation4 + $0xc] sm:$0x7] %v2896_v19  ;;  %v7539_v21 = vld [vmem:[%s9980_s5 + $0x220] sm:$0xff] }
 0x348   : > { %v2819_v25 = vmax.f32 %v2803_v20, 0.0 }
 0x349   : > { %v2606_v58 = vpop.f32.mrf.mxu1  ;;  %v2898_v41 = vld [vmem:[#allocation2 + $0x60] ss:$2 sm:$0xf]  ;;  %v2899_v12 = vld [vmem:[#allocation2 + $0x61] ss:$2 sm:$0xf]  ;;  %3847 = vmatpush.bf16.msrb.mxu0 %v7541_v44 }
 0x34a   : > { %2835 = vst [vmem:[#allocation2 + $0x68] sm:$0xff] %v2819_v25  ;;  %v2625_v30 = vadd.f32 %v2606_v58, %v2359_v42  ;;  %v2902_v54 = vmax.f32 %v2898_v41, %v2899_v12  ;;  %v3646_v42 = vld [vmem:[#allocation4 + $0x18] sm:$0x1]  ;;  %v7493_v25 = vld [vmem:[%s9980_s5 + $0xb8] sm:$0xff] }
 0x34b   : > { %v3673_v34 = vunpack.c.l.b16 %v3646_v42  ;;  %v3448_v58 = vld [vmem:[#allocation4 + $0x4] sm:$0xe] }
 0x34c   : > { %v2784_v36 = vadd.f32 %v2765_v28, %v2625_v30 }
 0x34d   : > { %3848 = vmatpush.bf16.msrb.mxu0 %v7540_v9  ;;  %v8612_v30 = vpack.c.b16 %v3673_v34, %v3673_v34 }
 0x34e   : > { %v2804_v45 = vadd.f32 %v8393_v26, %v2784_v36  ;;  %v8543_v61 = vld [vmem:[#allocation4 + $0x8] sm:$0xff]   ;;  %v3467_v36 = vunpack.c.l.b16 %v3448_v58 }
 0x34f   : > { %v8545_v47 = vld [vmem:[#allocation4 + $0xc] sm:$0xf]  ;;  %3627 = vmatmul.bf16.vlgmr.msrb.gmra.mxu2 %v8543_v61  ;;  %v2976_v49 = vshll.u32 %v8543_v61, 16  ;;  %v2980_v29 = vshrl.u32 %v8543_v61, 16  ;;  %v8595_v19 = vunpack.c.l.b16 %v8543_v61 }
 0x350   : > { %v2820_v62 = vmax.f32 %v2804_v45, 0.0  ;;  %v7774_v42 = vld [vmem:[#allocation4 + $0x8] sm:$0xf0] }
 0x351   : > { %v2608_v13 = vpop.f32.mrf.mxu1  ;;  %v2978_v55 = vrot.slane %v2976_v49, 1  ;;  %3849 = vmatpush.bf16.msrb.mxu0 %v7539_v21  ;;  %v3352_v28 = vpack.c.b16 %v8595_v19, %v3347_v17  ;;  %v3693_v49 = vshll.u32 %v8612_v30, 16  ;;  %v7775_v17 = vld [vmem:[#allocation4 + $0x8] sm:$0xe] }
 0x352   : > { %2836 = vst [vmem:[#allocation2 + $0x70] sm:$0xff] %v2820_v62  ;;  %v2626_v22 = vadd.f32 %v2608_v13, %v2360_v59  ;;  %v3468_v59 = vpack.c.b16 %v8595_v19, %v3467_v36  ;;  %v7734_v36 = vunpack.c.h.b16 %v8526_v56 }
 0x353   : > { %v2979_v40 = vsel %vm1109_vm7, %v2974_v43, %v2978_v55  ;;  %v8567_v38 = vor.u32 %v2980_v29, %v2978_v55  ;;  %v3358_v23 = vshll.u32 %v3352_v28, 16  ;;  %v3356_v52 = vshrl.u32 %v3352_v28, 16 }
 0x354   : > { %v2785_v1 = vadd.f32 %v2767_v60, %v2626_v22  ;;  %3046 = vmatmul.bf16.vlgmr.msra.gmra.mxu3 %v2979_v40  ;;  %v7490_v22 = vld [vmem:[%s9980_s5 + $0xa0] sm:$0xff]  ;;  %v3695_v63 = vrot.slane %v3693_v49, 1  ;;  %v3469_v29 = vrot.slane %v3468_v59, 1 }
 0x355   : > { %3850 = vmatpush.bf16.msrb.mxu0 %v7538_v6  ;;  %v3360_v55 = vrot.slane %v3358_v23, 1  ;;  %v7498_v6 = vld [vmem:[%s9980_s5 + $0xe0] sm:$0xff]  ;;  %v7496_v23 = vld [vmem:[%s9980_s5 + $0xd0] sm:$0xff] }
 0x356   : > { %v2805_v39 = vadd.f32 %v8393_v26, %v2785_v1  ;;  %v7472_v26 = vld [vmem:[%s9980_s5 + $0x10] sm:$0xff] }
 0x357   : > { %3112 = vmatpush.bf16.msrb.mxu3 %v7472_v26  ;;  %v3361_v15 = vor.u32 %v3360_v55, %v3356_v52  ;;  %v7489_v26 = vld [vmem:[%s9980_s5 + $0x98] sm:$0xff] }
 0x358   : > { %v2821_v48 = vmax.f32 %v2805_v39, 0.0  ;;  %v7530_v52 = vld [vmem:[%s9980_s5 + $0x1d8] sm:$0xff] }
 0x359   : > { %v2900_v31 = vld [vmem:[#allocation2 + $0x70] ss:$2 sm:$0xf]  ;;  %v2901_v37 = vld [vmem:[#allocation2 + $0x71] ss:$2 sm:$0xf]  ;;  %3851 = vmatpush.bf16.msrb.mxu0 %v7537_v14 }
 0x35a   : > { %v2903_v2 = vmax.f32 %v2900_v31, %v2901_v37  ;;  %2837 = vst [vmem:[#allocation2 + $0x78] sm:$0xff] %v2821_v48  ;;  %v3324_v31 = vld [vmem:[#allocation4 + $0x14] sm:$0x1]  ;;  %v3126_v14 = vld [vmem:[#allocation4] sm:$0xe] }
 0x35b   : > { %3113 = vmatpush.bf16.msrb.mxu3 %v7471_v46  ;;  %v3351_v44 = vunpack.c.l.b16 %v3324_v31 }
 0x35c   : > { %v2904_v16 = vmax.f32 %v2902_v54, %v2903_v2 }
 0x35d   : > { %3852 = vmatpush.bf16.msrb.mxu0 %v7536_v11  ;;  %v7495_v11 = vld [vmem:[%s9980_s5 + $0xc8] sm:$0xff] }
 0x35e   : > { %v2905_v5 = vpack.c.bf16 %v2904_v16, %v2904_v16  ;;  %v7488_v16 = vld [vmem:[%s9980_s5 + $0x90] sm:$0xff] }
 0x35f   : > { %3114 = vmatpush.bf16.msrb.mxu3 %v7470_v18 }
 0x360   : > { %v2907_v24 = vshrl.u32 %v2905_v5, 16  ;;  %v2910_v53 = vshll.u32 %v2905_v5, 16  ;;  %v3354_v5 = vpack.c.b16 %v3351_v44, %v3351_v44 }
 0x361   : > { %3853 = vmatpush.bf16.msrb.mxu0 %v7535_v57 }
 0x362   : > { %v2909_v3 = vrot.slane %v2907_v24, 7  ;;  %v3371_v46 = vshll.u32 %v3354_v5, 16  ;;  %v3472_v9 = vrot.slane %v3354_v5, 1 }
 0x363   : > { %3202 = vmatpush.bf16.msra.mxu3 %v7493_v25  ;;  %v7776_v25 = vor.u32 %v7775_v17, %v7774_v42 }
 0x364   : > { %v2912_v20 = vor.u32 %v2910_v53, %v2909_v3  ;;  %v7486_v3 = vld [vmem:[%s9980_s5 + $0x80] sm:$0xff]  ;;  %v3373_v18 = vrot.slane %v3371_v46, 1 }
 0x365   : > { %v3791_v28 = vrot.slane %v7776_v25, 1  ;;  %v6631_v46 = vld [vmem:[%s9982_s7 + $0x60] sm:$0xf] }
 0x366   : > { %v2915_v33 = vsel %vm8408_vm10, %v2912_v20, %v2914_v51  ;;  %v7500_v20 = vld [vmem:[%s9980_s5 + $0xf0] sm:$0xff] }
 0x367   : > { %2916 = vst [vmem:[#allocation4 + $0x10] sm:$0x7] %v2915_v33  ;;  %3203 = vmatpush.bf16.msra.mxu3 %v7492_v35  ;;  %v7499_v33 = vld [vmem:[%s9980_s5 + $0xe8] sm:$0xff]  ;;  %v7497_v35 = vld [vmem:[%s9980_s5 + $0xd8] sm:$0xff] }
 0x36b   : > { %3204 = vmatpush.bf16.msra.mxu3 %v7491_v10  ;;  %v3145_v10 = vunpack.c.l.b16 %v3126_v14 }
 0x36e   : > { %v3323_v8 = vld [vmem:[#allocation4 + $0x10] sm:$0xff]  }
 0x36f   : > { %v7853_v0 = vld [vmem:[#allocation4 + $0xc] sm:$0xf0]   ;;  %3632 = vmatmul.bf16.gmra.mxu2 %v3323_v8  ;;  %3205 = vmatpush.bf16.msra.mxu3 %v7490_v22  ;;  %v3146_v8 = vpack.c.b16 %v7734_v36, %v3145_v10  ;;  %v7529_v22 = vld [vmem:[%s9980_s5 + $0x1d0] sm:$0xff] }
 0x370   : > { %v2937_v45 = vld [vmem:[#allocation4 + $0x10] sm:$0x1]  ;;  %v7851_v13 = vor.u32 %v7853_v0, %v8545_v47  ;;  %v7549_v10 = vld [vmem:[%s9982_s7 + $0x34] sm:$0xf] }
 0x371   : > { %v8620_v50 = vld [vmem:[#allocation4 + $0x10] sm:$0xff]  ;;  %v2964_v62 = vunpack.c.l.b16 %v2937_v45  ;;  %v3148_v45 = vrot.slane %v8543_v61, 1  ;;  %v3147_v49 = vrot.slane %v3146_v8, 1 }
 0x372   : > { %v3685_v27 = vshll.u32 %v8620_v50, 16  ;;  %v3689_v40 = vshrl.u32 %v8620_v50, 16  ;;  %v3470_v1 = vrot.slane %v7851_v13, 1  ;;  %v3363_v47 = vshll.u32 %v7851_v13, 16  ;;  %v7494_v0 = vld [vmem:[%s9980_s5 + $0xc0] sm:$0xff] }
 0x373   : > { %v8626_v43 = vpack.c.b16 %v2964_v62, %v2964_v62  ;;  %3206 = vmatpush.bf16.msra.mxu3 %v7489_v26  ;;  %v3367_v24 = vshrl.u32 %v7851_v13, 16  ;;  %v3792_v34 = vrot.slane %v8620_v50, 1  ;;  %v3794_v50 = vrot.slane %v8612_v30, 1  ;;  %v7534_v62 = vld [vmem:[%s9980_s5 + $0x1f8] sm:$0xff]  ;;  %v7531_v30 = vld [vmem:[%s9980_s5 + $0x1e0] sm:$0xff] }
 0x374   : > { %v3687_v60 = vrot.slane %v3685_v27, 1  ;;  %v3471_v12 = vsel %vm1409_vm6, %v3469_v29, %v3470_v1  ;;  %v3365_v7 = vrot.slane %v3363_v47, 1  ;;  %v3473_v21 = vsel %vm1409_vm6, %v3470_v1, %v3472_v9  ;;  %v7533_v27 = vld [vmem:[%s9980_s5 + $0x1f0] sm:$0xff]  ;;  %v7556_v9 = vld [vmem:[%s9982_s7 + $0x64] sm:$0xf0] }
 0x375   : > { %v2984_v32 = vshll.u32 %v8626_v43, 16  ;;  %3532 = vmatmul.bf16.vlgmr.msrb.gmra.mxu1 %v3471_v12  ;;  %v3793_v58 = vsel %vm1409_vm6, %v3791_v28, %v3792_v34  ;;  %v3795_v59 = vsel %vm1409_vm6, %v3792_v34, %v3794_v50  ;;  %v3150_v13 = vrot.slane %v8626_v43, 1  ;;  %v7527_v43 = vld [vmem:[%s9980_s5 + $0x1c0] sm:$0xff]  ;;  %v7552_v34 = vld [vmem:[%s9982_s7 + $0x44] sm:$0xf0] }
 0x376   : > { %v8638_v39 = vsel %vm1109_vm7, %v8567_v38, %v3687_v60  ;;  %v3691_v41 = vor.u32 %v3689_v40, %v3687_v60  ;;  %v3366_v2 = vsel %vm1109_vm7, %v3361_v15, %v3365_v7  ;;  %v3369_v53 = vor.u32 %v3367_v24, %v3365_v7  ;;  %v7528_v60 = vld [vmem:[%s9980_s5 + $0x1c8] sm:$0xff]  ;;  %v7555_v24 = vld [vmem:[%s9982_s7 + $0x64] sm:$0xf] }
 0x377   : > { %v2986_v48 = vrot.slane %v2984_v32, 1  ;;  %3433 = vmatmul.bf16.vlgmr.msra.gmra.mxu0 %v3366_v2  ;;  %3207 = vmatpush.bf16.msra.mxu3 %v7488_v16  ;;  %v3151_v55 = vsel %vm1409_vm6, %v3148_v45, %v3150_v13  ;;  %v3245_v40 = vpack.c.b16 %v8595_v19, %v7734_v36  ;;  %v7557_v2 = vld [vmem:[%s9982_s7 + $0x74] sm:$0xf]  ;;  %v6641_v16 = vld [vmem:[%s9982_s7 + $0x78] sm:$0xf0] }
 0x378   : > { %v8642_v37 = vsel %vm1109_vm7, %v3691_v41, %v3695_v63  ;;  %v3374_v51 = vsel %vm1109_vm7, %v3369_v53, %v3373_v18  ;;  %v7782_v63 = vld [vmem:[#allocation4 + $0xc] sm:$0xff]  ;;  %v6644_v5 = vor.u32 %v7557_v2, %v6641_v16  ;;  %v6633_v53 = vld [vmem:[%s9982_s7 + $0x68] sm:$0xf0]  ;;  %v6623_v18 = vld [vmem:[%s9982_s7 + $0x50] sm:$0xf] }
 0x379   : > { %v2987_v54 = vsel %vm1109_vm7, %v8567_v38, %v2986_v48  ;;  %v7487_v38 = vld [vmem:[%s9980_s5 + $0x88] sm:$0xff]  ;;  %v7550_v36 = vld [vmem:[%s9982_s7 + $0x34] sm:$0xf0] }
 0x37a   : > { %3051 = vmatmul.bf16.gmra.mxu3 %v2987_v54  ;;  %v7558_v54 = vld [vmem:[%s9982_s7 + $0x74] sm:$0xf0]  ;;  %4190 = vmatpush.bf16.msra.mxu0 %v6644_v5 }
 0x37b   : > { %3208 = vmatpush.bf16.msra.mxu3 %v7487_v38  ;;  %v7546_v13 = vld [vmem:[%s9982_s7 + $0x14] sm:$0xf0] }
 0x37f   : > { %3209 = vmatpush.bf16.msra.mxu3 %v7486_v3  ;;  %v6632_v3 = vor.u32 %v7556_v9, %v6631_v46  ;;  %v6585_v46 = vld [vmem:[%s9982_s7 + $0x8] sm:$0xf0]  ;;  %v6567_v9 = vld [vmem:[%s9982_s7 + $0xe0] sm:$0xf] }
 0x385   : > { %3537 = vmatmul.bf16.gmra.mxu1 %v3473_v21  ;;  %v7554_v21 = vld [vmem:[%s9982_s7 + $0x54] sm:$0xf0] }
 0x387   : > { %3438 = vmatmul.bf16.gmra.mxu0 %v3374_v51  ;;  %v6636_v51 = vor.u32 %v7555_v24, %v6633_v53  ;;  %v7572_v24 = vld [vmem:[%s9982_s7 + $0xe4] sm:$0xf0] }
 0x388   : > { %v6568_v53 = vor.u32 %v7572_v24, %v6567_v9  ;;  %v7600_v9 = vld [vmem:[%s9982_s7 + $0x1c4] sm:$0xf0] }
 0x389   : > { %4191 = vmatpush.bf16.msra.mxu0 %v6636_v51  ;;  %v6799_v51 = vld [vmem:[%s9982_s7 + $0x1f0] sm:$0xf] }
 0x38a   : > { %3115 = vmatmul.bf16.vlgmr.msrb.gmra.mxu3 %v8526_v56  ;;  %v3149_v56 = vsel %vm1409_vm6, %v3147_v49, %v3148_v45  ;;  %v6609_v45 = vld [vmem:[%s9982_s7 + $0x38] sm:$0xf0]  ;;  %v6599_v49 = vld [vmem:[%s9982_s7 + $0x20] sm:$0xf] }
 0x38b   : > { %3297 = vmatpush.bf16.msrb.mxu3 %v7501_v4  ;;  %v7553_v4 = vld [vmem:[%s9982_s7 + $0x54] sm:$0xf]  ;;  %v6612_v50 = vor.u32 %v7549_v10, %v6609_v45  ;;  %v7604_v10 = vld [vmem:[%s9982_s7 + $0x1e4] sm:$0xf0] }
 0x38f   : > { %3298 = vmatpush.bf16.msrb.mxu3 %v7500_v20  ;;  %v6625_v20 = vld [vmem:[%s9982_s7 + $0x58] sm:$0xf0] }
 0x390   : > { %v6628_v17 = vor.u32 %v7553_v4, %v6625_v20 }
 0x392   : > { %4192 = vmatpush.bf16.msra.mxu0 %v6628_v17  ;;  %v7605_v17 = vld [vmem:[%s9982_s7 + $0x1f4] sm:$0xf] }
 0x393   : > { %3299 = vmatpush.bf16.msrb.mxu3 %v7499_v33  ;;  %v6624_v33 = vor.u32 %v7554_v21, %v6623_v18  ;;  %v7571_v18 = vld [vmem:[%s9982_s7 + $0xe4] sm:$0xf]  ;;  %v6569_v21 = vld [vmem:[%s9982_s7 + $0xe8] sm:$0xf0] }
 0x394   : > { %v6572_v20 = vor.u32 %v7571_v18, %v6569_v21  ;;  %v7599_v18 = vld [vmem:[%s9982_s7 + $0x1c4] sm:$0xf]  ;;  %v6777_v21 = vld [vmem:[%s9982_s7 + $0x1c8] sm:$0xf0] }
 0x397   : > { %3300 = vmatpush.bf16.msrb.mxu3 %v7498_v6  ;;  %3854 = vmatmul.bf16.vlgmr.msrb.gmra.mxu0 %v3793_v58  ;;  %v6615_v6 = vld [vmem:[%s9982_s7 + $0x40] sm:$0xf]  ;;  %v7551_v58 = vld [vmem:[%s9982_s7 + $0x44] sm:$0xf] }
 0x398   : > { %v6616_v28 = vor.u32 %v7552_v34, %v6615_v6 }
 0x39a   : > { %3120 = vmatmul.bf16.gmra.mxu3 %v8543_v61  ;;  %v7532_v61 = vld [vmem:[%s9980_s5 + $0x1e8] sm:$0xff] }
 0x39b   : > { %3301 = vmatpush.bf16.msrb.mxu3 %v7497_v35  ;;  %v6617_v35 = vld [vmem:[%s9982_s7 + $0x48] sm:$0xf0] }
 0x39c   : > { %v6620_v14 = vor.u32 %v7551_v58, %v6617_v35  ;;  %v7570_v58 = vld [vmem:[%s9982_s7 + $0xd4] sm:$0xf0]  ;;  %v7569_v35 = vld [vmem:[%s9982_s7 + $0xd4] sm:$0xf] }
 0x39e   : > { %4193 = vmatpush.bf16.msra.mxu0 %v6620_v14 }
 0x39f   : > { %3302 = vmatpush.bf16.msrb.mxu3 %v7496_v23  ;;  %v6607_v23 = vld [vmem:[%s9982_s7 + $0x30] sm:$0xf] }
 0x3a2   : > { %4194 = vmatpush.bf16.msra.mxu0 %v6612_v50 }
 0x3a3   : > { %3303 = vmatpush.bf16.msrb.mxu3 %v7495_v11 }
 0x3a7   : > { %3304 = vmatpush.bf16.msrb.mxu3 %v7494_v0  ;;  %3859 = vmatmul.bf16.gmra.mxu0 %v3795_v59  ;;  %v6608_v0 = vor.u32 %v7550_v36, %v6607_v23  ;;  %v7547_v59 = vld [vmem:[%s9982_s7 + $0x24] sm:$0xf]  ;;  %v6561_v23 = vld [vmem:[%s9982_s7 + $0xd8] sm:$0xf0]  ;;  %v6791_v36 = vld [vmem:[%s9982_s7 + $0x1e0] sm:$0xf] }
 0x3a8   : > { %v6564_v45 = vor.u32 %v7569_v35, %v6561_v23  ;;  %v6792_v50 = vor.u32 %v7604_v10, %v6791_v36  ;;  %v7597_v36 = vld [vmem:[%s9982_s7 + $0x1b4] sm:$0xf]  ;;  %v6769_v10 = vld [vmem:[%s9982_s7 + $0x1b8] sm:$0xf0] }
 0x3aa   : > { %3210 = vmatmul.bf16.vlgmr.msra.gmra.mxu3 %v3149_v56  ;;  %v7548_v56 = vld [vmem:[%s9982_s7 + $0x24] sm:$0xf0] }
 0x3ab   : > { %3747 = vmatpush.bf16.msra.mxu3 %v7534_v62  ;;  %v6600_v62 = vor.u32 %v7548_v56, %v6599_v49  ;;  %v6793_v49 = vld [vmem:[%s9982_s7 + $0x1e8] sm:$0xf0] }
 0x3af   : > { %3748 = vmatpush.bf16.msra.mxu3 %v7533_v27  ;;  %v6601_v27 = vld [vmem:[%s9982_s7 + $0x28] sm:$0xf0] }
 0x3b3   : > { %3749 = vmatpush.bf16.msra.mxu3 %v7532_v61  ;;  %v6604_v61 = vor.u32 %v7547_v59, %v6601_v27 }
 0x3b5   : > { %4195 = vmatpush.bf16.msra.mxu0 %v6604_v61  ;;  %v6551_v61 = vld [vmem:[%s9982_s7 + $0xc0] sm:$0xf] }
 0x3b7   : > { %3750 = vmatpush.bf16.msra.mxu3 %v7531_v30  ;;  %v6591_v30 = vld [vmem:[%s9982_s7 + $0x10] sm:$0xf] }
 0x3ba   : > { %3215 = vmatmul.bf16.gmra.mxu3 %v3151_v55  ;;  %v7545_v55 = vld [vmem:[%s9982_s7 + $0x14] sm:$0xf] }
 0x3bb   : > { %3751 = vmatpush.bf16.msra.mxu3 %v7530_v52 }
 0x3bf   : > { %3752 = vmatpush.bf16.msra.mxu3 %v7529_v22  ;;  %v6592_v22 = vor.u32 %v7546_v13, %v6591_v30  ;;  %v7568_v30 = vld [vmem:[%s9982_s7 + $0xc4] sm:$0xf0]  ;;  %v7567_v13 = vld [vmem:[%s9982_s7 + $0xc4] sm:$0xf] }
 0x3c3   : > { %3753 = vmatpush.bf16.msra.mxu3 %v7528_v60  ;;  %v6593_v60 = vld [vmem:[%s9982_s7 + $0x18] sm:$0xf0] }
 0x3c7   : > { %3754 = vmatpush.bf16.msra.mxu3 %v7527_v43  ;;  %v6575_v43 = vld [vmem:[%s9982_s7 + $0xf0] sm:$0xf] }
 0x3ca   : > { %3305 = vmatmul.bf16.vlgmr.msrb.gmra.mxu3 %v3245_v40  ;;  %v7574_v40 = vld [vmem:[%s9982_s7 + $0xf4] sm:$0xf0] }
 0x3d7   : > { %v3047_v29 = vpop.f32.mrf.mxu3 }
 0x3da   : > { %3310 = vmatmul.bf16.gmra.mxu3 %v7782_v63 }
 0x3df   : > { %v8722_v1 = vpop.f32.mrf.mxu3 }
 0x3ea   : > { %3755 = vmatmul.bf16.vlgmr.msra.gmra.mxu3 %v8638_v39 }
 0x3f2   : > { %v3533_v16 = vpop.f32.mrf.mxu1 }
 0x3f4   : > { %v8750_v26 = vpop.f32.mrf.mxu0 }
 0x3fa   : > { %3760 = vmatmul.bf16.gmra.mxu3 %v8642_v37  ;;  %v6639_v37 = vld [vmem:[%s9982_s7 + $0x70] sm:$0xf] }
 0x3fb   : > { %v6640_v44 = vor.u32 %v7558_v54, %v6639_v37 }
 0x3fc   : > { %v8781_v42 = vpop.f32.mrf.mxu0 }
 0x3fd   : > { %v3052_v32 = vpop.f32.mrf.mxu3  ;;  %4176 = vmatpush.bf16.msrb.mxu3 %v6640_v44  ;;  %v7543_v44 = vld [vmem:[%s9982_s7 + $0x4] sm:$0xf] }
 0x401   : > { %4177 = vmatpush.bf16.msrb.mxu3 %v6632_v3  ;;  %v6588_v3 = vor.u32 %v7543_v44, %v6585_v46  ;;  %v6543_v44 = vld [vmem:[%s9982_s7 + $0xb0] sm:$0xf] }
 0x404   : > { %v8804_v11 = vpop.f32.mrf.mxu0 }
 0x405   : > { %v8725_v47 = vpop.f32.mrf.mxu3  ;;  %4178 = vmatpush.bf16.msrb.mxu3 %v6624_v33  ;;  %v7606_v33 = vld [vmem:[%s9982_s7 + $0x1f4] sm:$0xf0] }
 0x406   : > { %v6800_v34 = vor.u32 %v7606_v33, %v6799_v51 }
 0x409   : > { %4179 = vmatpush.bf16.msrb.mxu3 %v6616_v28  ;;  %v6559_v28 = vld [vmem:[%s9982_s7 + $0xd0] sm:$0xf] }
 0x40a   : > { %v6560_v14 = vor.u32 %v7570_v58, %v6559_v28  ;;  %v6767_v28 = vld [vmem:[%s9982_s7 + $0x1b0] sm:$0xf]  ;;  %v7598_v58 = vld [vmem:[%s9982_s7 + $0x1b4] sm:$0xf0] }
 0x40b   : > { %v6768_v23 = vor.u32 %v7598_v58, %v6767_v28 }
 0x40c   : > { %v8851_v37 = vpop.f32.mrf.mxu0 }
 0x40d   : > { %v3116_v57 = vpop.f32.mrf.mxu3  ;;  %4180 = vmatpush.bf16.msrb.mxu3 %v6608_v0  ;;  %v3628_v0 = vpop.f32.mrf.mxu2 }
 0x40e   : > { %v8727_v41 = vadd.f32 %v3116_v57, %v3047_v29  ;;  %v6596_v29 = vor.u32 %v7545_v55, %v6593_v60  ;;  %v7573_v57 = vld [vmem:[%s9982_s7 + $0xf4] sm:$0xf]  ;;  %v6553_v55 = vld [vmem:[%s9982_s7 + $0xc8] sm:$0xf0]  ;;  %v7602_v60 = vld [vmem:[%s9982_s7 + $0x1d4] sm:$0xf0] }
 0x410   : > { %4196 = vmatpush.bf16.msra.mxu0 %v6596_v29  ;;  %v7601_v29 = vld [vmem:[%s9982_s7 + $0x1d4] sm:$0xf] }
 0x411   : > { %4181 = vmatpush.bf16.msrb.mxu3 %v6600_v62 }
 0x414   : > { %4197 = vmatpush.bf16.msra.mxu0 %v6588_v3  ;;  %v3855_v27 = vpop.f32.mrf.mxu0 }
 0x415   : > { %v8729_v12 = vpop.f32.mrf.mxu3  ;;  %4182 = vmatpush.bf16.msrb.mxu3 %v6592_v22  ;;  %v6783_v22 = vld [vmem:[%s9982_s7 + $0x1d0] sm:$0xf]  ;;  %v3630_v33 = vpop.f32.mrf.mxu2 }
 0x416   : > { %v3119_v4 = vadd.f32 %v8729_v12, %v8722_v1 }
 0x41c   : > { %v3857_v35 = vpop.f32.mrf.mxu0 }
 0x41d   : > { %v3121_v19 = vpop.f32.mrf.mxu3 }
 0x41e   : > { %v8731_v48 = vadd.f32 %v3121_v19, %v3052_v32  ;;  %v6576_v32 = vor.u32 %v7574_v40, %v6575_v43  ;;  %v6577_v19 = vld [vmem:[%s9982_s7 + $0xf8] sm:$0xf0]  ;;  %v3535_v43 = vpop.f32.mrf.mxu1  ;;  %v6556_v40 = vor.u32 %v7567_v13, %v6553_v55  ;;  %v7596_v55 = vld [vmem:[%s9982_s7 + $0x1a4] sm:$0xf0] }
 0x41f   : > { %v6580_v54 = vor.u32 %v7573_v57, %v6577_v19 }
 0x420   : > { %4067 = vmatpush.bf16.msra.mxu1 %v6576_v32  ;;  %v6785_v32 = vld [vmem:[%s9982_s7 + $0x1d8] sm:$0xf0] }
 0x421   : > { %4081 = vmatpush.bf16.msra.mxu2 %v6580_v54  ;;  %v8948_v54 = vld [vmem:[%s9981_s6] ss:$0 sm:$0xff] }
 0x424   : > { %4068 = vmatpush.bf16.msra.mxu1 %v6568_v53 }
 0x425   : > { %v8733_v15 = vpop.f32.mrf.mxu3  ;;  %4082 = vmatpush.bf16.msra.mxu2 %v6572_v20  ;;  %v6780_v20 = vor.u32 %v7599_v18, %v6777_v21  ;;  %v7589_v18 = vld [vmem:[%s9982_s7 + $0x174] sm:$0xf]  ;;  %v3860_v21 = vpop.f32.mrf.mxu0 }
 0x428   : > { %4069 = vmatpush.bf16.msra.mxu1 %v6560_v14 }
 0x429   : > { %4083 = vmatpush.bf16.msra.mxu2 %v6564_v45 }
 0x42d   : > { %v8735_v7 = vpop.f32.mrf.mxu3  ;;  %4084 = vmatpush.bf16.msra.mxu2 %v6556_v40 }
 0x42e   : > { %v3221_v63 = vadd.f32 %v8735_v7, %v8727_v41  ;;  %v6583_v41 = vld [vmem:[%s9982_s7] sm:$0xf]  ;;  %v7544_v7 = vld [vmem:[%s9982_s7 + $0x4] sm:$0xf0] }
 0x42f   : > { %v6584_v5 = vor.u32 %v7544_v7, %v6583_v41 }
 0x431   : > { %4183 = vmatpush.bf16.msrb.mxu3 %v6584_v5 }
 0x435   : > { %v8737_v39 = vpop.f32.mrf.mxu3  ;;  %4443 = vmatpush.bf16.msra.mxu3 %v6800_v34 }
 0x439   : > { %4444 = vmatpush.bf16.msra.mxu3 %v6792_v50 }
 0x43d   : > { %v8739_v31 = vpop.f32.mrf.mxu3 }
 0x43e   : > { %v3223_v41 = vadd.f32 %v8739_v31, %v8731_v48  ;;  %v6545_v48 = vld [vmem:[%s9982_s7 + $0xb8] sm:$0xf0]  ;;  %v6775_v31 = vld [vmem:[%s9982_s7 + $0x1c0] sm:$0xf] }
 0x43f   : > { %v6776_v53 = vor.u32 %v7600_v9, %v6775_v31 }
 0x445   : > { %v8755_v38 = vpop.f32.mrf.mxu3 }
 0x44d   : > { %v3306_v25 = vpop.f32.mrf.mxu3 }
 0x44e   : > { %v3316_v2 = vadd.f32 %v3306_v25, %v3221_v63  ;;  %v6801_v25 = vld [vmem:[%s9982_s7 + $0x1f8] sm:$0xf0]  ;;  %v6784_v63 = vor.u32 %v7602_v60, %v6783_v22  ;;  %v6761_v22 = vld [vmem:[%s9982_s7 + $0x1a8] sm:$0xf0] }
 0x44f   : > { %v6804_v1 = vor.u32 %v7605_v17, %v6801_v25  ;;  %v7564_v17 = vld [vmem:[%s9982_s7 + $0xa4] sm:$0xf0]  ;;  %v7563_v25 = vld [vmem:[%s9982_s7 + $0xa4] sm:$0xf] }
 0x450   : > { %v3444_v6 = vadd.f32 %v8750_v26, %v3316_v2  ;;  %v3222_v26 = vadd.f32 %v8737_v39, %v3119_v4  ;;  %v7603_v39 = vld [vmem:[%s9982_s7 + $0x1e4] sm:$0xf]  ;;  %v6788_v2 = vor.u32 %v7601_v29, %v6785_v32  ;;  %4445 = vmatpush.bf16.msra.mxu3 %v6784_v63  ;;  %v3633_v29 = vpop.f32.mrf.mxu2  ;;  %v6519_v32 = vld [vmem:[%s9982_s7 + $0x80] sm:$0xf] }
 0x451   : > { %4457 = vmatpush.bf16.msrb.mxu0 %v6804_v1  ;;  %v6796_v62 = vor.u32 %v7603_v39, %v6793_v49  ;;  %v6537_v1 = vld [vmem:[%s9982_s7 + $0xa8] sm:$0xf0]  ;;  %v6772_v39 = vor.u32 %v7597_v36, %v6769_v10  ;;  %v3538_v49 = vpop.f32.mrf.mxu1  ;;  %v7587_v36 = vld [vmem:[%s9982_s7 + $0x164] sm:$0xf] }
 0x452   : > { %v3543_v59 = vadd.f32 %v3533_v16, %v3444_v6  ;;  %v7565_v16 = vld [vmem:[%s9982_s7 + $0xb4] sm:$0xf]  ;;  %v6540_v14 = vor.u32 %v7563_v25, %v6537_v1  ;;  %v6713_v10 = vld [vmem:[%s9982_s7 + $0x168] sm:$0xf0] }
 0x453   : > { %v6548_v3 = vor.u32 %v7565_v16, %v6545_v48  ;;  %v6719_v48 = vld [vmem:[%s9982_s7 + $0x170] sm:$0xf] }
 0x454   : > { %v3638_v19 = vadd.f32 %v3628_v0, %v3543_v59  ;;  %4446 = vmatpush.bf16.msra.mxu3 %v6776_v53  ;;  %v3124_v0 = vadd.f32 %v8733_v15, %v8725_v47  ;;  %v7562_v59 = vld [vmem:[%s9982_s7 + $0x94] sm:$0xf0] }
 0x455   : > { %v8806_v8 = vpop.f32.mrf.mxu3  ;;  %4458 = vmatpush.bf16.msrb.mxu0 %v6796_v62  ;;  %4085 = vmatpush.bf16.msra.mxu2 %v6548_v3  ;;  %v7561_v62 = vld [vmem:[%s9982_s7 + $0x94] sm:$0xf]  ;;  %v7590_v53 = vld [vmem:[%s9982_s7 + $0x174] sm:$0xf0] }
 0x456   : > { %v3317_v56 = vadd.f32 %v8806_v8, %v3222_v26  ;;  %v6552_v8 = vor.u32 %v7568_v30, %v6551_v61  ;;  %v3224_v47 = vadd.f32 %v8755_v38, %v3124_v0  ;;  %v6529_v61 = vld [vmem:[%s9982_s7 + $0x98] sm:$0xf0]  ;;  %v6759_v30 = vld [vmem:[%s9982_s7 + $0x1a0] sm:$0xf]  ;;  %v7595_v38 = vld [vmem:[%s9982_s7 + $0x1a4] sm:$0xf] }
 0x457   : > { %v6760_v40 = vor.u32 %v7596_v55, %v6759_v30  ;;  %v6764_v63 = vor.u32 %v7595_v38, %v6761_v22 }
 0x458   : > { %v3445_v57 = vadd.f32 %v8781_v42, %v3317_v56  ;;  %4070 = vmatpush.bf16.msra.mxu1 %v6552_v8  ;;  %v7566_v42 = vld [vmem:[%s9982_s7 + $0xb4] sm:$0xf0]  ;;  %4447 = vmatpush.bf16.msra.mxu3 %v6768_v23  ;;  %v6532_v8 = vor.u32 %v7561_v62, %v6529_v61 }
 0x459   : > { %4459 = vmatpush.bf16.msrb.mxu0 %v6788_v2  ;;  %v6544_v46 = vor.u32 %v7566_v42, %v6543_v44  ;;  %4086 = vmatpush.bf16.msra.mxu2 %v6540_v14  ;;  %v7594_v44 = vld [vmem:[%s9982_s7 + $0x194] sm:$0xf0]  ;;  %v3540_v1 = vpop.f32.mrf.mxu1  ;;  %v7588_v14 = vld [vmem:[%s9982_s7 + $0x164] sm:$0xf0] }
 0x45a   : > { %v3544_v4 = vadd.f32 %v3535_v43, %v3445_v57  ;;  %v7560_v57 = vld [vmem:[%s9982_s7 + $0x84] sm:$0xf0] }
 0x45b   : > { %v6520_v2 = vor.u32 %v7560_v57, %v6519_v32  ;;  %v7583_v57 = vld [vmem:[%s9982_s7 + $0x144] sm:$0xf] }
 0x45c   : > { %4071 = vmatpush.bf16.msra.mxu1 %v6544_v46  ;;  %v3639_v50 = vadd.f32 %v3630_v33, %v3544_v4  ;;  %4448 = vmatpush.bf16.msra.mxu3 %v6760_v40  ;;  %v6753_v46 = vld [vmem:[%s9982_s7 + $0x198] sm:$0xf0]  ;;  %v6720_v4 = vor.u32 %v7590_v53, %v6719_v48  ;;  %v7592_v33 = vld [vmem:[%s9982_s7 + $0x184] sm:$0xf0]  ;;  %v6679_v53 = vld [vmem:[%s9982_s7 + $0x120] sm:$0xf] }
 0x45d   : > { %v8832_v52 = vpop.f32.mrf.mxu3  ;;  %4460 = vmatpush.bf16.msrb.mxu0 %v6780_v20  ;;  %4087 = vmatpush.bf16.msra.mxu2 %v6532_v8  ;;  %v6743_v20 = vld [vmem:[%s9982_s7 + $0x180] sm:$0xf]  ;;  %v7584_v40 = vld [vmem:[%s9982_s7 + $0x144] sm:$0xf0] }
 0x45e   : > { %v3318_v24 = vadd.f32 %v8832_v52, %v3223_v41  ;;  %v6535_v52 = vld [vmem:[%s9982_s7 + $0xa0] sm:$0xf]  ;;  %v6521_v41 = vld [vmem:[%s9982_s7 + $0x88] sm:$0xf0]  ;;  %v6744_v25 = vor.u32 %v7592_v33, %v6743_v20 }
 0x45f   : > { %v6536_v34 = vor.u32 %v7564_v17, %v6535_v52 }
 0x460   : > { %v3446_v26 = vadd.f32 %v8804_v11, %v3318_v24  ;;  %v6527_v11 = vld [vmem:[%s9982_s7 + $0x90] sm:$0xf] }
 0x461   : > { %4072 = vmatpush.bf16.msra.mxu1 %v6536_v34  ;;  %4461 = vmatpush.bf16.msrb.mxu0 %v6772_v39  ;;  %v6745_v34 = vld [vmem:[%s9982_s7 + $0x188] sm:$0xf0]  ;;  %v6716_v39 = vor.u32 %v7587_v36, %v6713_v10  ;;  %v6663_v36 = vld [vmem:[%s9982_s7 + $0x100] sm:$0xf] }
 0x462   : > { %v3545_v13 = vadd.f32 %v3538_v49, %v3446_v26  ;;  %v6711_v26 = vld [vmem:[%s9982_s7 + $0x160] sm:$0xf]  ;;  %v3635_v49 = vpop.f32.mrf.mxu2 }
 0x463   : > { %v6712_v23 = vor.u32 %v7588_v14, %v6711_v26  ;;  %v7637_v26 = vld [vmem:[%s9982_s7 + $0x2f4] sm:$0xf]  ;;  %v6961_v14 = vld [vmem:[%s9982_s7 + $0x2f8] sm:$0xf0] }
 0x464   : > { %v3640_v24 = vadd.f32 %v3633_v29, %v3545_v13 }
 0x465   : > { %v8892_v12 = vpop.f32.mrf.mxu3  ;;  %4462 = vmatpush.bf16.msrb.mxu0 %v6764_v63 }
 0x466   : > { %v3319_v60 = vadd.f32 %v8892_v12, %v3224_v47 }
 0x468   : > { %v3447_v31 = vadd.f32 %v8851_v37, %v3319_v60  ;;  %v6721_v37 = vld [vmem:[%s9982_s7 + $0x178] sm:$0xf0]  ;;  %v3862_v60 = vpop.f32.mrf.mxu0 }
 0x469   : > { %v6724_v17 = vor.u32 %v7589_v18, %v6721_v37  ;;  %v7580_v18 = vld [vmem:[%s9982_s7 + $0x124] sm:$0xf0] }
 0x46a   : > { %v6680_v37 = vor.u32 %v7580_v18, %v6679_v53  ;;  %v6919_v18 = vld [vmem:[%s9982_s7 + $0x2a0] sm:$0xf] }
 0x46d   : > { %v3756_v7 = vpop.f32.mrf.mxu3 }
 0x46e   : > { %v3766_v5 = vadd.f32 %v3756_v7, %v3638_v19  ;;  %v7559_v19 = vld [vmem:[%s9982_s7 + $0x84] sm:$0xf]  ;;  %v6751_v7 = vld [vmem:[%s9982_s7 + $0x190] sm:$0xf] }
 0x46f   : > { %v6524_v42 = vor.u32 %v7559_v19, %v6521_v41  ;;  %v6752_v16 = vor.u32 %v7594_v44, %v6751_v7  ;;  %v6697_v19 = vld [vmem:[%s9982_s7 + $0x148] sm:$0xf0]  ;;  %v6687_v7 = vld [vmem:[%s9982_s7 + $0x130] sm:$0xf]  ;;  %v7582_v44 = vld [vmem:[%s9982_s7 + $0x134] sm:$0xf0] }
 0x470   : > { %v3865_v51 = vadd.f32 %v3855_v27, %v3766_v5  ;;  %v6528_v27 = vor.u32 %v7562_v59, %v6527_v11  ;;  %v7593_v5 = vld [vmem:[%s9982_s7 + $0x194] sm:$0xf]  ;;  %v7586_v11 = vld [vmem:[%s9982_s7 + $0x154] sm:$0xf0] }
 0x471   : > { %v6756_v3 = vor.u32 %v7593_v5, %v6753_v46  ;;  %4088 = vmatpush.bf16.msra.mxu2 %v6524_v42  ;;  %4449 = vmatpush.bf16.msra.mxu3 %v6752_v16  ;;  %v7585_v59 = vld [vmem:[%s9982_s7 + $0x154] sm:$0xf]  ;;  %v6688_v16 = vor.u32 %v7582_v44, %v6687_v7  ;;  %v6935_v7 = vld [vmem:[%s9982_s7 + $0x2c0] sm:$0xf]  ;;  %v7632_v44 = vld [vmem:[%s9982_s7 + $0x2c4] sm:$0xf0] }
 0x472   : > { %v3873_v6 = vadd.f32 %v8948_v54, %v3865_v51  ;;  %4073 = vmatpush.bf16.msra.mxu1 %v6528_v27  ;;  %v6705_v27 = vld [vmem:[%s9982_s7 + $0x158] sm:$0xf0]  ;;  %v7581_v42 = vld [vmem:[%s9982_s7 + $0x134] sm:$0xf] }
 0x473   : > { %4463 = vmatpush.bf16.msrb.mxu0 %v6756_v3  ;;  %v6708_v8 = vor.u32 %v7585_v59, %v6705_v27  ;;  %v7635_v27 = vld [vmem:[%s9982_s7 + $0x2e4] sm:$0xf] }
 0x474   : > { %v3877_v45 = vmax.f32 %v3873_v6, 0.0  ;;  %v7591_v6 = vld [vmem:[%s9982_s7 + $0x184] sm:$0xf] }
 0x475   : > { %v3758_v56 = vpop.f32.mrf.mxu3  ;;  %v6748_v28 = vor.u32 %v7591_v6, %v6745_v34  ;;  %4323 = vmatpush.bf16.msrb.mxu2 %v6724_v17  ;;  %4450 = vmatpush.bf16.msra.mxu3 %v6744_v25  ;;  %v7578_v17 = vld [vmem:[%s9982_s7 + $0x114] sm:$0xf0]  ;;  %v7577_v6 = vld [vmem:[%s9982_s7 + $0x114] sm:$0xf]  ;;  %v6673_v34 = vld [vmem:[%s9982_s7 + $0x118] sm:$0xf0] }
 0x476   : > { %3881 = vst [vmem:[#allocation2] sm:$0xff] %v3877_v45  ;;  %v3767_v15 = vadd.f32 %v3758_v56, %v3639_v50  ;;  %4074 = vmatpush.bf16.msra.mxu1 %v6520_v2  ;;  %v6703_v56 = vld [vmem:[%s9982_s7 + $0x150] sm:$0xf] }
 0x477   : > { %4464 = vmatpush.bf16.msrb.mxu0 %v6748_v28  ;;  %v6959_v28 = vld [vmem:[%s9982_s7 + $0x2f0] sm:$0xf] }
 0x478   : > { %v3866_v43 = vadd.f32 %v3857_v35, %v3767_v15  ;;  %v3546_v35 = vadd.f32 %v3540_v1, %v3447_v31  ;;  %v6704_v15 = vor.u32 %v7586_v11, %v6703_v56  ;;  %v3906_v31 = vld [vmem:[#allocation5 + $0x4] sm:$0x3]  ;;  %v6665_v56 = vld [vmem:[%s9982_s7 + $0x108] sm:$0xf0] }
 0x479   : > { %4324 = vmatpush.bf16.msrb.mxu2 %v6716_v39  ;;  %v7576_v39 = vld [vmem:[%s9982_s7 + $0x104] sm:$0xf0] }
 0x47a   : > { %v3874_v12 = vadd.f32 %v8948_v54, %v3866_v43  ;;  %4309 = vmatpush.bf16.msrb.mxu1 %v6720_v4  ;;  %v3641_v47 = vadd.f32 %v3635_v49, %v3546_v35  ;;  %v6695_v43 = vld [vmem:[%s9982_s7 + $0x140] sm:$0xf]  ;;  %v7575_v49 = vld [vmem:[%s9982_s7 + $0x104] sm:$0xf] }
 0x47b   : > { %v6696_v32 = vor.u32 %v7584_v40, %v6695_v43  ;;  %v6943_v43 = vld [vmem:[%s9982_s7 + $0x2d0] sm:$0xf]  ;;  %v7634_v40 = vld [vmem:[%s9982_s7 + $0x2d4] sm:$0xf0] }
 0x47c   : > { %v3878_v9 = vmax.f32 %v3874_v12, 0.0  ;;  %v6700_v12 = vor.u32 %v7583_v57, %v6697_v19  ;;  %v3927_v19 = vld [vmem:[#allocation5 + $0x8] sm:$0x3] }
 0x47d   : > { %v3761_v51 = vpop.f32.mrf.mxu3  ;;  %v3885_v45 = vld [vmem:[#allocation2] ss:$2 sm:$0x3]  ;;  %v3886_v50 = vld [vmem:[#allocation2 + $0x1] ss:$2 sm:$0x3]  ;;  %4325 = vmatpush.bf16.msrb.mxu2 %v6708_v8 }
 0x47e   : > { %3882 = vst [vmem:[#allocation2 + $0x8] sm:$0xff] %v3878_v9  ;;  %v3768_v52 = vadd.f32 %v3761_v51, %v3640_v24  ;;  %4310 = vmatpush.bf16.msrb.mxu1 %v6712_v23  ;;  %v3891_v22 = vmax.f32 %v3885_v45, %v3886_v50  ;;  %v6681_v51 = vld [vmem:[%s9982_s7 + $0x128] sm:$0xf0]  ;;  %v6676_v23 = vor.u32 %v7577_v6, %v6673_v34 }
 0x480   : > { %v3867_v58 = vadd.f32 %v3860_v21, %v3768_v52  ;;  %v7579_v21 = vld [vmem:[%s9982_s7 + $0x124] sm:$0xf]  ;;  %v6671_v52 = vld [vmem:[%s9982_s7 + $0x110] sm:$0xf] }
 0x481   : > { %4326 = vmatpush.bf16.msrb.mxu2 %v6700_v12  ;;  %v6684_v20 = vor.u32 %v7579_v21, %v6681_v51  ;;  %v6672_v35 = vor.u32 %v7578_v17, %v6671_v52  ;;  %v7628_v21 = vld [vmem:[%s9982_s7 + $0x2a4] sm:$0xf0] }
 0x482   : > { %v3875_v0 = vadd.f32 %v8948_v54, %v3867_v58  ;;  %4311 = vmatpush.bf16.msrb.mxu1 %v6704_v15  ;;  %v7638_v58 = vld [vmem:[%s9982_s7 + $0x2f4] sm:$0xf0]  ;;  %v7636_v15 = vld [vmem:[%s9982_s7 + $0x2e4] sm:$0xf0]  ;;  %v6920_v6 = vor.u32 %v7628_v21, %v6919_v18  ;;  %v7617_v21 = vld [vmem:[%s9982_s7 + $0x254] sm:$0xf] }
 0x483   : > { %v6960_v59 = vor.u32 %v7638_v58, %v6959_v28  ;;  %v7626_v28 = vld [vmem:[%s9982_s7 + $0x294] sm:$0xf0]  ;;  %v7625_v58 = vld [vmem:[%s9982_s7 + $0x294] sm:$0xf] }
 0x484   : > { %v3879_v62 = vmax.f32 %v3875_v0, 0.0 }
 0x485   : > { %v3888_v61 = vld [vmem:[#allocation2 + $0x8] ss:$2 sm:$0x3]  ;;  %v3890_v30 = vld [vmem:[#allocation2 + $0x9] ss:$2 sm:$0x3]  ;;  %v3763_v13 = vpop.f32.mrf.mxu3 }
 0x486   : > { %v3892_v55 = vmax.f32 %v3888_v61, %v3890_v30  ;;  %3883 = vst [vmem:[#allocation2 + $0x10] sm:$0xff] %v3879_v62  ;;  %v3769_v38 = vadd.f32 %v3763_v13, %v3641_v47  ;;  %4312 = vmatpush.bf16.msrb.mxu1 %v6696_v32  ;;  %v6964_v62 = vor.u32 %v7637_v26, %v6961_v14  ;;  %v6951_v47 = vld [vmem:[%s9982_s7 + $0x2e0] sm:$0xf]  ;;  %v6953_v61 = vld [vmem:[%s9982_s7 + $0x2e8] sm:$0xf0] }
 0x487   : > { %v6664_v30 = vor.u32 %v7576_v39, %v6663_v36  ;;  %v6668_v13 = vor.u32 %v7575_v49, %v6665_v56  ;;  %v6913_v26 = vld [vmem:[%s9982_s7 + $0x298] sm:$0xf0]  ;;  %v6879_v36 = vld [vmem:[%s9982_s7 + $0x270] sm:$0xf]  ;;  %v6903_v49 = vld [vmem:[%s9982_s7 + $0x280] sm:$0xf] }
 0x488   : > { %v3868_v63 = vadd.f32 %v3862_v60, %v3769_v38  ;;  %v3893_v29 = vmax.f32 %v3891_v22, %v3892_v55  ;;  %v6952_v22 = vor.u32 %v7636_v15, %v6951_v47  ;;  %v6956_v60 = vor.u32 %v7635_v27, %v6953_v61  ;;  %v7624_v56 = vld [vmem:[%s9982_s7 + $0x284] sm:$0xf0]  ;;  %v6905_v27 = vld [vmem:[%s9982_s7 + $0x288] sm:$0xf0]  ;;  %v6871_v61 = vld [vmem:[%s9982_s7 + $0x260] sm:$0xf] }
 0x489   : > { %v6916_v15 = vor.u32 %v7625_v58, %v6913_v26  ;;  %v7665_v26 = vld [vmem:[%s9982_s7 + $0x3d4] sm:$0xf] }
 0x48a   : > { %v3876_v2 = vadd.f32 %v8948_v54, %v3868_v63  ;;  %v3894_v41 = vpack.c.bf16 %v3893_v29, %v3893_v29  ;;  %v6689_v54 = vld [vmem:[%s9982_s7 + $0x138] sm:$0xf0]  ;;  %4313 = vmatpush.bf16.msrb.mxu1 %v6688_v16  ;;  %v7633_v63 = vld [vmem:[%s9982_s7 + $0x2d4] sm:$0xf]  ;;  %v6937_v16 = vld [vmem:[%s9982_s7 + $0x2c8] sm:$0xf0] }
 0x48b   : > { %v6692_v48 = vor.u32 %v7581_v42, %v6689_v54  ;;  %v6945_v29 = vld [vmem:[%s9982_s7 + $0x2d8] sm:$0xf0]  ;;  %v7631_v42 = vld [vmem:[%s9982_s7 + $0x2c4] sm:$0xf] }
 0x48c   : > { %v3880_v5 = vmax.f32 %v3876_v2, 0.0  ;;  %v3896_v46 = vshrl.u32 %v3894_v41, 16  ;;  %v3899_v24 = vshll.u32 %v3894_v41, 16  ;;  %v6944_v2 = vor.u32 %v7634_v40, %v6943_v43  ;;  %v7670_v40 = vld [vmem:[%s9982_s7 + $0x3f4] sm:$0xf0] }
 0x48d   : > { %4327 = vmatpush.bf16.msrb.mxu2 %v6692_v48  ;;  %v3909_v33 = vld [vmem:[#allocation2 + $0x10] ss:$2 sm:$0x3]  ;;  %v3910_v1 = vld [vmem:[#allocation2 + $0x11] ss:$2 sm:$0x3]  ;;  %v6948_v41 = vor.u32 %v7633_v63, %v6945_v29 }
 0x48e   : > { %3884 = vst [vmem:[#allocation2 + $0x18] sm:$0xff] %v3880_v5  ;;  %v3898_v9 = vrot.slane %v3896_v46, 7  ;;  %4314 = vmatpush.bf16.msrb.mxu1 %v6680_v37  ;;  %v3915_v45 = vmax.f32 %v3909_v33, %v3910_v1  ;;  %v6936_v5 = vor.u32 %v7632_v44, %v6935_v7  ;;  %v6940_v46 = vor.u32 %v7631_v42, %v6937_v16  ;;  %v6927_v48 = vld [vmem:[%s9982_s7 + $0x2b0] sm:$0xf]  ;;  %v6921_v37 = vld [vmem:[%s9982_s7 + $0x2a8] sm:$0xf0] }
 0x48f   : > { %v6911_v1 = vld [vmem:[%s9982_s7 + $0x290] sm:$0xf]  ;;  %v7669_v63 = vld [vmem:[%s9982_s7 + $0x3f4] sm:$0xf]  ;;  %v7121_v29 = vld [vmem:[%s9982_s7 + $0x3f8] sm:$0xf0] }
 0x490   : > { %v3901_v4 = vor.u32 %v3899_v24, %v3898_v9  ;;  %v7629_v9 = vld [vmem:[%s9982_s7 + $0x2b4] sm:$0xf]  ;;  %v6929_v24 = vld [vmem:[%s9982_s7 + $0x2b8] sm:$0xf0]  ;;  %v6912_v47 = vor.u32 %v7626_v28, %v6911_v1  ;;  %v7666_v1 = vld [vmem:[%s9982_s7 + $0x3d4] sm:$0xf0] }
 0x491   : > { %4328 = vmatpush.bf16.msrb.mxu2 %v6684_v20  ;;  %v6932_v53 = vor.u32 %v7629_v9, %v6929_v24  ;;  %v7668_v9 = vld [vmem:[%s9982_s7 + $0x3e4] sm:$0xf0]  ;;  %v7667_v24 = vld [vmem:[%s9982_s7 + $0x3e4] sm:$0xf] }
 0x492   : > { %v3907_v25 = vsel %vm9131_vm13, %v3901_v4, %v3906_v31  ;;  %4315 = vmatpush.bf16.msrb.mxu1 %v6672_v35  ;;  %v7630_v31 = vld [vmem:[%s9982_s7 + $0x2b4] sm:$0xf0]  ;;  %v7627_v4 = vld [vmem:[%s9982_s7 + $0x2a4] sm:$0xf] }
 0x493   : > { %3908 = vst [vmem:[#allocation5 + $0x4] sm:$0x3] %v3907_v25  ;;  %v6928_v3 = vor.u32 %v7630_v31, %v6927_v48  ;;  %v6924_v34 = vor.u32 %v7627_v4, %v6921_v37  ;;  %v7111_v48 = vld [vmem:[%s9982_s7 + $0x3e0] sm:$0xf]  ;;  %v4204_v4 = vld [vmem:[#allocation5] sm:$0xe] }
 0x494   : > { %v6855_v37 = vld [vmem:[%s9982_s7 + $0x240] sm:$0xf] }
 0x495   : > { %v3912_v10 = vld [vmem:[#allocation2 + $0x18] ss:$2 sm:$0x3]  ;;  %v3914_v0 = vld [vmem:[#allocation2 + $0x19] ss:$2 sm:$0x3]  ;;  %4329 = vmatpush.bf16.msrb.mxu2 %v6676_v23 }
 0x496   : > { %v3916_v50 = vmax.f32 %v3912_v10, %v3914_v0  ;;  %4316 = vmatpush.bf16.msrb.mxu1 %v6664_v30  ;;  %v7622_v10 = vld [vmem:[%s9982_s7 + $0x274] sm:$0xf0]  ;;  %v7621_v0 = vld [vmem:[%s9982_s7 + $0x274] sm:$0xf]  ;;  %v7620_v30 = vld [vmem:[%s9982_s7 + $0x264] sm:$0xf0] }
 0x497   : > { %v6872_v42 = vor.u32 %v7620_v30, %v6871_v61  ;;  %v7663_v30 = vld [vmem:[%s9982_s7 + $0x3c4] sm:$0xf] }
 0x498   : > { %v3917_v11 = vmax.f32 %v3915_v45, %v3916_v50  ;;  %v6881_v45 = vld [vmem:[%s9982_s7 + $0x278] sm:$0xf0] }
 0x499   : > { %4330 = vmatpush.bf16.msrb.mxu2 %v6668_v13  ;;  %v6884_v43 = vor.u32 %v7621_v0, %v6881_v45  ;;  %v6857_v0 = vld [vmem:[%s9982_s7 + $0x248] sm:$0xf0] }
 0x49a   : > { %v3918_v8 = vpack.c.bf16 %v3917_v11, %v3917_v11  ;;  %v9197_v55 = vld [vmem:[#allocation5] sm:$0xff]   ;;  %v7623_v11 = vld [vmem:[%s9982_s7 + $0x284] sm:$0xf] }
 0x49b   : > { %4184 = vmatmul.bf16.vlgmr.msrb.gmra.mxu3 %v9197_v55  ;;  %4198 = vmatmul.bf16.vlgmr.msra.gmra.mxu0 %v9197_v55  ;;  %v3977_v51 = vshll.u32 %v9197_v55, 16  ;;  %v7750_v52 = vunpack.c.h.b16 %v9197_v55  ;;  %v3975_v50 = vshrl.u32 %v9197_v55, 16  ;;  %v6908_v7 = vor.u32 %v7623_v11, %v6905_v27  ;;  %v6849_v27 = vld [vmem:[%s9982_s7 + $0x238] sm:$0xf0]  ;;  %v7095_v55 = vld [vmem:[%s9982_s7 + $0x3c0] sm:$0xf] }
 0x49c   : > { %v3920_v38 = vshrl.u32 %v3918_v8, 16  ;;  %4733 = vmatpush.bf16.msrb.mxu3 %v6960_v59  ;;  %4747 = vmatpush.bf16.msra.mxu0 %v6964_v62  ;;  %v3923_v57 = vshll.u32 %v3918_v8, 16  ;;  %v4477_v62 = vld [vmem:[#allocation5 + $0xc] sm:$0x1] }
 0x49d   : > { %v3979_v23 = vrot.slane %v3977_v51, 1  ;;  %v6865_v51 = vld [vmem:[%s9982_s7 + $0x258] sm:$0xf0] }
 0x49e   : > { %v3922_v32 = vrot.slane %v3920_v38, 7  ;;  %v7119_v38 = vld [vmem:[%s9982_s7 + $0x3f0] sm:$0xf]  ;;  %v6868_v28 = vor.u32 %v7617_v21, %v6865_v51  ;;  %v7081_v21 = vld [vmem:[%s9982_s7 + $0x3a8] sm:$0xf0] }
 0x49f   : > { %v3980_v13 = vor.u32 %v3979_v23, %v3975_v50  ;;  %v7120_v16 = vor.u32 %v7670_v40, %v7119_v38  ;;  %v7105_v23 = vld [vmem:[%s9982_s7 + $0x3d8] sm:$0xf0]  ;;  %v6839_v38 = vld [vmem:[%s9982_s7 + $0x220] sm:$0xf] }
 0x4a0   : > { %v3925_v12 = vor.u32 %v3923_v57, %v3922_v32  ;;  %4734 = vmatpush.bf16.msrb.mxu3 %v6952_v22  ;;  %4748 = vmatpush.bf16.msra.mxu0 %v6956_v60  ;;  %v4628_v22 = vld [vmem:[#allocation5 + $0x4] sm:$0xe]  ;;  %v6880_v60 = vor.u32 %v7622_v10, %v6879_v36  ;;  %v4500_v57 = vunpack.c.l.b16 %v4477_v62  ;;  %v4223_v36 = vunpack.c.l.b16 %v4204_v4  ;;  %v7615_v10 = vld [vmem:[%s9982_s7 + $0x244] sm:$0xf]  ;;  %v6847_v62 = vld [vmem:[%s9982_s7 + $0x230] sm:$0xf] }
 0x4a1   : > { %v4647_v44 = vunpack.c.l.b16 %v4628_v22  ;;  %v4901_v40 = vld [vmem:[#allocation5 + $0x10] sm:$0x1] }
 0x4a2   : > { %v3928_v54 = vsel %vm9131_vm13, %v3925_v12, %v3927_v19  ;;  %v7619_v12 = vld [vmem:[%s9982_s7 + $0x264] sm:$0xf]  ;;  %v4224_v11 = vpack.c.b16 %v7750_v52, %v4223_v36  ;;  %v6823_v4 = vld [vmem:[%s9982_s7 + $0x200] sm:$0xf] }
 0x4a3   : > { %3929 = vst [vmem:[#allocation5 + $0x8] sm:$0x3] %v3928_v54  ;;  %v7124_v54 = vor.u32 %v7669_v63, %v7121_v29 }
 0x4a4   : > { %4735 = vmatpush.bf16.msrb.mxu3 %v6944_v2  ;;  %4749 = vmatpush.bf16.msra.mxu0 %v6948_v41  ;;  %v6873_v2 = vld [vmem:[%s9982_s7 + $0x268] sm:$0xf0]  ;;  %v6904_v41 = vor.u32 %v7624_v56, %v6903_v49  ;;  %v6860_v56 = vor.u32 %v7615_v10, %v6857_v0  ;;  %v4225_v22 = vrot.slane %v4224_v11, 1  ;;  %v7039_v10 = vld [vmem:[%s9982_s7 + $0x370] sm:$0xf] }
 0x4a5   : > { %v6876_v31 = vor.u32 %v7619_v12, %v6873_v2  ;;  %v7662_v2 = vld [vmem:[%s9982_s7 + $0x3b4] sm:$0xf0] }
 0x4a6   : > { %v7654_v0 = vld [vmem:[%s9982_s7 + $0x374] sm:$0xf0] }
 0x4a8   : > { %4736 = vmatpush.bf16.msrb.mxu3 %v6936_v5  ;;  %4750 = vmatpush.bf16.msra.mxu0 %v6940_v46  ;;  %v6863_v5 = vld [vmem:[%s9982_s7 + $0x250] sm:$0xf]  ;;  %v7618_v46 = vld [vmem:[%s9982_s7 + $0x254] sm:$0xf0] }
 0x4aa   : > { %v9252_v20 = vld [vmem:[#allocation5 + $0x4] sm:$0xff]  }
 0x4ab   : > { %v3948_v33 = vld [vmem:[#allocation5 + $0x8] sm:$0x1]  ;;  %v4360_v17 = vunpack.c.h.b16 %v9252_v20 }
 0x4ac   : > { %v3971_v25 = vunpack.c.l.b16 %v3948_v33  ;;  %4737 = vmatpush.bf16.msrb.mxu3 %v6928_v3  ;;  %4751 = vmatpush.bf16.msra.mxu0 %v6932_v53  ;;  %v9295_v59 = vld [vmem:[#allocation5 + $0x8] sm:$0xff]   ;;  %v7113_v3 = vld [vmem:[%s9982_s7 + $0x3e8] sm:$0xf0]  ;;  %v9344_v53 = vpack.c.b16 %v4500_v57, %v4500_v57  ;;  %v6864_v33 = vor.u32 %v7618_v46, %v6863_v5  ;;  %v7609_v46 = vld [vmem:[%s9982_s7 + $0x214] sm:$0xf] }
 0x4ad   : > { %v4361_v35 = vpack.c.b16 %v4360_v17, %v7750_v52  ;;  %v4499_v32 = vunpack.c.l.b16 %v9295_v59  ;;  %v7112_v17 = vor.u32 %v7668_v9, %v7111_v48  ;;  %v7664_v52 = vld [vmem:[%s9982_s7 + $0x3c4] sm:$0xf0]  ;;  %v6841_v57 = vld [vmem:[%s9982_s7 + $0x228] sm:$0xf0]  ;;  %v7610_v5 = vld [vmem:[%s9982_s7 + $0x214] sm:$0xf0] }
 0x4ae   : > { %v9270_v14 = vpack.c.b16 %v3971_v25, %v3971_v25  ;;  %v7116_v25 = vor.u32 %v7667_v24, %v7113_v3  ;;  %v7096_v63 = vor.u32 %v7664_v52, %v7095_v55  ;;  %v7079_v9 = vld [vmem:[%s9982_s7 + $0x3a0] sm:$0xf]  ;;  %v7660_v24 = vld [vmem:[%s9982_s7 + $0x3a4] sm:$0xf0]  ;;  %v4924_v3 = vunpack.c.l.b16 %v4901_v40  ;;  %v7033_v40 = vld [vmem:[%s9982_s7 + $0x368] sm:$0xf0] }
 0x4af   : > { %4451 = vmatmul.bf16.vlgmr.msra.gmra.mxu3 %v4361_v35  ;;  %4465 = vmatmul.bf16.vlgmr.msrb.gmra.mxu0 %v4361_v35  ;;  %v4648_v18 = vpack.c.b16 %v4499_v32, %v4647_v44  ;;  %v4650_v35 = vrot.slane %v9344_v53, 1  ;;  %v7656_v52 = vld [vmem:[%s9982_s7 + $0x384] sm:$0xf0] }
 0x4b0   : > { %v3982_v39 = vshll.u32 %v9270_v14, 16  ;;  %4738 = vmatpush.bf16.msrb.mxu3 %v6920_v6  ;;  %4752 = vmatpush.bf16.msra.mxu0 %v6924_v34  ;;  %v7616_v6 = vld [vmem:[%s9982_s7 + $0x244] sm:$0xf0]  ;;  %v7103_v34 = vld [vmem:[%s9982_s7 + $0x3d0] sm:$0xf]  ;;  %v4226_v61 = vrot.slane %v9270_v14, 1  ;;  %v9487_v36 = vpack.c.b16 %v4924_v3, %v4924_v3 }
 0x4b1   : > { %v4649_v58 = vrot.slane %v4648_v18, 1  ;;  %v6856_v45 = vor.u32 %v7616_v6, %v6855_v37  ;;  %v7104_v50 = vor.u32 %v7666_v1, %v7103_v34  ;;  %v7659_v18 = vld [vmem:[%s9982_s7 + $0x3a4] sm:$0xf]  ;;  %v7608_v37 = vld [vmem:[%s9982_s7 + $0x204] sm:$0xf0] }
 0x4b2   : > { %v3984_v8 = vrot.slane %v3982_v39, 1  ;;  %v7108_v39 = vor.u32 %v7665_v26, %v7105_v23  ;;  %v4227_v12 = vsel %vm1409_vm6, %v4225_v22, %v4226_v61  ;;  %v7607_v34 = vld [vmem:[%s9982_s7 + $0x204] sm:$0xf]  ;;  %v6825_v1 = vld [vmem:[%s9982_s7 + $0x208] sm:$0xf0] }
 0x4b3   : > { %v4651_v49 = vsel %vm1409_vm6, %v4649_v58, %v4650_v35  ;;  %v7084_v58 = vor.u32 %v7659_v18, %v7081_v21  ;;  %v7658_v35 = vld [vmem:[%s9982_s7 + $0x394] sm:$0xf0]  ;;  %v7657_v26 = vld [vmem:[%s9982_s7 + $0x394] sm:$0xf]  ;;  %v7073_v23 = vld [vmem:[%s9982_s7 + $0x398] sm:$0xf0]  ;;  %v6828_v11 = vor.u32 %v7607_v34, %v6825_v1 }
 0x4b4   : > { %v3985_v19 = vsel %vm1109_vm7, %v3980_v13, %v3984_v8  ;;  %4739 = vmatpush.bf16.msrb.mxu3 %v6912_v47  ;;  %4753 = vmatpush.bf16.msra.mxu0 %v6916_v15  ;;  %v7614_v47 = vld [vmem:[%s9982_s7 + $0x234] sm:$0xf0]  ;;  %v7613_v15 = vld [vmem:[%s9982_s7 + $0x234] sm:$0xf]  ;;  %v7097_v13 = vld [vmem:[%s9982_s7 + $0x3c8] sm:$0xf0]  ;;  %v4498_v8 = vunpack.c.l.b16 %v9252_v20 }
 0x4b5   : > { %4075 = vmatmul.bf16.vlgmr.msra.gmra.mxu1 %v3985_v19  ;;  %4089 = vmatmul.bf16.vlgmr.msra.gmra.mxu2 %v3985_v19  ;;  %v6848_v14 = vor.u32 %v7614_v47, %v6847_v62  ;;  %v7100_v29 = vor.u32 %v7663_v30, %v7097_v13  ;;  %v7611_v20 = vld [vmem:[%s9982_s7 + $0x224] sm:$0xf]  ;;  %v7087_v19 = vld [vmem:[%s9982_s7 + $0x3b0] sm:$0xf]  ;;  %v7063_v47 = vld [vmem:[%s9982_s7 + $0x380] sm:$0xf]  ;;  %v7040_v13 = vor.u32 %v7654_v0, %v7039_v10 }
 0x4b6   : > { %4596 = vmatpush.bf16.msra.mxu1 %v6880_v60  ;;  %4610 = vmatpush.bf16.msra.mxu2 %v6884_v43  ;;  %v6852_v60 = vor.u32 %v7613_v15, %v6849_v27  ;;  %v7612_v43 = vld [vmem:[%s9982_s7 + $0x224] sm:$0xf0]  ;;  %v9435_v44 = vpack.c.b16 %v4499_v32, %v4498_v8  ;;  %v7088_v32 = vor.u32 %v7662_v2, %v7087_v19  ;;  %v7655_v61 = vld [vmem:[%s9982_s7 + $0x384] sm:$0xf]  ;;  %v4935_v30 = vshll.u32 %v9487_v36, 16 }
 0x4b7   : > { %v7076_v27 = vor.u32 %v7657_v26, %v7073_v23  ;;  %v7065_v22 = vld [vmem:[%s9982_s7 + $0x388] sm:$0xf0]  ;;  %v7007_v21 = vld [vmem:[%s9982_s7 + $0x330] sm:$0xf]  ;;  %v7643_v34 = vld [vmem:[%s9982_s7 + $0x324] sm:$0xf] }
 0x4b8   : > { %4740 = vmatpush.bf16.msrb.mxu3 %v6904_v41  ;;  %4754 = vmatpush.bf16.msra.mxu0 %v6908_v7  ;;  %v7661_v41 = vld [vmem:[%s9982_s7 + $0x3b4] sm:$0xf]  ;;  %v7089_v7 = vld [vmem:[%s9982_s7 + $0x3b8] sm:$0xf0]  ;;  %v4506_v51 = vshll.u32 %v9435_v44, 16  ;;  %v4504_v62 = vshrl.u32 %v9435_v44, 16 }
 0x4b9   : > { %v7092_v48 = vor.u32 %v7661_v41, %v7089_v7  ;;  %v4937_v41 = vrot.slane %v4935_v30, 1  ;;  %v7023_v7 = vld [vmem:[%s9982_s7 + $0x350] sm:$0xf]  ;;  %v7001_v1 = vld [vmem:[%s9982_s7 + $0x328] sm:$0xf0] }
 0x4ba   : > { %4597 = vmatpush.bf16.msra.mxu1 %v6872_v42  ;;  %4611 = vmatpush.bf16.msra.mxu2 %v6876_v31  ;;  %v6840_v42 = vor.u32 %v7612_v43, %v6839_v38  ;;  %v6833_v31 = vld [vmem:[%s9982_s7 + $0x218] sm:$0xf0]  ;;  %v7651_v43 = vld [vmem:[%s9982_s7 + $0x364] sm:$0xf]  ;;  %v7641_v26 = vld [vmem:[%s9982_s7 + $0x314] sm:$0xf] }
 0x4bb   : > { %v6836_v6 = vor.u32 %v7609_v46, %v6833_v31  ;;  %v7036_v2 = vor.u32 %v7651_v43, %v7033_v40  ;;  %v7648_v31 = vld [vmem:[%s9982_s7 + $0x344] sm:$0xf0]  ;;  %v6993_v23 = vld [vmem:[%s9982_s7 + $0x318] sm:$0xf0]  ;;  %v7681_v43 = vld [vmem:[%s9982_s7 + $0x454] sm:$0xf] }
 0x4bc   : > { %5020 = vmatpush.bf16.msra.mxu3 %v7120_v16  ;;  %5034 = vmatpush.bf16.msrb.mxu0 %v7124_v54  ;;  %v6844_v16 = vor.u32 %v7611_v20, %v6841_v57  ;;  %v6831_v54 = vld [vmem:[%s9982_s7 + $0x210] sm:$0xf]  ;;  %v7068_v20 = vor.u32 %v7655_v61, %v7065_v22  ;;  %v6996_v0 = vor.u32 %v7641_v26, %v6993_v23  ;;  %v7191_v61 = vld [vmem:[%s9982_s7 + $0x460] sm:$0xf]  ;;  %v7684_v30 = vld [vmem:[%s9982_s7 + $0x464] sm:$0xf0] }
 0x4bd   : > { %v7185_v40 = vld [vmem:[%s9982_s7 + $0x458] sm:$0xf0] }
 0x4be   : > { %4598 = vmatpush.bf16.msra.mxu1 %v6864_v33  ;;  %4612 = vmatpush.bf16.msra.mxu2 %v6868_v28  ;;  %v4511_v33 = vshll.u32 %v9344_v53, 16  ;;  %v7071_v28 = vld [vmem:[%s9982_s7 + $0x390] sm:$0xf]  ;;  %v7080_v53 = vor.u32 %v7660_v24, %v7079_v9  ;;  %v7647_v9 = vld [vmem:[%s9982_s7 + $0x344] sm:$0xf] }
 0x4bf   : > { %4741 = vmatmul.bf16.vlgmr.msrb.gmra.mxu3 %v4651_v49  ;;  %4755 = vmatmul.bf16.vlgmr.msra.gmra.mxu0 %v4651_v49  ;;  %v7072_v15 = vor.u32 %v7658_v35, %v7071_v28  ;;  %v7017_v24 = vld [vmem:[%s9982_s7 + $0x348] sm:$0xf0]  ;;  %v7642_v35 = vld [vmem:[%s9982_s7 + $0x314] sm:$0xf0] }
 0x4c0   : > { %5021 = vmatpush.bf16.msra.mxu3 %v7112_v17  ;;  %5035 = vmatpush.bf16.msrb.mxu0 %v7116_v25  ;;  %v7777_v17 = vld [vmem:[#allocation5 + $0x8] sm:$0xff]   ;;  %v6832_v25 = vor.u32 %v7610_v5, %v6831_v54  ;;  %v4513_v55 = vrot.slane %v4511_v33, 1  ;;  %v7020_v18 = vor.u32 %v7647_v9, %v7017_v24  ;;  %v7151_v24 = vld [vmem:[%s9982_s7 + $0x410] sm:$0xf] }
 0x4c1   : > { %v4930_v49 = vshll.u32 %v7777_v17, 16  ;;  %v4928_v57 = vshrl.u32 %v7777_v17, 16  ;;  %v7025_v54 = vld [vmem:[%s9982_s7 + $0x358] sm:$0xf0] }
 0x4c2   : > { %4599 = vmatpush.bf16.msra.mxu1 %v6856_v45  ;;  %4613 = vmatpush.bf16.msra.mxu2 %v6860_v56  ;;  %v4508_v45 = vrot.slane %v4506_v51, 1  ;;  %v6824_v56 = vor.u32 %v7608_v37, %v6823_v4  ;;  %v7646_v51 = vld [vmem:[%s9982_s7 + $0x334] sm:$0xf0]  ;;  %v7645_v4 = vld [vmem:[%s9982_s7 + $0x334] sm:$0xf] }
 0x4c3   : > { %v7009_v37 = vld [vmem:[%s9982_s7 + $0x338] sm:$0xf0]  ;;  %v7008_v33 = vor.u32 %v7646_v51, %v7007_v21 }
 0x4c4   : > { %5022 = vmatpush.bf16.msra.mxu3 %v7104_v50  ;;  %5036 = vmatpush.bf16.msrb.mxu0 %v7108_v39  ;;  %v7653_v50 = vld [vmem:[%s9982_s7 + $0x374] sm:$0xf]  ;;  %v7041_v39 = vld [vmem:[%s9982_s7 + $0x378] sm:$0xf0]  ;;  %v4509_v38 = vor.u32 %v4508_v45, %v4504_v62  ;;  %v7012_v17 = vor.u32 %v7645_v4, %v7009_v37  ;;  %v6983_v45 = vld [vmem:[%s9982_s7 + $0x300] sm:$0xf] }
 0x4c5   : > { %4317 = vmatmul.bf16.vlgmr.msrb.gmra.mxu1 %v4227_v12  ;;  %4331 = vmatmul.bf16.vlgmr.msrb.gmra.mxu2 %v4227_v12  ;;  %v7044_v8 = vor.u32 %v7653_v50, %v7041_v39  ;;  %v7640_v50 = vld [vmem:[%s9982_s7 + $0x304] sm:$0xf0]  ;;  %v7639_v39 = vld [vmem:[%s9982_s7 + $0x304] sm:$0xf]  ;;  %v7685_v62 = vld [vmem:[%s9982_s7 + $0x474] sm:$0xf] }
 0x4c6   : > { %4600 = vmatpush.bf16.msra.mxu1 %v6848_v14  ;;  %4614 = vmatpush.bf16.msra.mxu2 %v6852_v60  ;;  %v7031_v14 = vld [vmem:[%s9982_s7 + $0x360] sm:$0xf]  ;;  %v7652_v60 = vld [vmem:[%s9982_s7 + $0x364] sm:$0xf0]  ;;  %v4514_v19 = vsel %vm1109_vm7, %v4509_v38, %v4513_v55  ;;  %v7192_v38 = vor.u32 %v7684_v30, %v7191_v61  ;;  %v7153_v21 = vld [vmem:[%s9982_s7 + $0x418] sm:$0xf0] }
 0x4c7   : > { %v7032_v12 = vor.u32 %v7652_v60, %v7031_v14  ;;  %v7183_v14 = vld [vmem:[%s9982_s7 + $0x450] sm:$0xf]  ;;  %v7682_v60 = vld [vmem:[%s9982_s7 + $0x454] sm:$0xf0]  ;;  %v7778_v51 = vld [vmem:[#allocation5 + $0x8] sm:$0xf0] }
 0x4c8   : > { %5023 = vmatpush.bf16.msra.mxu3 %v7096_v63  ;;  %5037 = vmatpush.bf16.msrb.mxu0 %v7100_v29  ;;  %v4932_v63 = vrot.slane %v4930_v49, 1  ;;  %v7064_v29 = vor.u32 %v7656_v52, %v7063_v47  ;;  %v6985_v49 = vld [vmem:[%s9982_s7 + $0x308] sm:$0xf0]  ;;  %v7201_v47 = vld [vmem:[%s9982_s7 + $0x478] sm:$0xf0] }
 0x4c9   : > { %v7204_v52 = vor.u32 %v7685_v62, %v7201_v47  ;;  %v7779_v4 = vld [vmem:[#allocation5 + $0x8] sm:$0xe]  ;;  %v7263_v62 = vld [vmem:[%s9984_s9 + $0x70] sm:$0xf]  ;;  %v7700_v61 = vld [vmem:[%s9984_s9 + $0x64] sm:$0xf0] }
 0x4ca   : > { %4601 = vmatpush.bf16.msra.mxu1 %v6840_v42  ;;  %4615 = vmatpush.bf16.msra.mxu2 %v6844_v16  ;;  %v4933_v44 = vor.u32 %v4932_v63, %v4928_v57  ;;  %v7650_v42 = vld [vmem:[%s9982_s7 + $0x354] sm:$0xf0]  ;;  %v7649_v16 = vld [vmem:[%s9982_s7 + $0x354] sm:$0xf]  ;;  %v7184_v63 = vor.u32 %v7682_v60, %v7183_v14  ;;  %v7680_v57 = vld [vmem:[%s9982_s7 + $0x444] sm:$0xf0] }
 0x4cb   : > { %v7024_v5 = vor.u32 %v7650_v42, %v7023_v7  ;;  %v7028_v46 = vor.u32 %v7649_v16, %v7025_v54  ;;  %v7678_v7 = vld [vmem:[%s9982_s7 + $0x434] sm:$0xf0]  ;;  %v7169_v42 = vld [vmem:[%s9982_s7 + $0x438] sm:$0xf0] }
 0x4cc   : > { %5024 = vmatpush.bf16.msra.mxu3 %v7088_v32  ;;  %5038 = vmatpush.bf16.msrb.mxu0 %v7092_v48  ;;  %v7015_v32 = vld [vmem:[%s9982_s7 + $0x340] sm:$0xf]  ;;  %v4938_v48 = vsel %vm1109_vm7, %v4933_v44, %v4937_v41  ;;  %v7167_v41 = vld [vmem:[%s9982_s7 + $0x430] sm:$0xf]  ;;  %v7677_v44 = vld [vmem:[%s9982_s7 + $0x434] sm:$0xf] }
 0x4cd   : > { %v7016_v3 = vor.u32 %v7648_v31, %v7015_v32  ;;  %v7168_v16 = vor.u32 %v7678_v7, %v7167_v41  ;;  %v7172_v54 = vor.u32 %v7677_v44, %v7169_v42  ;;  %v7675_v32 = vld [vmem:[%s9982_s7 + $0x424] sm:$0xf]  ;;  %v7702_v47 = vld [vmem:[%s9984_s9 + $0x74] sm:$0xf0]  ;;  %v7319_v41 = vld [vmem:[%s9984_s9 + $0xe0] sm:$0xf] }
 0x4ce   : > { %4602 = vmatpush.bf16.msra.mxu1 %v6832_v25  ;;  %4616 = vmatpush.bf16.msra.mxu2 %v6836_v6  ;;  %v6999_v25 = vld [vmem:[%s9982_s7 + $0x320] sm:$0xf]  ;;  %v7644_v6 = vld [vmem:[%s9982_s7 + $0x324] sm:$0xf0]  ;;  %v7718_v60 = vld [vmem:[%s9984_s9 + $0xf4] sm:$0xf0] }
 0x4cf   : > { %v7000_v28 = vor.u32 %v7644_v6, %v6999_v25  ;;  %v7672_v25 = vld [vmem:[%s9982_s7 + $0x404] sm:$0xf0]  ;;  %v7671_v6 = vld [vmem:[%s9982_s7 + $0x404] sm:$0xf] }
 0x4d0   : > { %5025 = vmatpush.bf16.msra.mxu3 %v7080_v53  ;;  %5039 = vmatpush.bf16.msrb.mxu0 %v7084_v58  ;;  %v7004_v53 = vor.u32 %v7643_v34, %v7001_v1  ;;  %v6991_v58 = vld [vmem:[%s9982_s7 + $0x310] sm:$0xf]  ;;  %v7145_v34 = vld [vmem:[%s9982_s7 + $0x408] sm:$0xf0]  ;;  %v7780_v1 = vor.u32 %v7779_v4, %v7778_v51  ;;  %v7716_v7 = vld [vmem:[%s9984_s9 + $0xe4] sm:$0xf0] }
 0x4d1   : > { %v6992_v10 = vor.u32 %v7642_v35, %v6991_v58  ;;  %v5074_v35 = vrot.slane %v9487_v36, 1  ;;  %v7320_v42 = vor.u32 %v7716_v7, %v7319_v41  ;;  %v7297_v7 = vld [vmem:[%s9984_s9 + $0xb8] sm:$0xf0] }
 0x4d2   : > { %4603 = vmatpush.bf16.msra.mxu1 %v6824_v56  ;;  %4617 = vmatpush.bf16.msra.mxu2 %v6828_v11  ;;  %v7199_v56 = vld [vmem:[%s9982_s7 + $0x470] sm:$0xf]  ;;  %v7686_v11 = vld [vmem:[%s9982_s7 + $0x474] sm:$0xf0]  ;;  %v5073_v58 = vrot.slane %v7780_v1, 1 }
 0x4d3   : > { %v7200_v55 = vor.u32 %v7686_v11, %v7199_v56 }
 0x4d4   : > { %5026 = vmatpush.bf16.msra.mxu3 %v7072_v15  ;;  %5040 = vmatpush.bf16.msrb.mxu0 %v7076_v27  ;;  %v6984_v15 = vor.u32 %v7640_v50, %v6983_v45  ;;  %v6988_v27 = vor.u32 %v7639_v39, %v6985_v49  ;;  %v5075_v26 = vsel %vm1409_vm6, %v5073_v58, %v5074_v35  ;;  %v7694_v58 = vld [vmem:[%s9984_s9 + $0x34] sm:$0xf0] }
 0x4d5   : > { %4604 = vmatmul.bf16.vlgmr.msra.gmra.mxu1 %v4514_v19  ;;  %4618 = vmatmul.bf16.vlgmr.msra.gmra.mxu2 %v4514_v19  ;;  %v7679_v19 = vld [vmem:[%s9982_s7 + $0x444] sm:$0xf] }
 0x4d6   : > { %4867 = vmatpush.bf16.msrb.mxu1 %v7040_v13  ;;  %4881 = vmatpush.bf16.msrb.mxu2 %v7044_v8  ;;  %v7683_v13 = vld [vmem:[%s9982_s7 + $0x464] sm:$0xf]  ;;  %v7193_v8 = vld [vmem:[%s9982_s7 + $0x468] sm:$0xf0] }
 0x4d7   : > { %v7196_v22 = vor.u32 %v7683_v13, %v7193_v8  ;;  %v7699_v8 = vld [vmem:[%s9984_s9 + $0x64] sm:$0xf] }
 0x4d8   : > { %5027 = vmatpush.bf16.msra.mxu3 %v7064_v29  ;;  %5041 = vmatpush.bf16.msrb.mxu0 %v7068_v20  ;;  %v7188_v29 = vor.u32 %v7681_v43, %v7185_v40  ;;  %v7175_v20 = vld [vmem:[%s9982_s7 + $0x440] sm:$0xf]  ;;  %v7717_v43 = vld [vmem:[%s9984_s9 + $0xf4] sm:$0xf]  ;;  %v7329_v40 = vld [vmem:[%s9984_s9 + $0xf8] sm:$0xf0] }
 0x4da   : > { %4868 = vmatpush.bf16.msrb.mxu1 %v7032_v12  ;;  %4882 = vmatpush.bf16.msrb.mxu2 %v7036_v2  ;;  %v7176_v12 = vor.u32 %v7680_v57, %v7175_v20  ;;  %v7332_v57 = vor.u32 %v7717_v43, %v7329_v40 }
 0x4db   : > { %5028 = vmatmul.bf16.vlgmr.msra.gmra.mxu3 %v4938_v48  ;;  %5042 = vmatmul.bf16.vlgmr.msrb.gmra.mxu0 %v4938_v48  ;;  %v7161_v48 = vld [vmem:[%s9982_s7 + $0x428] sm:$0xf0] }
 0x4dc   : > { %v7164_v9 = vor.u32 %v7675_v32, %v7161_v48  ;;  %v7239_v48 = vld [vmem:[%s9984_s9 + $0x40] sm:$0xf] }
 0x4de   : > { %4869 = vmatpush.bf16.msrb.mxu1 %v7024_v5  ;;  %4883 = vmatpush.bf16.msrb.mxu2 %v7028_v46  ;;  %v7159_v5 = vld [vmem:[%s9982_s7 + $0x420] sm:$0xf]  ;;  %v7676_v46 = vld [vmem:[%s9982_s7 + $0x424] sm:$0xf0] }
 0x4df   : > { %v7160_v31 = vor.u32 %v7676_v46, %v7159_v5 }
 0x4e2   : > { %4870 = vmatpush.bf16.msrb.mxu1 %v7016_v3  ;;  %4884 = vmatpush.bf16.msrb.mxu2 %v7020_v18  ;;  %v7674_v3 = vld [vmem:[%s9982_s7 + $0x414] sm:$0xf0]  ;;  %v7673_v18 = vld [vmem:[%s9982_s7 + $0x414] sm:$0xf] }
 0x4e3   : > { %v7152_v37 = vor.u32 %v7674_v3, %v7151_v24  ;;  %v7241_v24 = vld [vmem:[%s9984_s9 + $0x48] sm:$0xf0] }
 0x4e6   : > { %4871 = vmatpush.bf16.msrb.mxu1 %v7008_v33  ;;  %4885 = vmatpush.bf16.msrb.mxu2 %v7012_v17  ;;  %v7156_v33 = vor.u32 %v7673_v18, %v7153_v21  ;;  %v7143_v17 = vld [vmem:[%s9982_s7 + $0x400] sm:$0xf] }
 0x4ea   : > { %4872 = vmatpush.bf16.msrb.mxu1 %v7000_v28  ;;  %4886 = vmatpush.bf16.msrb.mxu2 %v7004_v53  ;;  %v7144_v28 = vor.u32 %v7672_v25, %v7143_v17  ;;  %v7148_v53 = vor.u32 %v7671_v6, %v7145_v34  ;;  %v7714_v17 = vld [vmem:[%s9984_s9 + $0xd4] sm:$0xf0]  ;;  %v7713_v25 = vld [vmem:[%s9984_s9 + $0xd4] sm:$0xf] }
 0x4ee   : > { %4873 = vmatpush.bf16.msrb.mxu1 %v6992_v10  ;;  %4887 = vmatpush.bf16.msrb.mxu2 %v6996_v0 }
 0x4f2   : > { %4874 = vmatpush.bf16.msrb.mxu1 %v6984_v15  ;;  %4888 = vmatpush.bf16.msrb.mxu2 %v6988_v27  ;;  %v7701_v15 = vld [vmem:[%s9984_s9 + $0x74] sm:$0xf]  ;;  %v7264_v27 = vor.u32 %v7702_v47, %v7263_v62  ;;  %v7233_v47 = vld [vmem:[%s9984_s9 + $0x38] sm:$0xf0] }
 0x4f3   : > { %v7693_v62 = vld [vmem:[%s9984_s9 + $0x34] sm:$0xf] }
 0x4f4   : > { %5403 = vmatpush.bf16.msrb.mxu3 %v7264_v27  ;;  %v7236_v27 = vor.u32 %v7693_v62, %v7233_v47 }
 0x4f5   : > { %4875 = vmatmul.bf16.vlgmr.msrb.gmra.mxu1 %v9295_v59  ;;  %4889 = vmatmul.bf16.vlgmr.msrb.gmra.mxu2 %v9295_v59  ;;  %v7177_v59 = vld [vmem:[%s9982_s7 + $0x448] sm:$0xf0] }
 0x4f6   : > { %5157 = vmatpush.bf16.msra.mxu1 %v7200_v55  ;;  %5171 = vmatpush.bf16.msra.mxu2 %v7204_v52  ;;  %v7180_v2 = vor.u32 %v7679_v19, %v7177_v59  ;;  %v7265_v55 = vld [vmem:[%s9984_s9 + $0x78] sm:$0xf0]  ;;  %v7255_v52 = vld [vmem:[%s9984_s9 + $0x60] sm:$0xf]  ;;  %v7247_v19 = vld [vmem:[%s9984_s9 + $0x50] sm:$0xf] }
 0x4f7   : > { %v7268_v13 = vor.u32 %v7701_v15, %v7265_v55  ;;  %v7256_v14 = vor.u32 %v7700_v61, %v7255_v52  ;;  %v7698_v59 = vld [vmem:[%s9984_s9 + $0x54] sm:$0xf0]  ;;  %v7303_v15 = vld [vmem:[%s9984_s9 + $0xc0] sm:$0xf]  ;;  %v7712_v55 = vld [vmem:[%s9984_s9 + $0xc4] sm:$0xf0] }
 0x4f8   : > { %v7248_v5 = vor.u32 %v7698_v59, %v7247_v19  ;;  %v7711_v52 = vld [vmem:[%s9984_s9 + $0xc4] sm:$0xf]  ;;  %v7305_v61 = vld [vmem:[%s9984_s9 + $0xc8] sm:$0xf0]  ;;  %v7295_v19 = vld [vmem:[%s9984_s9 + $0xb0] sm:$0xf] }
 0x4f9   : > { %5404 = vmatpush.bf16.msrb.mxu3 %v7256_v14  ;;  %v7692_v14 = vld [vmem:[%s9984_s9 + $0x24] sm:$0xf0]  ;;  %v7710_v59 = vld [vmem:[%s9984_s9 + $0xb4] sm:$0xf0] }
 0x4fa   : > { %5158 = vmatpush.bf16.msra.mxu1 %v7192_v38  ;;  %5172 = vmatpush.bf16.msra.mxu2 %v7196_v22  ;;  %v7257_v38 = vld [vmem:[%s9984_s9 + $0x68] sm:$0xf0]  ;;  %v7327_v22 = vld [vmem:[%s9984_s9 + $0xf0] sm:$0xf]  ;;  %v7296_v41 = vor.u32 %v7710_v59, %v7295_v19 }
 0x4fb   : > { %v7328_v20 = vor.u32 %v7718_v60, %v7327_v22  ;;  %v7223_v22 = vld [vmem:[%s9984_s9 + $0x20] sm:$0xf]  ;;  %v7691_v60 = vld [vmem:[%s9984_s9 + $0x24] sm:$0xf] }
 0x4fc   : > { %v7224_v40 = vor.u32 %v7692_v14, %v7223_v22 }
 0x4fd   : > { %5417 = vmatpush.bf16.msra.mxu0 %v7328_v20  ;;  %5405 = vmatpush.bf16.msrb.mxu3 %v7248_v5 }
 0x4fe   : > { %5159 = vmatpush.bf16.msra.mxu1 %v7184_v63  ;;  %5173 = vmatpush.bf16.msra.mxu2 %v7188_v29  ;;  %v7260_v29 = vor.u32 %v7699_v8, %v7257_v38  ;;  %v7308_v8 = vor.u32 %v7711_v52, %v7305_v61  ;;  %v7703_v61 = vld [vmem:[%s9984_s9 + $0x84] sm:$0xf] }
 0x501   : > { %5418 = vmatpush.bf16.msra.mxu0 %v7320_v42  ;;  %v7215_v42 = vld [vmem:[%s9984_s9 + $0x10] sm:$0xf] }
 0x502   : > { %5160 = vmatpush.bf16.msra.mxu1 %v7176_v12  ;;  %5174 = vmatpush.bf16.msra.mxu2 %v7180_v2  ;;  %v7697_v12 = vld [vmem:[%s9984_s9 + $0x54] sm:$0xf]  ;;  %v7249_v2 = vld [vmem:[%s9984_s9 + $0x58] sm:$0xf0] }
 0x503   : > { %v7252_v32 = vor.u32 %v7697_v12, %v7249_v2  ;;  %v7709_v12 = vld [vmem:[%s9984_s9 + $0xb4] sm:$0xf] }
 0x504   : > { %v7300_v5 = vor.u32 %v7709_v12, %v7297_v7 }
 0x506   : > { %5161 = vmatpush.bf16.msra.mxu1 %v7168_v16  ;;  %5175 = vmatpush.bf16.msra.mxu2 %v7172_v54  ;;  %v7715_v16 = vld [vmem:[%s9984_s9 + $0xe4] sm:$0xf]  ;;  %v7321_v54 = vld [vmem:[%s9984_s9 + $0xe8] sm:$0xf0] }
 0x507   : > { %v7324_v46 = vor.u32 %v7715_v16, %v7321_v54  ;;  %v7690_v16 = vld [vmem:[%s9984_s9 + $0x14] sm:$0xf0] }
 0x50a   : > { %5162 = vmatpush.bf16.msra.mxu1 %v7160_v31  ;;  %5176 = vmatpush.bf16.msra.mxu2 %v7164_v9  ;;  %v7696_v31 = vld [vmem:[%s9984_s9 + $0x44] sm:$0xf0]  ;;  %v7695_v9 = vld [vmem:[%s9984_s9 + $0x44] sm:$0xf] }
 0x50b   : > { %v7240_v21 = vor.u32 %v7696_v31, %v7239_v48  ;;  %v7244_v51 = vor.u32 %v7695_v9, %v7241_v24  ;;  %v7217_v48 = vld [vmem:[%s9984_s9 + $0x18] sm:$0xf0]  ;;  %v7287_v31 = vld [vmem:[%s9984_s9 + $0xa0] sm:$0xf]  ;;  %v7289_v24 = vld [vmem:[%s9984_s9 + $0xa8] sm:$0xf0] }
 0x50d   : > { %5406 = vmatpush.bf16.msrb.mxu3 %v7240_v21 }
 0x50e   : > { %5163 = vmatpush.bf16.msra.mxu1 %v7152_v37  ;;  %5177 = vmatpush.bf16.msra.mxu2 %v7156_v33  ;;  %v7311_v33 = vld [vmem:[%s9984_s9 + $0xd0] sm:$0xf] }
 0x50f   : > { %v7312_v1 = vor.u32 %v7714_v17, %v7311_v33 }
 0x511   : > { %5419 = vmatpush.bf16.msra.mxu0 %v7312_v1 }
 0x512   : > { %5164 = vmatpush.bf16.msra.mxu1 %v7144_v28  ;;  %5178 = vmatpush.bf16.msra.mxu2 %v7148_v53  ;;  %v7313_v28 = vld [vmem:[%s9984_s9 + $0xd8] sm:$0xf0]  ;;  %v7231_v53 = vld [vmem:[%s9984_s9 + $0x30] sm:$0xf] }
 0x513   : > { %v7316_v35 = vor.u32 %v7713_v25, %v7313_v28  ;;  %v7207_v28 = vld [vmem:[%s9984_s9] sm:$0xf] }
 0x515   : > { %5165 = vmatmul.bf16.vlgmr.msra.gmra.mxu1 %v5075_v26  ;;  %5179 = vmatmul.bf16.vlgmr.msra.gmra.mxu2 %v5075_v26  ;;  %v7232_v26 = vor.u32 %v7694_v58, %v7231_v53  ;;  %v7688_v53 = vld [vmem:[%s9984_s9 + $0x4] sm:$0xf0] }
 0x516   : > { %5431 = vmatpush.bf16.msrb.mxu1 %v7268_v13  ;;  %5445 = vmatpush.bf16.msrb.mxu2 %v7332_v57  ;;  %v7304_v13 = vor.u32 %v7712_v55, %v7303_v15  ;;  %v7705_v15 = vld [vmem:[%s9984_s9 + $0x94] sm:$0xf]  ;;  %v7271_v55 = vld [vmem:[%s9984_s9 + $0x80] sm:$0xf] }
 0x517   : > { %5407 = vmatpush.bf16.msrb.mxu3 %v7232_v26  ;;  %v7706_v26 = vld [vmem:[%s9984_s9 + $0x94] sm:$0xf0] }
 0x518   : > { %v9713_v49 = vpop.f32.mrf.mxu0  ;;  %5420 = vmatpush.bf16.msra.mxu0 %v7304_v13  ;;  %v7273_v13 = vld [vmem:[%s9984_s9 + $0x88] sm:$0xf0] }
 0x51a   : > { %5432 = vmatpush.bf16.msrb.mxu1 %v7260_v29  ;;  %5446 = vmatpush.bf16.msrb.mxu2 %v7324_v46  ;;  %v7225_v29 = vld [vmem:[%s9984_s9 + $0x28] sm:$0xf0]  ;;  %v7216_v46 = vor.u32 %v7690_v16, %v7215_v42 }
 0x51b   : > { %v7228_v20 = vor.u32 %v7691_v60, %v7225_v29  ;;  %5408 = vmatpush.bf16.msrb.mxu3 %v7224_v40 }
 0x51c   : > { %5421 = vmatpush.bf16.msra.mxu0 %v7296_v41 }
 0x51e   : > { %v9707_v45 = vpop.f32.mrf.mxu3  ;;  %5433 = vmatpush.bf16.msrb.mxu1 %v7252_v32  ;;  %5447 = vmatpush.bf16.msrb.mxu2 %v7316_v35  ;;  %v7689_v32 = vld [vmem:[%s9984_s9 + $0x14] sm:$0xf]  ;;  %v7208_v35 = vor.u32 %v7688_v53, %v7207_v28 }
 0x51f   : > { %v7220_v9 = vor.u32 %v7689_v32, %v7217_v48  ;;  %5409 = vmatpush.bf16.msrb.mxu3 %v7216_v46 }
 0x520   : > { %v9739_v30 = vpop.f32.mrf.mxu0 }
 0x522   : > { %5434 = vmatpush.bf16.msrb.mxu1 %v7244_v51  ;;  %5448 = vmatpush.bf16.msrb.mxu2 %v7308_v8 }
 0x523   : > { %5410 = vmatpush.bf16.msrb.mxu3 %v7208_v35 }
 0x526   : > { %v9715_v36 = vpop.f32.mrf.mxu3  ;;  %5435 = vmatpush.bf16.msrb.mxu1 %v7236_v27  ;;  %5449 = vmatpush.bf16.msrb.mxu2 %v7300_v5  ;;  %v7281_v27 = vld [vmem:[%s9984_s9 + $0x98] sm:$0xf0] }
 0x52a   : > { %5436 = vmatpush.bf16.msrb.mxu1 %v7228_v20  ;;  %v7276_v20 = vor.u32 %v7703_v61, %v7273_v13 }
 0x52c   : > { %v9799_v3 = vpop.f32.mrf.mxu0 }
 0x52e   : > { %5437 = vmatpush.bf16.msrb.mxu1 %v7220_v9 }
 0x532   : > { %v9701_v23 = vpop.f32.mrf.mxu1  ;;  %v9759_v63 = vpop.f32.mrf.mxu3 }
 0x533   : > { %v4186_v54 = vadd.f32 %v9707_v45, %v9701_v23  ;;  %v7708_v23 = vld [vmem:[%s9984_s9 + $0xa4] sm:$0xf0]  ;;  %v7707_v45 = vld [vmem:[%s9984_s9 + $0xa4] sm:$0xf] }
 0x534   : > { %v9816_v6 = vpop.f32.mrf.mxu0  ;;  %v7288_v51 = vor.u32 %v7708_v23, %v7287_v31  ;;  %v7292_v33 = vor.u32 %v7707_v45, %v7289_v24 }
 0x536   : > { %5422 = vmatpush.bf16.msra.mxu0 %v7288_v51  ;;  %5450 = vmatpush.bf16.msrb.mxu2 %v7292_v33 }
 0x538   : > { %v9703_v10 = vpop.f32.mrf.mxu2 }
 0x539   : > { %v4200_v58 = vadd.f32 %v9713_v49, %v9703_v10 }
 0x53a   : > { %v9705_v0 = vpop.f32.mrf.mxu1  ;;  %v9803_v4 = vpop.f32.mrf.mxu3 }
 0x53b   : > { %v4188_v1 = vadd.f32 %v9715_v36, %v9705_v0  ;;  %v7209_v0 = vld [vmem:[%s9984_s9 + $0x8] sm:$0xf0]  ;;  %v7279_v36 = vld [vmem:[%s9984_s9 + $0x90] sm:$0xf] }
 0x53c   : > { %v9874_v2 = vpop.f32.mrf.mxu0  ;;  %v7280_v49 = vor.u32 %v7706_v26, %v7279_v36  ;;  %v7862_v26 = vmov 0.0  }
 0x53d   : > { %5459 = vst [vmem:[%s403_s20] sm:$0xff] %v7862_v26 }
 0x53e   : > { %5423 = vmatpush.bf16.msra.mxu0 %v7280_v49  ;;  %5460 = vst [vmem:[%s403_s20 + $0x8] sm:$0xff] %v7862_v26 }
 0x540   : > { %v9709_v50 = vpop.f32.mrf.mxu2 }
 0x541   : > { %v4202_v40 = vadd.f32 %v9739_v30, %v9709_v50 }
 0x542   : > { %v9711_v39 = vpop.f32.mrf.mxu1  ;;  %v9847_v38 = vpop.f32.mrf.mxu3 }
 0x543   : > { %v4337_v21 = vadd.f32 %v9711_v39, %v4186_v54  ;;  %v7687_v39 = vld [vmem:[%s9984_s9 + $0x4] sm:$0xf] }
 0x544   : > { %v7212_v10 = vor.u32 %v7687_v39, %v7209_v0  ;;  %v4758_v14 = vpop.f32.mrf.mxu0 }
 0x545   : > { %v4471_v47 = vadd.f32 %v9759_v63, %v4337_v21  ;;  %v7704_v63 = vld [vmem:[%s9984_s9 + $0x84] sm:$0xf0] }
 0x546   : > { %5438 = vmatpush.bf16.msrb.mxu1 %v7212_v10  ;;  %v7272_v60 = vor.u32 %v7704_v63, %v7271_v55 }
 0x548   : > { %v9717_v56 = vpop.f32.mrf.mxu2  ;;  %5424 = vmatpush.bf16.msra.mxu0 %v7272_v60 }
 0x549   : > { %v4338_v8 = vadd.f32 %v9717_v56, %v4200_v58 }
 0x54a   : > { %v9719_v11 = vpop.f32.mrf.mxu1  ;;  %v4744_v17 = vpop.f32.mrf.mxu3 }
 0x54b   : > { %v4339_v62 = vadd.f32 %v9719_v11, %v4188_v1  ;;  %v7284_v11 = vor.u32 %v7705_v15, %v7281_v27  ;;  %v4472_v12 = vadd.f32 %v9799_v3, %v4338_v8 }
 0x54d   : > { %v4473_v29 = vadd.f32 %v9803_v4, %v4339_v62  ;;  %5451 = vmatpush.bf16.msrb.mxu2 %v7284_v11  ;;  %v5237_v62 = vld [vmem:[%s9985_s10] sm:$0x3] }
 0x54e   : > { %v5240_v27 = vperm.slane %v5237_v62, 1 }
 0x550   : > { %v9779_v44 = vpop.f32.mrf.mxu2 }
 0x551   : > { %v4340_v59 = vadd.f32 %v9779_v44, %v4202_v40  ;;  %5452 = vmatpush.bf16.msrb.mxu2 %v7276_v20  ;;  %v5189_v44 = vld [vmem:[%s9983_s8] sm:$0x3] }
 0x552   : > { %v9801_v18 = vpop.f32.mrf.mxu1  ;;  %v5191_v46 = vperm.slane %v5189_v44, 0  ;;  %v5192_v51 = vperm.slane %v5189_v44, 1 }
 0x553   : > { %v4624_v22 = vadd.f32 %v9801_v18, %v4471_v47  ;;  %v4474_v30 = vadd.f32 %v9816_v6, %v4340_v59  ;;  %v5239_v47 = vperm.slane %v5237_v62, 0 }
 0x555   : > { %v4761_v18 = vadd.f32 %v9847_v38, %v4624_v22 }
 0x558   : > { %v9805_v37 = vpop.f32.mrf.mxu2  ;;  %v5043_v16 = vpop.f32.mrf.mxu0 }
 0x559   : > { %v4625_v7 = vadd.f32 %v9805_v37, %v4472_v12 }
 0x55a   : > { %v9818_v34 = vpop.f32.mrf.mxu1 }
 0x55b   : > { %v4626_v56 = vadd.f32 %v9818_v34, %v4473_v29  ;;  %v4762_v34 = vadd.f32 %v9874_v2, %v4625_v7 }
 0x55d   : > { %v4763_v4 = vadd.f32 %v4744_v17, %v4626_v56 }
 0x55e   : > { %v5029_v19 = vpop.f32.mrf.mxu3 }
 0x560   : > { %v9858_v43 = vpop.f32.mrf.mxu2 }
 0x561   : > { %v4627_v3 = vadd.f32 %v9858_v43, %v4474_v30  ;;  %v5045_v43 = vpop.f32.mrf.mxu0 }
 0x563   : > { %v4764_v48 = vadd.f32 %v4758_v14, %v4627_v3 }
 0x572   : > { %v9863_v57 = vpop.f32.mrf.mxu1 }
 0x573   : > { %v4895_v42 = vadd.f32 %v9863_v57, %v4761_v18  ;;  %v5031_v57 = vpop.f32.mrf.mxu3 }
 0x575   : > { %v5048_v54 = vadd.f32 %v5029_v19, %v4895_v42 }
 0x578   : > { %v4890_v25 = vpop.f32.mrf.mxu2 }
 0x579   : > { %v4896_v5 = vadd.f32 %v4890_v25, %v4762_v34 }
 0x57a   : > { %v4878_v52 = vpop.f32.mrf.mxu1 }
 0x57b   : > { %v4897_v38 = vadd.f32 %v4878_v52, %v4763_v4  ;;  %v5049_v45 = vadd.f32 %v5043_v16, %v4896_v5 }
 0x57d   : > { %v5050_v31 = vadd.f32 %v5031_v57, %v4897_v38 }
 0x580   : > { %v4892_v41 = vpop.f32.mrf.mxu2 }
 0x581   : > { %v4898_v9 = vadd.f32 %v4892_v41, %v4764_v48 }
 0x583   : > { %v5051_v1 = vadd.f32 %v5045_v43, %v4898_v9 }
 0x592   : > { %v5166_v50 = vpop.f32.mrf.mxu1 }
 0x593   : > { %v5185_v37 = vadd.f32 %v5166_v50, %v5048_v54 }
 0x595   : > { %v5195_v23 = vadd.f32 %v5191_v46, %v5185_v37 }
 0x597   : > { %v5199_v2 = vmax.f32 %v5195_v23, 0.0 }
 0x598   : > { %v5180_v32 = vpop.f32.mrf.mxu2 }
 0x599   : > { %v5186_v21 = vadd.f32 %v5180_v32, %v5049_v45 }
 0x59a   : > { %v5168_v6 = vpop.f32.mrf.mxu1 }
 0x59b   : > { %v5187_v24 = vadd.f32 %v5168_v6, %v5050_v31  ;;  %v5196_v28 = vadd.f32 %v5192_v51, %v5186_v21 }
 0x59d   : > { %v5197_v33 = vadd.f32 %v5191_v46, %v5187_v24  ;;  %v5200_v35 = vmax.f32 %v5196_v28, 0.0 }
 0x59f   : > { %v5201_v17 = vmax.f32 %v5197_v33, 0.0 }
 0x5a0   : > { %v5182_v25 = vpop.f32.mrf.mxu2 }
 0x5a1   : > { %v5203_v53 = vpack.c.bf16 %v5201_v17, %v5199_v2  ;;  %v5188_v39 = vadd.f32 %v5182_v25, %v5051_v1 }
 0x5a3   : > { %v5198_v58 = vadd.f32 %v5192_v51, %v5188_v39  ;;  %5411 = vmatmul.bf16.vlgmr.msrb.gmra.mxu3 %v5203_v53  ;;  %5439 = vmatmul.bf16.vlgmr.msrb.gmra.mxu1 %v5203_v53 }
 0x5a5   : > { %v5202_v0 = vmax.f32 %v5198_v58, 0.0 }
 0x5a7   : > { %v5204_v36 = vpack.c.bf16 %v5202_v0, %v5200_v35 }
 0x5a9   : > { %5425 = vmatmul.bf16.vlgmr.msra.gmra.mxu0 %v5204_v36  ;;  %5453 = vmatmul.bf16.vlgmr.msrb.gmra.mxu2 %v5204_v36 }
 0x620   : > { %v5440_v10 = vpop.f32.mrf.mxu1 }
 0x621   : > { %v5441_v11 = vadd.f32 %v5440_v10, %v5240_v27 }
 0x626   : > { %v5412_v49 = vpop.f32.mrf.mxu3  ;;  %v5426_v15 = vpop.f32.mrf.mxu0 }
 0x627   : > { %v5413_v55 = vadd.f32 %v5412_v49, %v5239_v47 }
 0x628   : > { %v5442_v22 = vpop.f32.mrf.mxu1 }
 0x629   : > { %v5427_v52 = vadd.f32 %v5426_v15, %v5413_v55  ;;  %v5443_v40 = vadd.f32 %v5442_v22, %v5240_v27 }
 0x62b   : > { %5461 = vst [vmem:[%s403_s20] sm:$0x3] %v5427_v52 }
 0x62c   : > { %v5454_v63 = vpop.f32.mrf.mxu2 }
 0x62d   : > { %v5455_v61 = vadd.f32 %v5454_v63, %v5441_v11 }
 0x62e   : > { %v5414_v13 = vpop.f32.mrf.mxu3  ;;  %v5428_v14 = vpop.f32.mrf.mxu0 }
 0x62f   : > { %5462 = vst [vmem:[%s403_s20 + $0x8] sm:$0x3] %v5455_v61  ;;  %v5415_v8 = vadd.f32 %v5414_v13, %v5239_v47 }
 0x631   : > { %v5429_v60 = vadd.f32 %v5428_v14, %v5415_v8 }
 0x633   : > { %v5465_v29 = vrot.slane %v5429_v60, 6 }
 0x634   : > { %v5456_v20 = vpop.f32.mrf.mxu2 }
 0x635   : > { %5469 = vst [vmem:[%s403_s20] sm:$0xc] %v5465_v29  ;;  %v5457_v19 = vadd.f32 %v5456_v20, %v5443_v40 }
 0x637   : > { %v5466_v59 = vrot.slane %v5457_v19, 6 }
 0x639   : > { %5470 = vst [vmem:[%s403_s20 + $0x8] sm:$0xc] %v5466_v59 }
 0x63a PF: > { %s22_s17 = sadd.s32 1, %s7856_s17  }
 0x63b   : > { %p19_p7 = scmp.ge.s32.totalorder %s22_s17, 4  }
 0x63d   :  { %21 = sbr.rel (!%p19_p7) target bundleno = 1 (0x1), region = 158 }
 0x642   :  { %5492 = vsyncpa [#allocation7], 1 }
 0x643   :  { %5494 = vsyncpa [#allocation7 + $0x1], 1 }

</bundles_post_ra>
